<compile_context>
chip_gen: v7x
topology: tpu7x:2x2x1
jax: 0.10.0
libtpu: 0.0.40
codegen_flags: <defaults>
</compile_context>

<pallas_src>
import functools
import math

import jax
import jax.numpy as jnp
from jax.experimental import pallas as pl
from jax.experimental.pallas import tpu as pltpu


def _gelu_tanh(z):
    # tanh-approx GELU (EUP-friendly inside the kernel), f32.
    c = math.sqrt(2.0 / math.pi)
    return 0.5 * z * (1.0 + jnp.tanh(c * (z + 0.044715 * z * z * z)))


def combiner_kernel(x_ref, wbbT_ref, bbbT_ref, corr_ref, w1_ref, b1_ref,
                    w2_ref, b2_ref, out_ref, acc_ref, *, t_true):
    # x_ref : (bB, F, tT) f32  NCL tile (streamed)    wbbT: (Ep, F) f32 (resident)
    # bbbT  : (Ep, 1) f32                             corr: (1, Ep) f32 = (Tp-T)*relu(bbb)
    # w1    : (Ep, Hp) f32   b1: (1, Hp) f32          w2  : (Hp, Kp) f32   b2: (1, Kp) f32
    # out   : (bB, Kp) f32                            acc : (bB, Ep) f32 scratch
    t_idx = pl.program_id(1)

    @pl.when(t_idx == 0)
    def _init():
        acc_ref[...] = jnp.zeros_like(acc_ref)

    bB, _, tT = x_ref.shape
    wbbT = wbbT_ref[...]
    bbbT = bbbT_ref[...]
    ones_row = jnp.ones((1, tT), jnp.float32)

    rows = []
    for b in range(bB):  # static unroll; bB is small (<= 8)
        # Backbone linear in MXU-native orientation: (Ep, F) @ (F, tT) -> (Ep, tT).
        hb = jnp.dot(wbbT, x_ref[b], preferred_element_type=jnp.float32)
        hb = jnp.maximum(hb + bbbT, 0.0)                      # bias + ReLU (f32)
        # Time pooling as a matmul against a ones row: output is already a (1, Ep) row,
        # so the accumulator stays in the natural (bB, Ep) orientation.
        pooled = jax.lax.dot_general(
            ones_row, hb,
            dimension_numbers=(((1,), (1,)), ((), ())),
            preferred_element_type=jnp.float32)               # (1, Ep)
        rows.append(pooled)
    acc_ref[...] += jnp.concatenate(rows, axis=0)             # running pooled sum

    # ---- head (runs once, after the last time tile) ----
    @pl.when(t_idx == pl.num_programs(1) - 1)
    def _finalize():
        # Remove the padded-frame contribution (pad value 0 + ReLU => relu(bbb) each),
        # then fold mean pooling into one scalar multiply.
        emb = (acc_ref[...] - corr_ref[...]) * (1.0 / t_true)             # (bB, Ep)
        z = jnp.dot(emb, w1_ref[...], preferred_element_type=jnp.float32) + b1_ref[...]
        z = _gelu_tanh(z)
        out = jnp.dot(z, w2_ref[...], preferred_element_type=jnp.float32) + b2_ref[...]
        out_ref[...] = out.astype(out_ref.dtype)


def _round_up(v, m):
    return ((v + m - 1) // m) * m


def combiner_forward(x_bft, params, *, b_tile=8, max_t_tile=512):
    """x_bft: (B, F, T) float32 (PyTorch NCL layout). Returns (B, K) float32.

    VMEM footprint per step is ~2 * b_tile*F*t_tile*4 bytes for the double-buffered x
    tile plus an (Ep, t_tile) f32 intermediate and the resident weights — a few MiB at
    the defaults, well under the 48 MiB limit below (v7x has 64 MiB physical VMEM, so
    never plan past ~56 MiB there; v5e/v6e can go higher if tiles are grown further).
    """
    wbb, bbb, w1, b1, w2, b2 = params
    B, F, T = x_bft.shape
    E, H, K = wbb.shape[1], w1.shape[1], w2.shape[1]

    b_tile = min(b_tile, B)          # keep >= 2 batch tiles when B allows (v7x megacore)
    Bp = _round_up(B, b_tile)

    # Time tiling: whole clip in one tile when it fits (trailing block dim == full dim is
    # legal), otherwise 128-aligned tiles of max_t_tile frames.
    if T <= max_t_tile:
        t_tile, Tp = T, T
    else:
        t_tile = max_t_tile          # multiple of 128 (required when t_tile != Tp)
        Tp = _round_up(T, t_tile)

    Ep, Hp, Kp = _round_up(E, 128), _round_up(H, 128), _round_up(K, 128)

    x_p = x_bft
    if (Bp, Tp) != (B, T):
        # Single fused pad pass; only taken when the tiling actually requires padding.
        x_p = jnp.pad(x_bft, ((0, Bp - B), (0, 0), (0, Tp - T)))

    # Weights are tiny: pad model dims lane-dense (x128) once; F stays unpadded.
    wbbT_p = jnp.zeros((Ep, F), jnp.float32).at[:E, :].set(wbb.T)
    bbbT_p = jnp.zeros((Ep, 1), jnp.float32).at[:E, :].set(bbb.reshape(E, 1))
    corr_p = (Tp - T) * jnp.zeros((1, Ep), jnp.float32).at[:, :E].set(
        jnp.maximum(bbb.reshape(1, E), 0.0))
    w1_p = jnp.zeros((Ep, Hp), jnp.float32).at[:E, :H].set(w1)
    b1_p = jnp.zeros((1, Hp), jnp.float32).at[:, :H].set(b1.reshape(1, H))
    w2_p = jnp.zeros((Hp, Kp), jnp.float32).at[:H, :K].set(w2)
    b2_p = jnp.zeros((1, Kp), jnp.float32).at[:, :K].set(b2.reshape(1, K))

    grid = (Bp // b_tile, Tp // t_tile)
    kernel = functools.partial(combiner_kernel, t_true=T)

    flops = (2 * Bp * Tp * F * Ep          # backbone matmuls
             + 2 * Bp * Tp * Ep            # pooling matmuls
             + 2 * Bp * (Ep * Hp + Hp * Kp))
    bytes_accessed = int(x_p.size * 4
                         + (wbbT_p.size + bbbT_p.size + corr_p.size
                            + w1_p.size + b1_p.size + w2_p.size + b2_p.size) * 4
                         + Bp * Kp * 4)

    out_p = pl.pallas_call(
        kernel,
        out_shape=jax.ShapeDtypeStruct((Bp, Kp), jnp.float32),
        grid_spec=pltpu.PrefetchScalarGridSpec(
            num_scalar_prefetch=0,
            grid=grid,
            in_specs=[
                pl.BlockSpec((b_tile, F, t_tile), lambda b, t: (b, 0, t)),  # x (NCL)
                pl.BlockSpec((Ep, F), lambda b, t: (0, 0)),                 # wbb^T
                pl.BlockSpec((Ep, 1), lambda b, t: (0, 0)),                 # bbb (col)
                pl.BlockSpec((1, Ep), lambda b, t: (0, 0)),                 # pad corr
                pl.BlockSpec((Ep, Hp), lambda b, t: (0, 0)),                # w1
                pl.BlockSpec((1, Hp), lambda b, t: (0, 0)),                 # b1
                pl.BlockSpec((Hp, Kp), lambda b, t: (0, 0)),                # w2
                pl.BlockSpec((1, Kp), lambda b, t: (0, 0)),                 # b2
            ],
            out_specs=pl.BlockSpec((b_tile, Kp), lambda b, t: (b, 0)),
            scratch_shapes=[pltpu.VMEM((b_tile, Ep), jnp.float32)],
        ),
        compiler_params=pltpu.CompilerParams(
            dimension_semantics=("parallel", "arbitrary"),
            vmem_limit_bytes=48 * 1024 * 1024,
        ),
        cost_estimate=pl.CostEstimate(
            flops=flops, transcendentals=Bp * Hp, bytes_accessed=bytes_accessed),
    )(x_p, wbbT_p, bbbT_p, corr_p, w1_p, b1_p, w2_p, b2_p)

    return out_p[:B, :K]


def reference_forward(x_bft, params):
    # Pure-JAX mirror of the fused forward (f32 throughout).
    wbb, bbb, w1, b1, w2, b2 = params
    h = jnp.einsum("bft,fe->bte", x_bft, wbb, preferred_element_type=jnp.float32)
    h = jnp.maximum(h + bbb[None, :, :], 0.0)
    emb = jnp.mean(h, axis=1)
    z = _gelu_tanh(jnp.dot(emb, w1, preferred_element_type=jnp.float32) + b1)
    return jnp.dot(z, w2, preferred_element_type=jnp.float32) + b2


def make_params(key, F, E, H, K):
    k1, k2, k3, k4, k5, k6 = jax.random.split(key, 6)
    wbb = jax.random.normal(k1, (F, E), jnp.float32) * (1.0 / math.sqrt(F))
    bbb = 0.1 * jax.random.normal(k4, (1, E), jnp.float32)
    w1 = jax.random.normal(k2, (E, H), jnp.float32) * (1.0 / math.sqrt(E))
    b1 = 0.1 * jax.random.normal(k5, (1, H), jnp.float32)
    w2 = jax.random.normal(k3, (H, K), jnp.float32) * (1.0 / math.sqrt(H))
    b2 = 0.1 * jax.random.normal(k6, (1, K), jnp.float32)
    return (wbb, bbb, w1, b1, w2, b2)


if __name__ == "__main__":
    # Small but representative: fbank F=80 (no 128-padding needed/used) and T=200;
    # E/H/K lane-dense.  B=16 with b_tile=8 keeps 2 batch tiles for v7x megacore.
    B, F, T = 16, 80, 200        # batch, fbank feature dim, time frames (NCL input)
    E, H, K = 128, 256, 128      # backbone embedding, head hidden, head output

    key = jax.random.PRNGKey(0)
    kx, kp = jax.random.split(key)
    x = jax.random.normal(kx, (B, F, T), jnp.float32)   # PyTorch NCL layout
    params = make_params(kp, F, E, H, K)

    ref = reference_forward(x, params)

    # Fast path: whole clip in one time tile -> x streamed straight from HBM,
    # zero wrapper layout passes.
    out = jax.block_until_ready(combiner_forward(x, params))
    assert out.shape == (B, K)
    assert jnp.allclose(out, ref, atol=5e-3, rtol=5e-3), "mismatch vs reference (1 tile)"

    # Multi-time-tile path: exercises the cross-tile accumulator and the
    # padded-frame finalize correction (Tp=256 > T=200).
    out2 = jax.block_until_ready(combiner_forward(x, params, max_t_tile=128))
    assert jnp.allclose(out2, ref, atol=5e-3, rtol=5e-3), "mismatch vs reference (tiled)"

    print("KERNEL_OK")
</pallas_src>

<mosaic_0001>
module attributes {stable_mosaic.version = 11 : i64} {
  func.func @combiner_kernel(%arg0: i32, %arg1: i32, %arg2: memref<8x80x200xf32, #tpu.memory_space<vmem>>, %arg3: memref<128x80xf32, #tpu.memory_space<vmem>>, %arg4: memref<128x1xf32, #tpu.memory_space<vmem>>, %arg5: memref<1x128xf32, #tpu.memory_space<vmem>>, %arg6: memref<128x256xf32, #tpu.memory_space<vmem>>, %arg7: memref<1x256xf32, #tpu.memory_space<vmem>>, %arg8: memref<256x128xf32, #tpu.memory_space<vmem>>, %arg9: memref<1x128xf32, #tpu.memory_space<vmem>>, %arg10: memref<8x128xf32, #tpu.memory_space<vmem>>, %arg11: memref<8x128xf32, #tpu.memory_space<vmem>>) attributes {dimension_semantics = [#tpu.dimension_semantics<parallel>, #tpu.dimension_semantics<arbitrary>], iteration_bounds = array<i64: 2, 1>, scalar_prefetch = 0 : i64, scratch_operands = 1 : i64, tpu.core_type = #tpu.core_type<tc>, window_params = [{transform_indices = @transform_0, window_bounds = array<i64: 8, 80, 200>}, {pipeline_mode = #tpu.pipeline_mode<synchronous>, transform_indices = @transform_1, window_bounds = array<i64: 128, 80>}, {pipeline_mode = #tpu.pipeline_mode<synchronous>, transform_indices = @transform_2, window_bounds = array<i64: 128, 1>}, {pipeline_mode = #tpu.pipeline_mode<synchronous>, transform_indices = @transform_3, window_bounds = array<i64: 1, 128>}, {pipeline_mode = #tpu.pipeline_mode<synchronous>, transform_indices = @transform_4, window_bounds = array<i64: 128, 256>}, {pipeline_mode = #tpu.pipeline_mode<synchronous>, transform_indices = @transform_5, window_bounds = array<i64: 1, 256>}, {pipeline_mode = #tpu.pipeline_mode<synchronous>, transform_indices = @transform_6, window_bounds = array<i64: 256, 128>}, {pipeline_mode = #tpu.pipeline_mode<synchronous>, transform_indices = @transform_7, window_bounds = array<i64: 1, 128>}, {transform_indices = @transform_8, window_bounds = array<i64: 8, 128>}]} {
    %c0_i32 = arith.constant 0 : i32
    %0 = arith.cmpi eq, %arg1, %c0_i32 : i32
    %1 = arith.extui %0 : i1 to i32
    %c0_i32_0 = arith.constant 0 : i32
    %2 = arith.cmpi ne, %1, %c0_i32_0 : i32
    scf.if %2 {
      %cst_51 = arith.constant 0.000000e+00 : f32
      %77 = vector.broadcast %cst_51 : f32 to vector<8x128xf32>
      %c0_52 = arith.constant 0 : index
      %c0_53 = arith.constant 0 : index
      %78 = vector.load %arg11[%c0_52, %c0_53] : memref<8x128xf32, #tpu.memory_space<vmem>>, vector<8x128xf32>
      tpu.vector_store %arg11[%c0_52, %c0_53], %77 {strides = array<i32>} : memref<8x128xf32, #tpu.memory_space<vmem>>, vector<8x128xf32>,
    } else {
    }
    %c0 = arith.constant 0 : index
    %c0_1 = arith.constant 0 : index
    %3 = vector.load %arg3[%c0, %c0_1] : memref<128x80xf32, #tpu.memory_space<vmem>>, vector<128x80xf32>
    %c0_2 = arith.constant 0 : index
    %c0_3 = arith.constant 0 : index
    %4 = vector.load %arg4[%c0_2, %c0_3] : memref<128x1xf32, #tpu.memory_space<vmem>>, vector<128x1xf32>
    %cst = arith.constant 1.000000e+00 : f32
    %5 = vector.broadcast %cst : f32 to vector<1x200xf32>
    %c0_4 = arith.constant 0 : index
    %c0_5 = arith.constant 0 : index
    %c0_6 = arith.constant 0 : index
    %6 = vector.load %arg2[%c0_4, %c0_5, %c0_6] : memref<8x80x200xf32, #tpu.memory_space<vmem>>, vector<1x80x200xf32>
    %7 = vector.shape_cast %6 : vector<1x80x200xf32> to vector<80x200xf32>
    %cst_7 = arith.constant dense<0.000000e+00> : vector<128x200xf32>
    %8 = tpu.matmul %3, %7, %cst_7 {dimension_numbers = #tpu.dot_dimension_numbers<[1], [0], [0], [1], [0, 0, 1, 1], [], []>} : vector<128x80xf32>, vector<80x200xf32>, vector<128x200xf32> -> vector<128x200xf32>
    %9 = vector.broadcast %4 : vector<128x1xf32> to vector<128x200xf32>
    %10 = arith.addf %8, %9 : vector<128x200xf32>
    %cst_8 = arith.constant 0.000000e+00 : f32
    %11 = vector.broadcast %cst_8 : f32 to vector<128x200xf32>
    %12 = arith.maximumf %10, %11 : vector<128x200xf32>
    %cst_9 = arith.constant dense<0.000000e+00> : vector<1x128xf32>
    %13 = tpu.matmul %5, %12, %cst_9 {dimension_numbers = #tpu.dot_dimension_numbers<[1], [1], [0], [0], [0, 0, 1, 0], [], []>} : vector<1x200xf32>, vector<128x200xf32>, vector<1x128xf32> -> vector<1x128xf32>
    %c1 = arith.constant 1 : index
    %c0_10 = arith.constant 0 : index
    %c0_11 = arith.constant 0 : index
    %14 = vector.load %arg2[%c1, %c0_10, %c0_11] : memref<8x80x200xf32, #tpu.memory_space<vmem>>, vector<1x80x200xf32>
    %15 = vector.shape_cast %14 : vector<1x80x200xf32> to vector<80x200xf32>
    %cst_12 = arith.constant dense<0.000000e+00> : vector<128x200xf32>
    %16 = tpu.matmul %3, %15, %cst_12 {dimension_numbers = #tpu.dot_dimension_numbers<[1], [0], [0], [1], [0, 0, 1, 1], [], []>} : vector<128x80xf32>, vector<80x200xf32>, vector<128x200xf32> -> vector<128x200xf32>
    %17 = vector.broadcast %4 : vector<128x1xf32> to vector<128x200xf32>
    %18 = arith.addf %16, %17 : vector<128x200xf32>
    %cst_13 = arith.constant 0.000000e+00 : f32
    %19 = vector.broadcast %cst_13 : f32 to vector<128x200xf32>
    %20 = arith.maximumf %18, %19 : vector<128x200xf32>
    %cst_14 = arith.constant dense<0.000000e+00> : vector<1x128xf32>
    %21 = tpu.matmul %5, %20, %cst_14 {dimension_numbers = #tpu.dot_dimension_numbers<[1], [1], [0], [0], [0, 0, 1, 0], [], []>} : vector<1x200xf32>, vector<128x200xf32>, vector<1x128xf32> -> vector<1x128xf32>
    %c2 = arith.constant 2 : index
    %c0_15 = arith.constant 0 : index
    %c0_16 = arith.constant 0 : index
    %22 = vector.load %arg2[%c2, %c0_15, %c0_16] : memref<8x80x200xf32, #tpu.memory_space<vmem>>, vector<1x80x200xf32>
    %23 = vector.shape_cast %22 : vector<1x80x200xf32> to vector<80x200xf32>
    %cst_17 = arith.constant dense<0.000000e+00> : vector<128x200xf32>
    %24 = tpu.matmul %3, %23, %cst_17 {dimension_numbers = #tpu.dot_dimension_numbers<[1], [0], [0], [1], [0, 0, 1, 1], [], []>} : vector<128x80xf32>, vector<80x200xf32>, vector<128x200xf32> -> vector<128x200xf32>
    %25 = vector.broadcast %4 : vector<128x1xf32> to vector<128x200xf32>
    %26 = arith.addf %24, %25 : vector<128x200xf32>
    %cst_18 = arith.constant 0.000000e+00 : f32
    %27 = vector.broadcast %cst_18 : f32 to vector<128x200xf32>
    %28 = arith.maximumf %26, %27 : vector<128x200xf32>
    %cst_19 = arith.constant dense<0.000000e+00> : vector<1x128xf32>
    %29 = tpu.matmul %5, %28, %cst_19 {dimension_numbers = #tpu.dot_dimension_numbers<[1], [1], [0], [0], [0, 0, 1, 0], [], []>} : vector<1x200xf32>, vector<128x200xf32>, vector<1x128xf32> -> vector<1x128xf32>
    %c3 = arith.constant 3 : index
    %c0_20 = arith.constant 0 : index
    %c0_21 = arith.constant 0 : index
    %30 = vector.load %arg2[%c3, %c0_20, %c0_21] : memref<8x80x200xf32, #tpu.memory_space<vmem>>, vector<1x80x200xf32>
    %31 = vector.shape_cast %30 : vector<1x80x200xf32> to vector<80x200xf32>
    %cst_22 = arith.constant dense<0.000000e+00> : vector<128x200xf32>
    %32 = tpu.matmul %3, %31, %cst_22 {dimension_numbers = #tpu.dot_dimension_numbers<[1], [0], [0], [1], [0, 0, 1, 1], [], []>} : vector<128x80xf32>, vector<80x200xf32>, vector<128x200xf32> -> vector<128x200xf32>
    %33 = vector.broadcast %4 : vector<128x1xf32> to vector<128x200xf32>
    %34 = arith.addf %32, %33 : vector<128x200xf32>
    %cst_23 = arith.constant 0.000000e+00 : f32
    %35 = vector.broadcast %cst_23 : f32 to vector<128x200xf32>
    %36 = arith.maximumf %34, %35 : vector<128x200xf32>
    %cst_24 = arith.constant dense<0.000000e+00> : vector<1x128xf32>
    %37 = tpu.matmul %5, %36, %cst_24 {dimension_numbers = #tpu.dot_dimension_numbers<[1], [1], [0], [0], [0, 0, 1, 0], [], []>} : vector<1x200xf32>, vector<128x200xf32>, vector<1x128xf32> -> vector<1x128xf32>
    %c4 = arith.constant 4 : index
    %c0_25 = arith.constant 0 : index
    %c0_26 = arith.constant 0 : index
    %38 = vector.load %arg2[%c4, %c0_25, %c0_26] : memref<8x80x200xf32, #tpu.memory_space<vmem>>, vector<1x80x200xf32>
    %39 = vector.shape_cast %38 : vector<1x80x200xf32> to vector<80x200xf32>
    %cst_27 = arith.constant dense<0.000000e+00> : vector<128x200xf32>
    %40 = tpu.matmul %3, %39, %cst_27 {dimension_numbers = #tpu.dot_dimension_numbers<[1], [0], [0], [1], [0, 0, 1, 1], [], []>} : vector<128x80xf32>, vector<80x200xf32>, vector<128x200xf32> -> vector<128x200xf32>
    %41 = vector.broadcast %4 : vector<128x1xf32> to vector<128x200xf32>
    %42 = arith.addf %40, %41 : vector<128x200xf32>
    %cst_28 = arith.constant 0.000000e+00 : f32
    %43 = vector.broadcast %cst_28 : f32 to vector<128x200xf32>
    %44 = arith.maximumf %42, %43 : vector<128x200xf32>
    %cst_29 = arith.constant dense<0.000000e+00> : vector<1x128xf32>
    %45 = tpu.matmul %5, %44, %cst_29 {dimension_numbers = #tpu.dot_dimension_numbers<[1], [1], [0], [0], [0, 0, 1, 0], [], []>} : vector<1x200xf32>, vector<128x200xf32>, vector<1x128xf32> -> vector<1x128xf32>
    %c5 = arith.constant 5 : index
    %c0_30 = arith.constant 0 : index
    %c0_31 = arith.constant 0 : index
    %46 = vector.load %arg2[%c5, %c0_30, %c0_31] : memref<8x80x200xf32, #tpu.memory_space<vmem>>, vector<1x80x200xf32>
    %47 = vector.shape_cast %46 : vector<1x80x200xf32> to vector<80x200xf32>
    %cst_32 = arith.constant dense<0.000000e+00> : vector<128x200xf32>
    %48 = tpu.matmul %3, %47, %cst_32 {dimension_numbers = #tpu.dot_dimension_numbers<[1], [0], [0], [1], [0, 0, 1, 1], [], []>} : vector<128x80xf32>, vector<80x200xf32>, vector<128x200xf32> -> vector<128x200xf32>
    %49 = vector.broadcast %4 : vector<128x1xf32> to vector<128x200xf32>
    %50 = arith.addf %48, %49 : vector<128x200xf32>
    %cst_33 = arith.constant 0.000000e+00 : f32
    %51 = vector.broadcast %cst_33 : f32 to vector<128x200xf32>
    %52 = arith.maximumf %50, %51 : vector<128x200xf32>
    %cst_34 = arith.constant dense<0.000000e+00> : vector<1x128xf32>
    %53 = tpu.matmul %5, %52, %cst_34 {dimension_numbers = #tpu.dot_dimension_numbers<[1], [1], [0], [0], [0, 0, 1, 0], [], []>} : vector<1x200xf32>, vector<128x200xf32>, vector<1x128xf32> -> vector<1x128xf32>
    %c6 = arith.constant 6 : index
    %c0_35 = arith.constant 0 : index
    %c0_36 = arith.constant 0 : index
    %54 = vector.load %arg2[%c6, %c0_35, %c0_36] : memref<8x80x200xf32, #tpu.memory_space<vmem>>, vector<1x80x200xf32>
    %55 = vector.shape_cast %54 : vector<1x80x200xf32> to vector<80x200xf32>
    %cst_37 = arith.constant dense<0.000000e+00> : vector<128x200xf32>
    %56 = tpu.matmul %3, %55, %cst_37 {dimension_numbers = #tpu.dot_dimension_numbers<[1], [0], [0], [1], [0, 0, 1, 1], [], []>} : vector<128x80xf32>, vector<80x200xf32>, vector<128x200xf32> -> vector<128x200xf32>
    %57 = vector.broadcast %4 : vector<128x1xf32> to vector<128x200xf32>
    %58 = arith.addf %56, %57 : vector<128x200xf32>
    %cst_38 = arith.constant 0.000000e+00 : f32
    %59 = vector.broadcast %cst_38 : f32 to vector<128x200xf32>
    %60 = arith.maximumf %58, %59 : vector<128x200xf32>
    %cst_39 = arith.constant dense<0.000000e+00> : vector<1x128xf32>
    %61 = tpu.matmul %5, %60, %cst_39 {dimension_numbers = #tpu.dot_dimension_numbers<[1], [1], [0], [0], [0, 0, 1, 0], [], []>} : vector<1x200xf32>, vector<128x200xf32>, vector<1x128xf32> -> vector<1x128xf32>
    %c7 = arith.constant 7 : index
    %c0_40 = arith.constant 0 : index
    %c0_41 = arith.constant 0 : index
    %62 = vector.load %arg2[%c7, %c0_40, %c0_41] : memref<8x80x200xf32, #tpu.memory_space<vmem>>, vector<1x80x200xf32>
    %63 = vector.shape_cast %62 : vector<1x80x200xf32> to vector<80x200xf32>
    %cst_42 = arith.constant dense<0.000000e+00> : vector<128x200xf32>
    %64 = tpu.matmul %3, %63, %cst_42 {dimension_numbers = #tpu.dot_dimension_numbers<[1], [0], [0], [1], [0, 0, 1, 1], [], []>} : vector<128x80xf32>, vector<80x200xf32>, vector<128x200xf32> -> vector<128x200xf32>
    %65 = vector.broadcast %4 : vector<128x1xf32> to vector<128x200xf32>
    %66 = arith.addf %64, %65 : vector<128x200xf32>
    %cst_43 = arith.constant 0.000000e+00 : f32
    %67 = vector.broadcast %cst_43 : f32 to vector<128x200xf32>
    %68 = arith.maximumf %66, %67 : vector<128x200xf32>
    %cst_44 = arith.constant dense<0.000000e+00> : vector<1x128xf32>
    %69 = tpu.matmul %5, %68, %cst_44 {dimension_numbers = #tpu.dot_dimension_numbers<[1], [1], [0], [0], [0, 0, 1, 0], [], []>} : vector<1x200xf32>, vector<128x200xf32>, vector<1x128xf32> -> vector<1x128xf32>
    %c0_45 = arith.constant 0 : index
    %c0_46 = arith.constant 0 : index
    %70 = vector.load %arg11[%c0_45, %c0_46] : memref<8x128xf32, #tpu.memory_space<vmem>>, vector<8x128xf32>
    %71 = tpu.concatenate %13, %21, %29, %37, %45, %53, %61, %69 in 0 : vector<1x128xf32>, vector<1x128xf32>, vector<1x128xf32>, vector<1x128xf32>, vector<1x128xf32>, vector<1x128xf32>, vector<1x128xf32>, vector<1x128xf32> -> vector<8x128xf32>
    %72 = arith.addf %70, %71 : vector<8x128xf32>
    %c0_47 = arith.constant 0 : index
    %c0_48 = arith.constant 0 : index
    %73 = vector.load %arg11[%c0_47, %c0_48] : memref<8x128xf32, #tpu.memory_space<vmem>>, vector<8x128xf32>
    tpu.vector_store %arg11[%c0_47, %c0_48], %72 {strides = array<i32>} : memref<8x128xf32, #tpu.memory_space<vmem>>, vector<8x128xf32>,
    %c0_i32_49 = arith.constant 0 : i32
    %74 = arith.cmpi eq, %arg1, %c0_i32_49 : i32
    %75 = arith.extui %74 : i1 to i32
    %c0_i32_50 = arith.constant 0 : i32
    %76 = arith.cmpi ne, %75, %c0_i32_50 : i32
    scf.if %76 {
      %c0_51 = arith.constant 0 : index
      %c0_52 = arith.constant 0 : index
      %77 = vector.load %arg11[%c0_51, %c0_52] : memref<8x128xf32, #tpu.memory_space<vmem>>, vector<8x128xf32>
      %c0_53 = arith.constant 0 : index
      %c0_54 = arith.constant 0 : index
      %78 = vector.load %arg5[%c0_53, %c0_54] : memref<1x128xf32, #tpu.memory_space<vmem>>, vector<1x128xf32>
      %79 = vector.broadcast %78 : vector<1x128xf32> to vector<8x128xf32>
      %80 = arith.subf %77, %79 : vector<8x128xf32>
      %cst_55 = arith.constant 5.000000e-03 : f32
      %81 = vector.broadcast %cst_55 : f32 to vector<8x128xf32>
      %82 = arith.mulf %80, %81 : vector<8x128xf32>
      %c0_56 = arith.constant 0 : index
      %c0_57 = arith.constant 0 : index
      %83 = vector.load %arg6[%c0_56, %c0_57] : memref<128x256xf32, #tpu.memory_space<vmem>>, vector<128x256xf32>
      %cst_58 = arith.constant dense<0.000000e+00> : vector<8x256xf32>
      %84 = tpu.matmul %82, %83, %cst_58 {dimension_numbers = #tpu.dot_dimension_numbers<[1], [0], [0], [1], [0, 0, 1, 1], [], []>} : vector<8x128xf32>, vector<128x256xf32>, vector<8x256xf32> -> vector<8x256xf32>
      %c0_59 = arith.constant 0 : index
      %c0_60 = arith.constant 0 : index
      %85 = vector.load %arg7[%c0_59, %c0_60] : memref<1x256xf32, #tpu.memory_space<vmem>>, vector<1x256xf32>
      %86 = vector.broadcast %85 : vector<1x256xf32> to vector<8x256xf32>
      %87 = arith.addf %84, %86 : vector<8x256xf32>
      %cst_61 = arith.constant 5.000000e-01 : f32
      %88 = vector.broadcast %cst_61 : f32 to vector<8x256xf32>
      %89 = arith.mulf %88, %87 : vector<8x256xf32>
      %cst_62 = arith.constant 4.471500e-02 : f32
      %90 = vector.broadcast %cst_62 : f32 to vector<8x256xf32>
      %91 = arith.mulf %90, %87 : vector<8x256xf32>
      %92 = arith.mulf %91, %87 : vector<8x256xf32>
      %93 = arith.mulf %92, %87 : vector<8x256xf32>
      %94 = arith.addf %87, %93 : vector<8x256xf32>
      %cst_63 = arith.constant 0.797884583 : f32
      %95 = vector.broadcast %cst_63 : f32 to vector<8x256xf32>
      %96 = arith.mulf %95, %94 : vector<8x256xf32>
      %97 = math.tanh %96 : vector<8x256xf32>
      %cst_64 = arith.constant 1.000000e+00 : f32
      %98 = vector.broadcast %cst_64 : f32 to vector<8x256xf32>
      %99 = arith.addf %98, %97 : vector<8x256xf32>
      %100 = arith.mulf %89, %99 : vector<8x256xf32>
      %c0_65 = arith.constant 0 : index
      %c0_66 = arith.constant 0 : index
      %101 = vector.load %arg8[%c0_65, %c0_66] : memref<256x128xf32, #tpu.memory_space<vmem>>, vector<256x128xf32>
      %cst_67 = arith.constant dense<0.000000e+00> : vector<8x128xf32>
      %102 = tpu.matmul %100, %101, %cst_67 {dimension_numbers = #tpu.dot_dimension_numbers<[1], [0], [0], [1], [0, 0, 1, 1], [], []>} : vector<8x256xf32>, vector<256x128xf32>, vector<8x128xf32> -> vector<8x128xf32>
      %c0_68 = arith.constant 0 : index
      %c0_69 = arith.constant 0 : index
      %103 = vector.load %arg9[%c0_68, %c0_69] : memref<1x128xf32, #tpu.memory_space<vmem>>, vector<1x128xf32>
      %104 = vector.broadcast %103 : vector<1x128xf32> to vector<8x128xf32>
      %105 = arith.addf %102, %104 : vector<8x128xf32>
      %c0_70 = arith.constant 0 : index
      %c0_71 = arith.constant 0 : index
      %106 = vector.load %arg10[%c0_70, %c0_71] : memref<8x128xf32, #tpu.memory_space<vmem>>, vector<8x128xf32>
      tpu.vector_store %arg10[%c0_70, %c0_71], %105 {strides = array<i32>} : memref<8x128xf32, #tpu.memory_space<vmem>>, vector<8x128xf32>,
    } else {
    }
    return
  }
  func.func @transform_0(%arg0: i32, %arg1: i32) -> (i32, i32, i32) {
    %c0_i32 = arith.constant 0 : i32
    %c0_i32_0 = arith.constant 0 : i32
    return %arg0, %c0_i32, %arg1 : i32, i32, i32
  }
  func.func @transform_1(%arg0: i32, %arg1: i32) -> (i32, i32) {
    %c0_i32 = arith.constant 0 : i32
    %c0_i32_0 = arith.constant 0 : i32
    %c0_i32_1 = arith.constant 0 : i32
    return %c0_i32, %c0_i32_0 : i32, i32
  }
  func.func @transform_2(%arg0: i32, %arg1: i32) -> (i32, i32) {
    %c0_i32 = arith.constant 0 : i32
    %c0_i32_0 = arith.constant 0 : i32
    %c0_i32_1 = arith.constant 0 : i32
    return %c0_i32, %c0_i32_0 : i32, i32
  }
  func.func @transform_3(%arg0: i32, %arg1: i32) -> (i32, i32) {
    %c0_i32 = arith.constant 0 : i32
    %c0_i32_0 = arith.constant 0 : i32
    %c0_i32_1 = arith.constant 0 : i32
    return %c0_i32, %c0_i32_0 : i32, i32
  }
  func.func @transform_4(%arg0: i32, %arg1: i32) -> (i32, i32) {
    %c0_i32 = arith.constant 0 : i32
    %c0_i32_0 = arith.constant 0 : i32
    %c0_i32_1 = arith.constant 0 : i32
    return %c0_i32, %c0_i32_0 : i32, i32
  }
  func.func @transform_5(%arg0: i32, %arg1: i32) -> (i32, i32) {
    %c0_i32 = arith.constant 0 : i32
    %c0_i32_0 = arith.constant 0 : i32
    %c0_i32_1 = arith.constant 0 : i32
    return %c0_i32, %c0_i32_0 : i32, i32
  }
  func.func @transform_6(%arg0: i32, %arg1: i32) -> (i32, i32) {
    %c0_i32 = arith.constant 0 : i32
    %c0_i32_0 = arith.constant 0 : i32
    %c0_i32_1 = arith.constant 0 : i32
    return %c0_i32, %c0_i32_0 : i32, i32
  }
  func.func @transform_7(%arg0: i32, %arg1: i32) -> (i32, i32) {
    %c0_i32 = arith.constant 0 : i32
    %c0_i32_0 = arith.constant 0 : i32
    %c0_i32_1 = arith.constant 0 : i32
    return %c0_i32, %c0_i32_0 : i32, i32
  }
  func.func @transform_8(%arg0: i32, %arg1: i32) -> (i32, i32) {
    %c0_i32 = arith.constant 0 : i32
    %c0_i32_0 = arith.constant 0 : i32
    return %arg0, %c0_i32 : i32, i32
  }
}

</mosaic_0001>

<bundles_post_ra>
// kernel: tpu_custom_call.1
= control target key start
LH: loop header
LB: loop body
LE: loop exit
PB: predicated region body
PF: predicated region fallthrough
CT: control target
= control target key end

     0   :  { %s6693_s0 = inlined_call_operand.hbm [shape: f32[16,80,200], index: 0, kind: input, shape index: {}]   ;;  %s6694_s1 = inlined_call_operand.vmem [shape: f32[128,80], index: 1, kind: input, shape index: {}]   ;;  %s6695_s2 = inlined_call_operand.vmem [shape: f32[128,1], index: 2, kind: input, shape index: {}]   ;;  %s6696_s3 = inlined_call_operand.hbm [shape: f32[1,128], index: 3, kind: input, shape index: {}]   ;;  %s6697_s4 = inlined_call_operand.hbm [shape: f32[128,256], index: 4, kind: input, shape index: {}]   ;;  %s6698_s5 = inlined_call_operand.hbm [shape: f32[1,256], index: 5, kind: input, shape index: {}]   ;;  %s6699_s6 = inlined_call_operand.hbm [shape: f32[256,128], index: 6, kind: input, shape index: {}]   ;;  %s6700_s7 = inlined_call_operand.hbm [shape: f32[1,128], index: 7, kind: input, shape index: {}]   ;;  %s6701_s8 = inlined_call_operand.hbm [shape: f32[16,128], index: 8, kind: output, shape index: {}]  }
   0x1   :  { %6709 = sst [smem:[#allocation20_spill]] %s6696_s3 }
   0x2   :  { %6710 = sst [smem:[#allocation21_spill]] %s6697_s4 }
   0x3   :  { %6711 = sst [smem:[#allocation22_spill]] %s6698_s5 }
   0x4   :  { %6712 = sst [smem:[#allocation23_spill]] %s6699_s6 }
   0x5   :  { %13 = vsyncpa [#allocation4], 0 }
   0x6   :  { %15 = vsyncpa [#allocation4 + $0x1], 0 }
   0x7   :  { %16 = vsyncpa [#allocation7], 0 }
   0x8   :  { %17 = vsyncpa [#allocation10], 0 }
   0x9   :  { %18 = vsyncpa [#allocation13], 0 }
   0xa   :  { %19 = vsyncpa [#allocation5], 0 }
   0xb   :  { %21 = vsyncpa [#allocation5 + $0x1], 0  ;;  %s5151_s27 = smov 0   ;;  %s5153_s28 = smov 0  }
   0xc   :  { %s5155_s29 = smov 0   ;;  %s5157_s30 = smov 0  }
   0xd   :  { %s5159_s9 = smov 0   ;;  %s5161_s10 = smov 0  }
   0xe LB: > { %s6705_s11 = sadd.s32 4294967295, %s5090_s10   ;;  %p3674_p0 = scmp.ge.s32.totalorder %s5090_s10, 1  ;;  %s5090_s10 = sphi %s5161_s10, %s27_s10   ;;  %s5086_s9 = sphi %s5159_s9, %s6741_s9   ;;  %s5082_s30 = sphi %s5157_s30, %s6740_s30   ;;  %s5078_s29 = sphi %s5155_s29, %s6739_s29   ;;  %s5074_s28 = sphi %s5153_s28, %s6738_s28   ;;  %s5070_s27 = sphi %s5151_s27, %s6737_s27  }
   0xf   : > { %p5185_p1 = scmp.eq.s32.totalorder %s6705_s11, 0  ;;  %p245_p2 = scmp.lt.s32.totalorder %s5090_s10, 3 }
  0x10   : > { %s5092_s14 = smov [#allocation6]   ;;  %s5093_s16 = smov [#allocation9]  }
  0x11   : > { %s6713_s12 = scalar_select %p5185_p1, 1, 0 }
  0x12   : > { %p5190_p3 = pnand %p3674_p0, %p245_p2  ;;  %s264_s15 = sshll.u32 %s5092_s14, 4  ;;  %s265_s15 = int_to_ptr.vmem [resolvable:$true] %s264_s15 }
  0x13   : > { %s288_s17 = sshll.u32 %s5093_s16, 4  ;;  %s5094_s19 = smov [#allocation8]   ;;  %s5203_s17 = int_to_ptr.vmem [resolvable:$true] %s288_s17 }
  0x14   : > { %s6714_s13 = scalar_select %p5190_p3, 1, 0 }
  0x15   : > { %p4707_p5 = pneg %p5190_p3  ;;  %s274_s20 = sshll.u32 %s5094_s19, 4  ;;  %s5205_s20 = int_to_ptr.vmem [resolvable:$true] %s274_s20 }
  0x16   : > { %s6716_s3 = sld [smem:[#allocation20_spill]] }
  0x17   : > { %p5199_p6 = pnand %p4707_p5, %p5185_p1 }
  0x19   : > { %p5215_p8 = pneg %p5199_p6 }
  0x1c   : > { %s4826_s23 = scalar_lea.hbm %s6716_s3, 16 }
  0x1d   : > { %p4827_p7 = scmp.ne.s32.totalorder %s6716_s3, %s4826_s23  ;;  %p4833_p11 = scmp.lt.u32.totalorder %s4826_s23, %s6716_s3 }
  0x1f   : > { %p4829_p9 = pnand %p5215_p8, %p4827_p7 }
  0x21   : > { %p4830_p10 = pneg %p4829_p9 }
  0x23   : > { %p4835_p12 = pnand %p4833_p11, %p4830_p10 }
  0x25   : > { %4838 = shalt.err (!%p4835_p12)
}
  0x26   : > { %s4839_s19 = scalar_lea.vmem %s265_s15, 16  ;;  %s4846_s21 = scalar_lea.vmem %s265_s15, 32 }
  0x27   : > { %p4840_p13 = scmp.ne.s32.totalorder %s265_s15, %s4839_s19  ;;  %p4847_p5 = scmp.lt.s32.totalorder %s265_s15, %s265_s15 }
  0x28   : > { %p4848_p4 = scmp.lt.s32.totalorder %s4846_s21, %s4839_s19 }
  0x29   : > { %p4842_p0 = pnand %p4840_p13, %p5215_p8 }
  0x2a   : > { %p4849_p3 = por %p4848_p4, %p4847_p5 }
  0x2b   : > { %p4843_p2 = pneg %p4842_p0 }
  0x2d   : > { %p4850_p1 = pnand %p4849_p3, %p4843_p2 }
  0x2f   : > { %4853 = shalt.err (!%p4850_p1)
}
  0x30   : > { %4710 = dma.hbm_to_vmem [thread:$0]  (!%p5199_p6), %s6716_s3, 16, %s265_s15, [#allocation7]  }
  0x31   : > { %s6718_s5 = sld [smem:[#allocation22_spill]] }
  0x37   : > { %s4854_s14 = scalar_lea.hbm %s6718_s5, 32 }
  0x38   : > { %p4855_p7 = scmp.ne.s32.totalorder %s6718_s5, %s4854_s14  ;;  %p4861_p1 = scmp.lt.u32.totalorder %s4854_s14, %s6718_s5 }
  0x3a   : > { %p4857_p9 = pnand %p4855_p7, %p5215_p8 }
  0x3c   : > { %p4858_p4 = pneg %p4857_p9 }
  0x3e   : > { %p4863_p3 = pnand %p4861_p1, %p4858_p4 }
  0x40   : > { %4866 = shalt.err (!%p4863_p3)
}
  0x41   : > { %s4867_s15 = scalar_lea.vmem %s5203_s17, 32  ;;  %p4875_p13 = scmp.lt.s32.totalorder %s5203_s17, %s5203_s17 }
  0x42   : > { %p4868_p10 = scmp.ne.s32.totalorder %s5203_s17, %s4867_s15  ;;  %p4876_p0 = scmp.lt.s32.totalorder %s4867_s15, %s4867_s15 }
  0x44   : > { %p4870_p11 = pnand %p4868_p10, %p5215_p8  ;;  %p4877_p2 = por %p4876_p0, %p4875_p13 }
  0x46   : > { %p4871_p12 = pneg %p4870_p11 }
  0x48   : > { %p4878_p5 = pnand %p4877_p2, %p4871_p12 }
  0x4a   : > { %4881 = shalt.err (!%p4878_p5)
}
  0x4b   : > { %4716 = dma.hbm_to_vmem [thread:$0]  (!%p5199_p6), %s6718_s5, 32, %s5203_s17, [#allocation10]  }
  0x4c   : > { %s6719_s4 = sld [smem:[#allocation21_spill]] }
  0x52   : > { %s4882_s25 = scalar_lea.hbm %s6719_s4, 4096 }
  0x53   : > { %p4883_p7 = scmp.ne.s32.totalorder %s6719_s4, %s4882_s25  ;;  %p4889_p1 = scmp.lt.u32.totalorder %s4882_s25, %s6719_s4 }
  0x55   : > { %p4885_p9 = pnand %p4883_p7, %p5215_p8 }
  0x57   : > { %p4886_p4 = pneg %p4885_p9 }
  0x59   : > { %p4891_p3 = pnand %p4889_p1, %p4886_p4 }
  0x5b   : > { %4894 = shalt.err (!%p4891_p3)
}
  0x5c   : > { %s4895_s17 = scalar_lea.vmem %s5205_s20, 4096  ;;  %p4903_p13 = scmp.lt.s32.totalorder %s5205_s20, %s5205_s20 }
  0x5d   : > { %p4896_p10 = scmp.ne.s32.totalorder %s5205_s20, %s4895_s17  ;;  %p4904_p0 = scmp.lt.s32.totalorder %s4895_s17, %s4895_s17 }
  0x5f   : > { %p4898_p11 = pnand %p4896_p10, %p5215_p8  ;;  %p4905_p2 = por %p4904_p0, %p4903_p13 }
  0x61   : > { %p4899_p12 = pneg %p4898_p11 }
  0x63   : > { %p4906_p5 = pnand %p4905_p2, %p4899_p12 }
  0x65   : > { %4909 = shalt.err (!%p4906_p5)
}
  0x66   : > { %s6706_s15 = smov 256   ;;  %s6707_s11 = smov 16  }
  0x67   : > { %4713 = dma.hbm_to_vmem [thread:$0]  (!%p5199_p6), %s6719_s4, 4096, %s5205_s20, [#allocation7], %s6706_s15, %s6706_s15, %s6707_s11  }
  0x68   : > { %s5097_s23 = smov [#allocation11]   ;;  %s6720_s6 = sld [smem:[#allocation23_spill]] }
  0x69   : > { %s298_s25 = sshll.u32 %s5097_s23, 4  ;;  %s299_s25 = int_to_ptr.vmem [resolvable:$true] %s298_s25 }
  0x6e   : > { %s4910_s19 = scalar_lea.hbm %s6720_s6, 4096 }
  0x6f   : > { %p4911_p7 = scmp.ne.s32.totalorder %s6720_s6, %s4910_s19  ;;  %p4917_p1 = scmp.lt.u32.totalorder %s4910_s19, %s6720_s6 }
  0x71   : > { %p4913_p9 = pnand %p4911_p7, %p5215_p8 }
  0x73   : > { %p4914_p4 = pneg %p4913_p9 }
  0x75   : > { %p4919_p3 = pnand %p4917_p1, %p4914_p4 }
  0x77   : > { %4922 = shalt.err (!%p4919_p3)
}
  0x78   : > { %s4923_s20 = scalar_lea.vmem %s299_s25, 4096  ;;  %p4931_p13 = scmp.lt.s32.totalorder %s299_s25, %s299_s25 }
  0x79   : > { %p4924_p10 = scmp.ne.s32.totalorder %s299_s25, %s4923_s20  ;;  %p4932_p0 = scmp.lt.s32.totalorder %s4923_s20, %s4923_s20 }
  0x7b   : > { %p4926_p11 = pnand %p4924_p10, %p5215_p8  ;;  %p4933_p2 = por %p4932_p0, %p4931_p13 }
  0x7d   : > { %p4927_p12 = pneg %p4926_p11 }
  0x7f   : > { %p4934_p5 = pnand %p4933_p2, %p4927_p12 }
  0x81   : > { %4937 = shalt.err (!%p4934_p5)
}
  0x82   : > { %s5098_s22 = smov 128   ;;  %s5099_s24 = smov 8  }
  0x83   : > { %4719 = dma.hbm_to_vmem [thread:$0]  (!%p5199_p6), %s6720_s6, 4096, %s299_s25, [#allocation10], %s5098_s22, %s5098_s22, %s5099_s24  }
  0x84   : > { %s5100_s23 = smov [#allocation12]   ;;  %s4938_s21 = scalar_lea.hbm %s6700_s7, 16 }
  0x85   : > { %s312_s14 = sshll.u32 %s5100_s23, 4  ;;  %p4939_p7 = scmp.ne.s32.totalorder %s6700_s7, %s4938_s21  ;;  %s313_s14 = int_to_ptr.vmem [resolvable:$true] %s312_s14 }
  0x86   : > { %p4945_p1 = scmp.lt.u32.totalorder %s4938_s21, %s6700_s7 }
  0x87   : > { %p4941_p9 = pnand %p4939_p7, %p5215_p8 }
  0x89   : > { %p4942_p4 = pneg %p4941_p9 }
  0x8b   : > { %p4947_p3 = pnand %p4945_p1, %p4942_p4 }
  0x8d   : > { %4950 = shalt.err (!%p4947_p3)
}
  0x8e   : > { %s4951_s25 = scalar_lea.vmem %s313_s14, 16  ;;  %s4958_s22 = scalar_lea.vmem %s313_s14, 32 }
  0x8f   : > { %p4952_p10 = scmp.ne.s32.totalorder %s313_s14, %s4951_s25  ;;  %p4959_p13 = scmp.lt.s32.totalorder %s313_s14, %s313_s14 }
  0x90   : > { %p4960_p0 = scmp.lt.s32.totalorder %s4958_s22, %s4951_s25 }
  0x91   : > { %p4954_p11 = pnand %p4952_p10, %p5215_p8 }
  0x92   : > { %p4961_p2 = por %p4960_p0, %p4959_p13 }
  0x93   : > { %p4955_p12 = pneg %p4954_p11 }
  0x95   : > { %p4962_p5 = pnand %p4961_p2, %p4955_p12 }
  0x97   : > { %4965 = shalt.err (!%p4962_p5)
}
  0x98   : > { %4722 = dma.hbm_to_vmem [thread:$0]  (!%p5199_p6), %s6700_s7, 16, %s313_s14, [#allocation13]  }
  0x99   : > { %s3673_s26 = sadd.s32 4294967294, %s5090_s10   ;;  %s39_s15 = sadd.s32 1, %s5086_s9 }
  0x9a   : > { %s48_s18 = sadd.s32 1, %s5078_s29  ;;  %p41_p8 = scmp.ge.s32.totalorder %s39_s15, 2 }
  0x9b   : > { %p55_p7 = scmp.ne.s32.totalorder %s5078_s29, %s5074_s28  ;;  %p56_p9 = scmp.eq.s32.totalorder %s5090_s10, 0 }
  0x9c   : > { %p61_p4 = scmp.ne.s32.totalorder %s5074_s28, %s5070_s27  ;;  %s6743_s15 = smov (%p41_p8, %s39_s15), 0 }
  0x9d   : > { %p5326_p1 = por %p56_p9, %p55_p7  ;;  %p6722_p3 = scmp.ne.s32.totalorder %s6713_s12, 0 }
  0x9e   : > { %s43_s23 = ssub.s32 %s5086_s9, %s6743_s15  ;;  %s6724_s14 = sadd.s32 4294967295, %s5090_s10  }
  0x9f   : > { %p5332_p6 = por %p6722_p3, %p61_p4  ;;  %p232_p10 = scmp.eq.s32.totalorder %s6724_s14, 1 }
  0xa0   : > { %p46_p11 = scmp.eq.s32.totalorder %s43_s23, 0  ;;  %p238_p12 = scmp.eq.s32.totalorder %s3673_s26, 1 }
  0xa1   : > { %p5340_p13 = por %p232_p10, %p55_p7  ;;  %p4736_p0 = scmp.lt.s32.totalorder %s5090_s10, 2 }
  0xa2   : > { %s5346_s19 = scalar_select %p46_p11, %s5078_s29, %s48_s18  }
  0xa3   : > { %s6725_s16 = scalar_select %p5340_p13, 1, 0 }
  0xa4   : > { %p5348_p2 = por %p238_p12, %p61_p4  ;;  %s323_s17 = sand.u32 1, %s5078_s29  }
  0xa5   : > { %s4680_s20 = smul.u32 1280, %s323_s17  ;;  %p5356_p5 = pnand %p4736_p0, %p5326_p1 }
  0xa6   : > { %s6726_s21 = scalar_select %p5348_p2, 1, 0 }
  0xa7   : > { %s4681_s25 = smul.u32 20480, %s5086_s9  ;;  %s327_s18 = scalar_lea.vmem [#allocation3], %s4680_s20 }
  0xa8   : > { %s337_s23 = sshll.u32 %s327_s18, 4  ;;  %s5367_s11 = scalar_lea.sflag [#allocation4], %s323_s17  ;;  %s5365_s23 = int_to_ptr.vmem [resolvable:$true] %s337_s23 }
  0xa9   : > { %s5363_s26 = scalar_lea.hbm %s6693_s0, %s4681_s25  ;;  %p4968_p7 = pneg %p5356_p5 }
  0xaa   : > { %s4966_s14 = scalar_lea.hbm %s5363_s26, 20480  ;;  %s4971_s3 = scalar_lea.hbm %s6693_s0, 40960 }
  0xab   : > { %p4967_p8 = scmp.ne.s32.totalorder %s5363_s26, %s4966_s14  ;;  %p4972_p1 = scmp.lt.u32.totalorder %s5363_s26, %s6693_s0 }
  0xac   : > { %p4973_p3 = scmp.lt.u32.totalorder %s4971_s3, %s4966_s14  ;;  %p4975_p11 = scmp.lt.u32.totalorder %s4966_s14, %s5363_s26 }
  0xad   : > { %p4969_p9 = pnand %p4968_p7, %p4967_p8 }
  0xae   : > { %p4974_p10 = por %p4973_p3, %p4972_p1 }
  0xaf   : > { %p4970_p4 = pneg %p4969_p9 }
  0xb0   : > { %p4976_p12 = por %p4975_p11, %p4974_p10 }
  0xb2   : > { %p4977_p0 = pnand %p4976_p12, %p4970_p4 }
  0xb4   : > { %4980 = shalt.err (!%p4977_p0)
}
  0xb5   : > { %s4981_s17 = scalar_lea.vmem %s5365_s23, 20480  ;;  %s5101_s20 = smov [#allocation3]  }
  0xb6   : > { %p4982_p8 = scmp.ne.s32.totalorder %s5365_s23, %s4981_s17  ;;  %s4986_s18 = sshll.u32 %s5101_s20, 4  ;;  %s4987_s18 = int_to_ptr.vmem [resolvable:$false] %s4986_s18 }
  0xb7   : > { %s4988_s4 = scalar_lea.vmem %s4987_s18, 40960  ;;  %p4989_p13 = scmp.lt.s32.totalorder %s5365_s23, %s4987_s18 }
  0xb8   : > { %p4984_p9 = pnand %p4982_p8, %p4968_p7  ;;  %p4990_p1 = scmp.lt.s32.totalorder %s4988_s4, %s4981_s17 }
  0xba   : > { %p4985_p2 = pneg %p4984_p9  ;;  %p4991_p3 = por %p4990_p1, %p4989_p13 }
  0xbc   : > { %p4992_p10 = pnand %p4991_p3, %p4985_p2 }
  0xbe   : > { %4995 = shalt.err (!%p4992_p10)
}
  0xbf   : > { %s6728_s6 = smov 16   ;;  %s6729_s14 = smov 256  }
  0xc0   : > { %4726 = dma.hbm_to_vmem [thread:$0]  (!%p5356_p5), %s5363_s26, 20480, %s5365_s23, %s5367_s11, %s6729_s14, %s6729_s14, %s6728_s6  }
  0xc1   : > { %p6730_p7 = scmp.ne.s32.totalorder %s6714_s13, 0 }
  0xc2   : > { %s5401_s25 = sand.u32 (!%p6730_p7), 1, %s5074_s28  }
  0xc3   : > { %349 = sbr.rel (%p6730_p7) target bundleno = 1659 (0x67b), region = 52  ;;  %s352_s3 = scalar_lea.sflag (!%p6730_p7), [#allocation4], %s5401_s25 }
  0xc4   : > { %s4682_s24 = smul.u32 (!%p6730_p7), 1280, %s5401_s25 }
  0xc6   : > { %s5405_s17 = scalar_lea.vmem (!%p6730_p7), [#allocation3], %s4682_s24 }
  0xca   : > { %5049 = dma.done.wait (%p5332_p6), %s352_s3, 20480  }
  0xcb   : > { %5051 = vsyncadd (%p5332_p6), %s352_s3, 4294946816  ;;  %p6731_p13 = scmp.ne.s32.totalorder %s6713_s12, 0 }
  0xcd   : > { %5053 = dma.done.wait (%p6731_p13), [#allocation7], 4112  }
  0xce   : > { %5055 = vsyncadd (%p6731_p13), [#allocation7], 4294963184 }
  0xcf   : > { %5057 = dma.done.wait (%p6731_p13), [#allocation10], 4128  }
  0xd0   : > { %5059 = vsyncadd (%p6731_p13), [#allocation10], 4294963168 }
  0xd1   : > { %5061 = dma.done.wait (%p6731_p13), [#allocation13], 16  }
  0xd2   : > { %5063 = vsyncadd (%p6731_p13), [#allocation13], 4294967280  ;;  %v5102_v0 = vmov 0.0   ;;  %v5103_v1 = vmov 0   ;;  %v448_v2 = vld [vmem:[%s5405_s17 + $0x8] sm:$0xff]  ;;  %v450_v3 = vld [vmem:[%s5405_s17 + $0x18] sm:$0xff] }
  0xd3   : > { %660 = vmatprep.mubr.f32.mxu0 %v5102_v0  ;;  %4803 = vset.pattern.permute.xlu0 %v5103_v1  ;;  %v447_v4 = vld [vmem:[%s5405_s17] sm:$0xff]  ;;  %v4136_v5 = vpack.c.bf16 %v450_v3, %v448_v2  ;;  %v449_v6 = vld [vmem:[%s5405_s17 + $0x10] sm:$0xff]  ;;  %v452_v7 = vld [vmem:[%s5405_s17 + $0x28] sm:$0xff]  ;;  %vm547_vm0 = vcmask 654336   ;;  %vm789_vm1 = vcmask 588800   ;;  %vm3257_vm3 = vcmask 1040384  }
  0xd4   : > { %4804 = vset.pattern.permute.xlu1 %v5103_v1  ;;  %v454_v8 = vld [vmem:[%s5405_s17 + $0x38] sm:$0xff]  ;;  %v4138_v9 = vpack.c.bf16 %v449_v6, %v447_v4  ;;  %v451_v11 = vld [vmem:[%s5405_s17 + $0x20] sm:$0xff]  ;;  %v453_v12 = vld [vmem:[%s5405_s17 + $0x30] sm:$0xff]  ;;  %vm3259_vm4 = vcmask 1041408   ;;  %vm3261_vm5 = vcmask 1042432   ;;  %vm3263_vm6 = vcmask 1043456  }
  0xd5   : > { %v4140_v10 = vpack.c.bf16 %v454_v8, %v452_v7  ;;  %v456_v13 = vld [vmem:[%s5405_s17 + $0x48] sm:$0xff]  ;;  %4137 = vmatprep.subr.bf16.mxu0 %v4136_v5  ;;  %v458_v14 = vld [vmem:[%s5405_s17 + $0x58] sm:$0xff]  ;;  %v4142_v15 = vpack.c.bf16 %v453_v12, %v451_v11  ;;  %v455_v17 = vld [vmem:[%s5405_s17 + $0x40] sm:$0xff]  ;;  %vm3265_vm7 = vcmask 1044480   ;;  %vm3267_vm8 = vcmask 1045504   ;;  %s3690_s3 = sshll.u32 %s5401_s25, 3 }
  0xd6   : > { %4139 = vmatpush1.bf16.msra.mxu0 %v4138_v9  ;;  %v4144_v16 = vpack.c.bf16 %v458_v14, %v456_v13  ;;  %v457_v18 = vld [vmem:[%s5405_s17 + $0x50] sm:$0xff]  ;;  %v460_v19 = vld [vmem:[%s5405_s17 + $0x68] sm:$0xff]  ;;  %v462_v20 = vld [vmem:[%s5405_s17 + $0x78] sm:$0xff]  ;;  %vm3269_vm9 = vcmask 1046528   ;;  %s4098_s12 = sshll.u32 %s5082_s30, 7  ;;  %s407_s13 = scalar_lea.vmem [#allocation14], %s3690_s3 }
  0xd7   : > { %4141 = vmatprep.subr.bf16.mxu0 %v4140_v10  ;;  %v4146_v21 = vpack.c.bf16 %v457_v18, %v455_v17  ;;  %v4148_v22 = vpack.c.bf16 %v462_v20, %v460_v19  ;;  %v459_v23 = vld [vmem:[%s5405_s17 + $0x60] sm:$0xff]  ;;  %v461_v24 = vld [vmem:[%s5405_s17 + $0x70] sm:$0xff]  ;;  %v464_v25 = vld [vmem:[%s5405_s17 + $0x88] sm:$0xff]  ;;  %s3543_s5 = sshll.u32 %s407_s13, 4  ;;  %s6644_s23 = scalar_lea.hbm %s6701_s8, %s4098_s12  ;;  %s6646_s5 = int_to_ptr.vmem [resolvable:$true] %s3543_s5 }
  0xd8   : > { %v466_v26 = vld [vmem:[%s5405_s17 + $0x98] sm:$0xff]  ;;  %v4150_v27 = vpack.c.bf16 %v461_v24, %v459_v23  ;;  %v463_v29 = vld [vmem:[%s5405_s17 + $0x80] sm:$0xff]  ;;  %v465_v30 = vld [vmem:[%s5405_s17 + $0x90] sm:$0xff]  ;;  %s3530_s11 = scalar_lea.sflag [#allocation5], %s5401_s25  ;;  %s4996_s20 = scalar_lea.vmem %s6646_s5, 128 }
  0xd9   : > { %v4152_v28 = vpack.c.bf16 %v466_v26, %v464_v25  ;;  %v3725_v31 = vld [vmem:[%s5405_s17 + $0xa8] sm:$0xff]  ;;  %v3727_v32 = vld [vmem:[%s5405_s17 + $0xb8] sm:$0xff]  ;;  %v4154_v33 = vpack.c.bf16 %v465_v30, %v463_v29  ;;  %v3724_v35 = vld [vmem:[%s5405_s17 + $0xa0] sm:$0xff]  ;;  %p4997_p6 = scmp.ne.s32.totalorder %s6646_s5, %s4996_s20  ;;  %p6734_p2 = scmp.ne.s32.totalorder %s6725_s16, 0 }
  0xda   : > { %4143 = vmatpush1.bf16.msra.mxu0 %v4142_v15  ;;  %v4196_v34 = vpack.c.bf16 %v3727_v32, %v3725_v31  ;;  %v3726_v36 = vld [vmem:[%s5405_s17 + $0xb0] sm:$0xff]  ;;  %v3729_v37 = vld [vmem:[%s5405_s17 + $0xc8] sm:$0xff]  ;;  %v3731_v38 = vld [vmem:[%s5405_s17 + $0xd8] sm:$0xff]  ;;  %s5105_s30 = smov [#allocation14]  }
  0xdb   : > { %4145 = vmatprep.subr.bf16.mxu0 %v4144_v16  ;;  %v431_v39 = vld [vmem:[%s6695_s2] sm:$0xff]  ;;  %v4198_v41 = vpack.c.bf16 %v3726_v36, %v3724_v35  ;;  %v432_v42 = vld [vmem:[%s6695_s2 + $0x8] sm:$0xff]  ;;  %v433_v43 = vld [vmem:[%s6695_s2 + $0x10] sm:$0xff]  ;;  %v4200_v44 = vpack.c.bf16 %v3731_v38, %v3729_v37  ;;  %p4998_p5 = pnand %p4997_p6, %p6734_p2  ;;  %s5000_s18 = sshll.u32 %s5105_s30, 4  ;;  %s5001_s18 = int_to_ptr.vmem [resolvable:$false] %s5000_s18 }
  0xdc   : > { %469 = vperm.xlu0 %4803, %v431_v39   ;;  %v5456_v40 = vld [vmem:[%s6694_s1] sm:$0xff]  ;;  %v3730_v46 = vld [vmem:[%s5405_s17 + $0xd0] sm:$0xff]  ;;  %479 = vperm.xlu1 %4804, %v433_v43   ;;  %v3733_v47 = vld [vmem:[%s5405_s17 + $0xe8] sm:$0xff]  ;;  %s5002_s4 = scalar_lea.vmem %s5001_s18, 256  ;;  %p5003_p11 = scmp.lt.s32.totalorder %s6646_s5, %s5001_s18 }
  0xdd   : > { %v3728_v45 = vld [vmem:[%s5405_s17 + $0xc0] sm:$0xff]  ;;  %v3735_v48 = vld [vmem:[%s5405_s17 + $0xf8] sm:$0xff]  ;;  %v5477_v50 = vld [vmem:[%s6694_s1 + $0x8] sm:$0xff]  ;;  %p4999_p4 = pneg %p4998_p5  ;;  %p5004_p12 = scmp.lt.s32.totalorder %s5002_s4, %s4996_s20 }
  0xde   : > { %4147 = vmatpush1.bf16.msra.mxu0 %v4146_v21  ;;  %v434_v49 = vld [vmem:[%s6695_s2 + $0x18] sm:$0xff]  ;;  %v4202_v51 = vpack.c.bf16 %v3730_v46, %v3728_v45  ;;  %v435_v52 = vld [vmem:[%s6695_s2 + $0x20] sm:$0xff]  ;;  %v4204_v53 = vpack.c.bf16 %v3735_v48, %v3733_v47  ;;  %v3734_v55 = vld [vmem:[%s5405_s17 + $0xf0] sm:$0xff] }
  0xdf   : > { %4149 = vmatprep.subr.bf16.mxu0 %v4148_v22  ;;  %v3732_v54 = vld [vmem:[%s5405_s17 + $0xe0] sm:$0xff]  ;;  %v3737_v56 = vld [vmem:[%s5405_s17 + $0x108] sm:$0xff]  ;;  %v3739_v57 = vld [vmem:[%s5405_s17 + $0x118] sm:$0xff]  ;;  %p5005_p0 = por %p5004_p12, %p5003_p11 }
  0xe0   : > { %474 = vperm.xlu0 %4803, %v432_v42   ;;  %484 = vperm.xlu1 %4804, %v434_v49   ;;  %v436_v58 = vld [vmem:[%s6695_s2 + $0x28] sm:$0xff]  ;;  %v5495_v59 = vld [vmem:[%s6694_s1 + $0x10] sm:$0xff]  ;;  %v4206_v60 = vpack.c.bf16 %v3734_v55, %v3732_v54  ;;  %v4208_v62 = vpack.c.bf16 %v3739_v57, %v3737_v56  ;;  %v3736_v63 = vld [vmem:[%s5405_s17 + $0x100] sm:$0xff] }
  0xe1   : > { %v437_v61 = vld [vmem:[%s6695_s2 + $0x30] sm:$0xff]  ;;  %v3741_v2 = vld [vmem:[%s5405_s17 + $0x128] sm:$0xff]  ;;  %v3743_v3 = vld [vmem:[%s5405_s17 + $0x138] sm:$0xff]  ;;  %p5006_p8 = pnand %p5005_p0, %p4999_p4 }
  0xe2   : > { %4151 = vmatpush1.bf16.msra.mxu0 %v4150_v27  ;;  %v3738_v1 = vld [vmem:[%s5405_s17 + $0x110] sm:$0xff]  ;;  %v438_v4 = vld [vmem:[%s6695_s2 + $0x38] sm:$0xff]  ;;  %v439_v7 = vld [vmem:[%s6695_s2 + $0x40] sm:$0xff]  ;;  %v4212_v8 = vpack.c.bf16 %v3743_v3, %v3741_v2 }
  0xe3   : > { %4153 = vmatprep.subr.bf16.mxu0 %v4152_v28  ;;  %v5513_v5 = vld [vmem:[%s6694_s1 + $0x18] sm:$0xff]  ;;  %v4210_v6 = vpack.c.bf16 %v3738_v1, %v3736_v63  ;;  %v3740_v9 = vld [vmem:[%s5405_s17 + $0x120] sm:$0xff]  ;;  %v3742_v10 = vld [vmem:[%s5405_s17 + $0x130] sm:$0xff] }
  0xe4   : > { %489 = vperm.xlu0 %4803, %v435_v52   ;;  %494 = vperm.xlu1 %4804, %v436_v58   ;;  %v3778_v11 = vld [vmem:[%s5405_s17 + $0x148] sm:$0xff]  ;;  %v3780_v12 = vld [vmem:[%s5405_s17 + $0x158] sm:$0xff]  ;;  %v5531_v14 = vld [vmem:[%s6694_s1 + $0x20] sm:$0xff]  ;;  %v4214_v15 = vpack.c.bf16 %v3742_v10, %v3740_v9 }
  0xe5   : > { %v440_v13 = vld [vmem:[%s6695_s2 + $0x48] sm:$0xff]  ;;  %v441_v16 = vld [vmem:[%s6695_s2 + $0x50] sm:$0xff]  ;;  %v4256_v17 = vpack.c.bf16 %v3780_v12, %v3778_v11  ;;  %v442_v18 = vld [vmem:[%s6695_s2 + $0x58] sm:$0xff] }
  0xe6   : > { %4155 = vmatpush1.bf16.msra.mxu0 %v4154_v33  ;;  %v5545_v19 = vld [vmem:[%s6694_s1 + $0x28] sm:$0xff]  ;;  %v443_v20 = vld [vmem:[%s6695_s2 + $0x60] sm:$0xff]  ;;  %v5559_v22 = vld [vmem:[%s6694_s1 + $0x30] sm:$0xff] }
  0xe7   : > { %4197 = vmatprep.subr.bf16.mxu0 %v4196_v34  ;;  %v444_v21 = vld [vmem:[%s6695_s2 + $0x68] sm:$0xff]  ;;  %v445_v23 = vld [vmem:[%s6695_s2 + $0x70] sm:$0xff]  ;;  %v446_v24 = vld [vmem:[%s6695_s2 + $0x78] sm:$0xff] }
  0xe8   : > { %499 = vperm.xlu0 %4803, %v437_v61   ;;  %504 = vperm.xlu1 %4804, %v438_v4   ;;  %v5573_v25 = vld [vmem:[%s6694_s1 + $0x38] sm:$0xff]  ;;  %v5581_v26 = vld [vmem:[%s6694_s1 + $0x40] sm:$0xff]  ;;  %v5589_v27 = vld [vmem:[%s6694_s1 + $0x48] sm:$0xff] }
  0xe9   : > { %3691 = vmatmul.mubr.msk.f32.vlgmr.msra.gmra.mrb[0].mxu0 %vm547_vm0, %v5456_v40  ;;  %v5597_v28 = vld [vmem:[%s6694_s1 + $0x50] sm:$0xff]  ;;  %v5605_v29 = vld [vmem:[%s6694_s1 + $0x58] sm:$0xff]  ;;  %v5613_v30 = vld [vmem:[%s6694_s1 + $0x60] sm:$0xff] }
  0xea   : > { %4199 = vmatpush1.bf16.msra.mxu0 %v4198_v41  ;;  %666 = vmatprep.mubr.f32.mxu0 %v5102_v0  ;;  %v5621_v31 = vld [vmem:[%s6694_s1 + $0x68] sm:$0xff]  ;;  %v5629_v32 = vld [vmem:[%s6694_s1 + $0x70] sm:$0xff]  ;;  %v5637_v33 = vld [vmem:[%s6694_s1 + $0x78] sm:$0xff] }
  0xeb   : > { %4201 = vmatprep.subr.bf16.mxu0 %v4200_v44  ;;  %v3777_v34 = vld [vmem:[%s5405_s17 + $0x140] sm:$0xff]  ;;  %v3779_v35 = vld [vmem:[%s5405_s17 + $0x150] sm:$0xff]  ;;  %v3782_v36 = vld [vmem:[%s5405_s17 + $0x168] sm:$0xff] }
  0xec   : > { %509 = vperm.xlu0 %4803, %v439_v7   ;;  %514 = vperm.xlu1 %4804, %v440_v13   ;;  %v3784_v37 = vld [vmem:[%s5405_s17 + $0x178] sm:$0xff]  ;;  %v4258_v38 = vpack.c.bf16 %v3779_v35, %v3777_v34  ;;  %v3781_v41 = vld [vmem:[%s5405_s17 + $0x160] sm:$0xff]  ;;  %v3783_v42 = vld [vmem:[%s5405_s17 + $0x170] sm:$0xff] }
  0xed   : > { %3692 = vmatmul.mubr.msk.f32.gmra.mrb[2].mxu0 %vm547_vm0, %v5477_v50  ;;  %v4260_v39 = vpack.c.bf16 %v3784_v37, %v3782_v36  ;;  %v3786_v43 = vld [vmem:[%s5405_s17 + $0x188] sm:$0xff]  ;;  %v3788_v44 = vld [vmem:[%s5405_s17 + $0x198] sm:$0xff]  ;;  %v4262_v45 = vpack.c.bf16 %v3783_v42, %v3781_v41  ;;  %v3785_v47 = vld [vmem:[%s5405_s17 + $0x180] sm:$0xff] }
  0xee   : > { %672 = vmatprep.mubr.f32.mxu0 %v5102_v0  ;;  %4203 = vmatpush1.bf16.msra.mxu0 %v4202_v51  ;;  %v4264_v46 = vpack.c.bf16 %v3788_v44, %v3786_v43  ;;  %v3787_v48 = vld [vmem:[%s5405_s17 + $0x190] sm:$0xff]  ;;  %v3790_v49 = vld [vmem:[%s5405_s17 + $0x1a8] sm:$0xff]  ;;  %v3792_v51 = vld [vmem:[%s5405_s17 + $0x1b8] sm:$0xff] }
  0xef   : > { %4205 = vmatprep.subr.bf16.mxu0 %v4204_v53  ;;  %v4266_v52 = vpack.c.bf16 %v3787_v48, %v3785_v47  ;;  %v4268_v53 = vpack.c.bf16 %v3792_v51, %v3790_v49  ;;  %v3789_v54 = vld [vmem:[%s5405_s17 + $0x1a0] sm:$0xff]  ;;  %v3791_v55 = vld [vmem:[%s5405_s17 + $0x1b0] sm:$0xff]  ;;  %v3794_v56 = vld [vmem:[%s5405_s17 + $0x1c8] sm:$0xff]  ;;  %v5104_v48 = vmov 1.0  }
  0xf0   : > { %519 = vperm.xlu0 %4803, %v441_v16   ;;  %524 = vperm.xlu1 %4804, %v442_v18   ;;  %v3796_v57 = vld [vmem:[%s5405_s17 + $0x1d8] sm:$0xff]  ;;  %v4270_v58 = vpack.c.bf16 %v3791_v55, %v3789_v54  ;;  %v3793_v61 = vld [vmem:[%s5405_s17 + $0x1c0] sm:$0xff]  ;;  %v3831_v63 = vld [vmem:[%s5405_s17 + $0x1e8] sm:$0xff] }
  0xf1   : > { %3693 = vmatmul.mubr.msk.f32.gmra.mrb[4].mxu0 %vm547_vm0, %v5495_v59  ;;  %v3833_v1 = vld [vmem:[%s5405_s17 + $0x1f8] sm:$0xff]  ;;  %v3830_v4 = vld [vmem:[%s5405_s17 + $0x1e0] sm:$0xff]  ;;  %v3835_v7 = vld [vmem:[%s5405_s17 + $0x208] sm:$0xff]  ;;  %3723 = vmatprep.mubr.msk.f32.mxu1 %vm789_vm1, %v5104_v48 }
  0xf2   : > { %678 = vmatprep.mubr.f32.mxu0 %v5102_v0  ;;  %4207 = vmatpush1.bf16.msra.mxu0 %v4206_v60  ;;  %v4272_v60 = vpack.c.bf16 %v3796_v57, %v3794_v56  ;;  %v4316_v3 = vpack.c.bf16 %v3833_v1, %v3831_v63  ;;  %v3834_v11 = vld [vmem:[%s5405_s17 + $0x200] sm:$0xff]  ;;  %v3836_v12 = vld [vmem:[%s5405_s17 + $0x210] sm:$0xff]  ;;  %v3839_v13 = vld [vmem:[%s5405_s17 + $0x228] sm:$0xff] }
  0xf3   : > { %4209 = vmatprep.subr.bf16.mxu0 %v4208_v62  ;;  %v3795_v62 = vld [vmem:[%s5405_s17 + $0x1d0] sm:$0xff]  ;;  %v4322_v16 = vpack.c.bf16 %v3836_v12, %v3834_v11  ;;  %v3838_v18 = vld [vmem:[%s5405_s17 + $0x220] sm:$0xff]  ;;  %v3847_v37 = vld [vmem:[%s5405_s17 + $0x268] sm:$0xff] }
  0xf4   : > { %529 = vperm.xlu0 %4803, %v443_v20   ;;  %534 = vperm.xlu1 %4804, %v444_v21   ;;  %v4274_v2 = vpack.c.bf16 %v3795_v62, %v3793_v61  ;;  %v3840_v20 = vld [vmem:[%s5405_s17 + $0x230] sm:$0xff]  ;;  %v3843_v21 = vld [vmem:[%s5405_s17 + $0x248] sm:$0xff]  ;;  %v3842_v35 = vld [vmem:[%s5405_s17 + $0x240] sm:$0xff] }
  0xf5   : > { %3694 = vmatmul.mubr.msk.f32.gmra.mrb[6].mxu0 %vm547_vm0, %v5513_v5  ;;  %v3844_v36 = vld [vmem:[%s5405_s17 + $0x250] sm:$0xff]  ;;  %v3846_v42 = vld [vmem:[%s5405_s17 + $0x260] sm:$0xff]  ;;  %v3884_v44 = vld [vmem:[%s5405_s17 + $0x288] sm:$0xff] }
  0xf6   : > { %684 = vmatprep.mubr.f32.mxu0 %v5102_v0  ;;  %4211 = vmatpush1.bf16.msra.mxu0 %v4210_v6  ;;  %v3832_v6 = vld [vmem:[%s5405_s17 + $0x1f0] sm:$0xff]  ;;  %v3883_v49 = vld [vmem:[%s5405_s17 + $0x280] sm:$0xff]  ;;  %vm5835_vm2 = vmpackc.low %vm789_vm1, %vm789_vm1 }
  0xf7   : > { %4213 = vmatprep.subr.bf16.mxu0 %v4212_v8  ;;  %v3837_v8 = vld [vmem:[%s5405_s17 + $0x218] sm:$0xff]  ;;  %v4318_v9 = vpack.c.bf16 %v3832_v6, %v3830_v4  ;;  %v3848_v43 = vld [vmem:[%s5405_s17 + $0x270] sm:$0xff]  ;;  %v3887_v56 = vld [vmem:[%s5405_s17 + $0x2a0] sm:$0xff] }
  0xf8   : > { %539 = vperm.xlu0 %4803, %v445_v23   ;;  %544 = vperm.xlu1 %4804, %v446_v24   ;;  %v4320_v10 = vpack.c.bf16 %v3837_v8, %v3835_v7  ;;  %v3845_v23 = vld [vmem:[%s5405_s17 + $0x258] sm:$0xff]  ;;  %v4326_v24 = vpack.c.bf16 %v3840_v20, %v3838_v18  ;;  %v3885_v51 = vld [vmem:[%s5405_s17 + $0x290] sm:$0xff]  ;;  %v3891_v63 = vld [vmem:[%s5405_s17 + $0x2c0] sm:$0xff] }
  0xf9   : > { %3695 = vmatmul.mubr.msk.f32.gmra.mrb[8].mxu0 %vm547_vm0, %v5531_v14  ;;  %v4328_v34 = vpack.c.bf16 %v3845_v23, %v3843_v21  ;;  %v4378_v54 = vpack.c.bf16 %v3885_v51, %v3883_v49  ;;  %v3889_v57 = vld [vmem:[%s5405_s17 + $0x2b0] sm:$0xff]  ;;  %v3895_v7 = vld [vmem:[%s5405_s17 + $0x2e0] sm:$0xff] }
  0xfa   : > { %690 = vmatprep.mubr.f32.mxu0 %v5102_v0  ;;  %4215 = vmatpush1.bf16.msra.mxu0 %v4214_v15  ;;  %v3841_v15 = vld [vmem:[%s5405_s17 + $0x238] sm:$0xff]  ;;  %v4382_v61 = vpack.c.bf16 %v3889_v57, %v3887_v56  ;;  %v3893_v1 = vld [vmem:[%s5405_s17 + $0x2d0] sm:$0xff] }
  0xfb   : > { %4257 = vmatprep.subr.bf16.mxu0 %v4256_v17  ;;  %v4324_v17 = vpack.c.bf16 %v3841_v15, %v3839_v13  ;;  %v4386_v4 = vpack.c.bf16 %v3893_v1, %v3891_v63  ;;  %v3897_v8 = vld [vmem:[%s5405_s17 + $0x2f0] sm:$0xff]  ;;  %v3899_v13 = vld [vmem:[%s5405_s17 + $0x300] sm:$0xff] }
  0xfc   : > { %v4390_v11 = vpack.c.bf16 %v3897_v8, %v3895_v7  ;;  %v3901_v15 = vld [vmem:[%s5405_s17 + $0x310] sm:$0xff] }
  0xfd   : > { %3696 = vmatmul.mubr.msk.f32.gmra.mrb[10].mxu0 %vm547_vm0, %v5545_v19  ;;  %v4394_v18 = vpack.c.bf16 %v3901_v15, %v3899_v13 }
  0xfe   : > { %696 = vmatprep.mubr.f32.mxu0 %v5102_v0 }
 0x101   : > { %3697 = vmatmul.mubr.msk.f32.gmra.mrb[12].mxu0 %vm547_vm0, %v5559_v22 }
 0x102   : > { %702 = vmatprep.mubr.f32.mxu0 %v5102_v0 }
 0x105   : > { %3698 = vmatmul.mubr.msk.f32.gmra.mrb[14].mxu0 %vm547_vm0, %v5573_v25 }
 0x106   : > { %708 = vmatprep.mubr.f32.mxu0 %v5102_v0 }
 0x109   : > { %3699 = vmatmul.mubr.msk.f32.gmra.mrb[16].mxu0 %vm547_vm0, %v5581_v26 }
 0x10a   : > { %714 = vmatprep.mubr.f32.mxu0 %v5102_v0 }
 0x10d   : > { %3700 = vmatmul.mubr.msk.f32.gmra.mrb[18].mxu0 %vm547_vm0, %v5589_v27 }
 0x10e   : > { %720 = vmatprep.mubr.f32.mxu0 %v5102_v0 }
 0x111   : > { %3701 = vmatmul.mubr.msk.f32.gmra.mrb[20].mxu0 %vm547_vm0, %v5597_v28 }
 0x112   : > { %726 = vmatprep.mubr.f32.mxu0 %v5102_v0 }
 0x115   : > { %3702 = vmatmul.mubr.msk.f32.gmra.mrb[22].mxu0 %vm547_vm0, %v5605_v29 }
 0x116   : > { %732 = vmatprep.mubr.f32.mxu0 %v5102_v0 }
 0x119   : > { %3703 = vmatmul.mubr.msk.f32.gmra.mrb[24].mxu0 %vm547_vm0, %v5613_v30 }
 0x11a   : > { %738 = vmatprep.mubr.f32.mxu0 %v5102_v0 }
 0x11d   : > { %3704 = vmatmul.mubr.msk.f32.gmra.mrb[26].mxu0 %vm547_vm0, %v5621_v31 }
 0x11e   : > { %744 = vmatprep.mubr.f32.mxu0 %v5102_v0 }
 0x121   : > { %3705 = vmatmul.mubr.msk.f32.gmra.mrb[28].mxu0 %vm547_vm0, %v5629_v32 }
 0x122   : > { %750 = vmatprep.mubr.f32.mxu0 %v5102_v0 }
 0x125   : > { %3706 = vmatmul.mubr.msk.f32.gmra.mrb[30].mxu0 %vm547_vm0, %v5637_v33 }
 0x126   : > { %996 = vmatprep.mubr.f32.mxu0 %v5102_v0 }
 0x129   : > { %3744 = vmatmul.mubr.msk.f32.vlgmr.msra.gmra.mrb[32].mxu0 %vm547_vm0, %v5456_v40 }
 0x12a   : > { %4259 = vmatpush1.bf16.msra.mxu0 %v4258_v38  ;;  %1002 = vmatprep.mubr.f32.mxu0 %v5102_v0  ;;  %v3849_v38 = vld [vmem:[%s5405_s17 + $0x278] sm:$0xff] }
 0x12b   : > { %4261 = vmatprep.subr.bf16.mxu0 %v4260_v39  ;;  %v4330_v39 = vpack.c.bf16 %v3844_v36, %v3842_v35  ;;  %v4332_v41 = vpack.c.bf16 %v3849_v38, %v3847_v37 }
 0x12d   : > { %3745 = vmatmul.mubr.msk.f32.gmra.mrb[34].mxu0 %vm547_vm0, %v5477_v50 }
 0x12e   : > { %1008 = vmatprep.mubr.f32.mxu0 %v5102_v0  ;;  %4263 = vmatpush1.bf16.msra.mxu0 %v4262_v45  ;;  %v3886_v45 = vld [vmem:[%s5405_s17 + $0x298] sm:$0xff] }
 0x12f   : > { %4265 = vmatprep.subr.bf16.mxu0 %v4264_v46  ;;  %v4334_v46 = vpack.c.bf16 %v3848_v43, %v3846_v42  ;;  %v4376_v47 = vpack.c.bf16 %v3886_v45, %v3884_v44 }
 0x131   : > { %3746 = vmatmul.mubr.msk.f32.gmra.mrb[36].mxu0 %vm547_vm0, %v5495_v59 }
 0x132   : > { %1014 = vmatprep.mubr.f32.mxu0 %v5102_v0  ;;  %4267 = vmatpush1.bf16.msra.mxu0 %v4266_v52  ;;  %v3888_v52 = vld [vmem:[%s5405_s17 + $0x2a8] sm:$0xff] }
 0x133   : > { %4269 = vmatprep.subr.bf16.mxu0 %v4268_v53  ;;  %v3890_v53 = vld [vmem:[%s5405_s17 + $0x2b8] sm:$0xff] }
 0x134   : > { %v4380_v55 = vpack.c.bf16 %v3890_v53, %v3888_v52 }
 0x135   : > { %3747 = vmatmul.mubr.msk.f32.gmra.mrb[38].mxu0 %vm547_vm0, %v5513_v5 }
 0x136   : > { %1020 = vmatprep.mubr.f32.mxu0 %v5102_v0  ;;  %4271 = vmatpush1.bf16.msra.mxu0 %v4270_v58  ;;  %v3892_v58 = vld [vmem:[%s5405_s17 + $0x2c8] sm:$0xff] }
 0x137   : > { %4273 = vmatprep.subr.bf16.mxu0 %v4272_v60  ;;  %v3894_v60 = vld [vmem:[%s5405_s17 + $0x2d8] sm:$0xff] }
 0x138   : > { %v4384_v62 = vpack.c.bf16 %v3894_v60, %v3892_v58 }
 0x139   : > { %3748 = vmatmul.mubr.msk.f32.gmra.mrb[40].mxu0 %vm547_vm0, %v5531_v14 }
 0x13a   : > { %1026 = vmatprep.mubr.f32.mxu0 %v5102_v0  ;;  %4275 = vmatpush1.bf16.msra.mxu0 %v4274_v2  ;;  %v3896_v2 = vld [vmem:[%s5405_s17 + $0x2e8] sm:$0xff] }
 0x13b   : > { %4317 = vmatprep.subr.bf16.mxu0 %v4316_v3  ;;  %v3898_v3 = vld [vmem:[%s5405_s17 + $0x2f8] sm:$0xff] }
 0x13c   : > { %v4388_v6 = vpack.c.bf16 %v3898_v3, %v3896_v2 }
 0x13d   : > { %3749 = vmatmul.mubr.msk.f32.gmra.mrb[42].mxu0 %vm547_vm0, %v5545_v19 }
 0x13e   : > { %1032 = vmatprep.mubr.f32.mxu0 %v5102_v0 }
 0x141   : > { %3750 = vmatmul.mubr.msk.f32.gmra.mrb[44].mxu0 %vm547_vm0, %v5559_v22 }
 0x142   : > { %1038 = vmatprep.mubr.f32.mxu0 %v5102_v0 }
 0x145   : > { %3751 = vmatmul.mubr.msk.f32.gmra.mrb[46].mxu0 %vm547_vm0, %v5573_v25 }
 0x146   : > { %1044 = vmatprep.mubr.f32.mxu0 %v5102_v0 }
 0x149   : > { %3752 = vmatmul.mubr.msk.f32.gmra.mrb[48].mxu0 %vm547_vm0, %v5581_v26 }
 0x14a   : > { %1050 = vmatprep.mubr.f32.mxu0 %v5102_v0 }
 0x14d   : > { %3753 = vmatmul.mubr.msk.f32.gmra.mrb[50].mxu0 %vm547_vm0, %v5589_v27 }
 0x14e   : > { %1056 = vmatprep.mubr.f32.mxu0 %v5102_v0 }
 0x151   : > { %3754 = vmatmul.mubr.msk.f32.gmra.mrb[52].mxu0 %vm547_vm0, %v5597_v28 }
 0x152   : > { %1062 = vmatprep.mubr.f32.mxu0 %v5102_v0 }
 0x155   : > { %3755 = vmatmul.mubr.msk.f32.gmra.mrb[54].mxu0 %vm547_vm0, %v5605_v29 }
 0x156   : > { %1068 = vmatprep.mubr.f32.mxu0 %v5102_v0 }
 0x159   : > { %3756 = vmatmul.mubr.msk.f32.gmra.mrb[56].mxu0 %vm547_vm0, %v5613_v30 }
 0x15a   : > { %1074 = vmatprep.mubr.f32.mxu0 %v5102_v0 }
 0x15b   : > { %v5814_v21 = vpop.permute.xlu0 %469 }
 0x15d   : > { %3757 = vmatmul.mubr.msk.f32.gmra.mrb[58].mxu0 %vm547_vm0, %v5621_v31 }
 0x15e   : > { %1080 = vmatprep.mubr.f32.mxu0 %v5102_v0 }
 0x15f   : > { %v5821_v35 = vpop.permute.xlu0 %474 }
 0x161   : > { %3758 = vmatmul.mubr.msk.f32.gmra.mrb[60].mxu0 %vm547_vm0, %v5629_v32 }
 0x162   : > { %1086 = vmatprep.mubr.f32.mxu0 %v5102_v0 }
 0x163   : > { %v5853_v7 = vpop.permute.xlu0 %489 }
 0x165   : > { %3759 = vmatmul.mubr.msk.f32.gmra.mrb[62].mxu0 %vm547_vm0, %v5637_v33 }
 0x166   : > { %1328 = vmatprep.mubr.f32.mxu0 %v5102_v0 }
 0x169   : > { %3797 = vmatmul.mubr.msk.f32.vlgmr.msra.gmra.mrb[64].mxu0 %vm547_vm0, %v5456_v40 }
 0x16a   : > { %4319 = vmatpush1.bf16.msra.mxu0 %v4318_v9  ;;  %1334 = vmatprep.mubr.f32.mxu0 %v5102_v0  ;;  %v3900_v9 = vld [vmem:[%s5405_s17 + $0x308] sm:$0xff] }
 0x16b   : > { %4321 = vmatprep.subr.bf16.mxu0 %v4320_v10  ;;  %v3902_v10 = vld [vmem:[%s5405_s17 + $0x318] sm:$0xff] }
 0x16c   : > { %v4392_v12 = vpack.c.bf16 %v3902_v10, %v3900_v9 }
 0x16d   : > { %3798 = vmatmul.mubr.msk.f32.gmra.mrb[66].mxu0 %vm547_vm0, %v5477_v50 }
 0x16e   : > { %1340 = vmatprep.mubr.f32.mxu0 %v5102_v0  ;;  %4323 = vmatpush1.bf16.msra.mxu0 %v4322_v16  ;;  %v3937_v16 = vld [vmem:[%s5405_s17 + $0x328] sm:$0xff] }
 0x16f   : > { %4325 = vmatprep.subr.bf16.mxu0 %v4324_v17  ;;  %v3939_v17 = vld [vmem:[%s5405_s17 + $0x338] sm:$0xff] }
 0x170   : > { %v4436_v20 = vpack.c.bf16 %v3939_v17, %v3937_v16 }
 0x171   : > { %3799 = vmatmul.mubr.msk.f32.gmra.mrb[68].mxu0 %vm547_vm0, %v5495_v59 }
 0x172   : > { %1346 = vmatprep.mubr.f32.mxu0 %v5102_v0  ;;  %4327 = vmatpush1.bf16.msra.mxu0 %v4326_v24 }
 0x173   : > { %4329 = vmatprep.subr.bf16.mxu0 %v4328_v34 }
 0x175   : > { %3800 = vmatmul.mubr.msk.f32.gmra.mrb[70].mxu0 %vm547_vm0, %v5513_v5 }
 0x176   : > { %1352 = vmatprep.mubr.f32.mxu0 %v5102_v0  ;;  %4331 = vmatpush1.bf16.msra.mxu0 %v4330_v39 }
 0x177   : > { %4333 = vmatprep.subr.bf16.mxu0 %v4332_v41  ;;  %v5827_v41 = vpop.permute.xlu1 %479 }
 0x179   : > { %3801 = vmatmul.mubr.msk.f32.gmra.mrb[72].mxu0 %vm547_vm0, %v5531_v14 }
 0x17a   : > { %1358 = vmatprep.mubr.f32.mxu0 %v5102_v0  ;;  %4335 = vmatpush1.bf16.msra.mxu0 %v4334_v46 }
 0x17b   : > { %4377 = vmatprep.subr.bf16.mxu0 %v4376_v47 }
 0x17d   : > { %3802 = vmatmul.mubr.msk.f32.gmra.mrb[74].mxu0 %vm547_vm0, %v5545_v19 }
 0x17e   : > { %1364 = vmatprep.mubr.f32.mxu0 %v5102_v0 }
 0x181   : > { %3803 = vmatmul.mubr.msk.f32.gmra.mrb[76].mxu0 %vm547_vm0, %v5559_v22 }
 0x182   : > { %1370 = vmatprep.mubr.f32.mxu0 %v5102_v0 }
 0x185   : > { %3804 = vmatmul.mubr.msk.f32.gmra.mrb[78].mxu0 %vm547_vm0, %v5573_v25 }
 0x186   : > { %1376 = vmatprep.mubr.f32.mxu0 %v5102_v0 }
 0x189   : > { %3805 = vmatmul.mubr.msk.f32.gmra.mrb[80].mxu0 %vm547_vm0, %v5581_v26 }
 0x18a   : > { %1382 = vmatprep.mubr.f32.mxu0 %v5102_v0 }
 0x18d   : > { %3806 = vmatmul.mubr.msk.f32.gmra.mrb[82].mxu0 %vm547_vm0, %v5589_v27 }
 0x18e   : > { %1388 = vmatprep.mubr.f32.mxu0 %v5102_v0 }
 0x191   : > { %3807 = vmatmul.mubr.msk.f32.gmra.mrb[84].mxu0 %vm547_vm0, %v5597_v28 }
 0x192   : > { %1394 = vmatprep.mubr.f32.mxu0 %v5102_v0 }
 0x195   : > { %3808 = vmatmul.mubr.msk.f32.gmra.mrb[86].mxu0 %vm547_vm0, %v5605_v29 }
 0x196   : > { %1400 = vmatprep.mubr.f32.mxu0 %v5102_v0 }
 0x199   : > { %3809 = vmatmul.mubr.msk.f32.gmra.mrb[88].mxu0 %vm547_vm0, %v5613_v30 }
 0x19a   : > { %1406 = vmatprep.mubr.f32.mxu0 %v5102_v0 }
 0x19d   : > { %3810 = vmatmul.mubr.msk.f32.gmra.mrb[90].mxu0 %vm547_vm0, %v5621_v31 }
 0x19e   : > { %1412 = vmatprep.mubr.f32.mxu0 %v5102_v0 }
 0x1a1   : > { %3811 = vmatmul.mubr.msk.f32.gmra.mrb[92].mxu0 %vm547_vm0, %v5629_v32 }
 0x1a2   : > { %1418 = vmatprep.mubr.f32.mxu0 %v5102_v0 }
 0x1a5   : > { %3812 = vmatmul.mubr.msk.f32.gmra.mrb[94].mxu0 %vm547_vm0, %v5637_v33 }
 0x1a6   : > { %1660 = vmatprep.mubr.f32.mxu0 %v5102_v0 }
 0x1a9   : > { %3850 = vmatmul.mubr.msk.f32.vlgmr.msra.gmra.mrb[96].mxu0 %vm547_vm0, %v5456_v40 }
 0x1aa   : > { %4379 = vmatpush1.bf16.msra.mxu0 %v4378_v54  ;;  %1666 = vmatprep.mubr.f32.mxu0 %v5102_v0 }
 0x1ab   : > { %4381 = vmatprep.subr.bf16.mxu0 %v4380_v55  ;;  %v5841_v55 = vpop.permute.xlu1 %484 }
 0x1ad   : > { %3851 = vmatmul.mubr.msk.f32.gmra.mrb[98].mxu0 %vm547_vm0, %v5477_v50 }
 0x1ae   : > { %1672 = vmatprep.mubr.f32.mxu0 %v5102_v0  ;;  %4383 = vmatpush1.bf16.msra.mxu0 %v4382_v61 }
 0x1af   : > { %4385 = vmatprep.subr.bf16.mxu0 %v4384_v62  ;;  %v5857_v10 = vpop.permute.xlu1 %494 }
 0x1b1   : > { %3852 = vmatmul.mubr.msk.f32.gmra.mrb[100].mxu0 %vm547_vm0, %v5495_v59 }
 0x1b2   : > { %1678 = vmatprep.mubr.f32.mxu0 %v5102_v0  ;;  %4387 = vmatpush1.bf16.msra.mxu0 %v4386_v4 }
 0x1b3   : > { %4389 = vmatprep.subr.bf16.mxu0 %v4388_v6 }
 0x1b5   : > { %3853 = vmatmul.mubr.msk.f32.gmra.mrb[102].mxu0 %vm547_vm0, %v5513_v5 }
 0x1b6   : > { %1684 = vmatprep.mubr.f32.mxu0 %v5102_v0  ;;  %4391 = vmatpush1.bf16.msra.mxu0 %v4390_v11 }
 0x1b7   : > { %4393 = vmatprep.subr.bf16.mxu0 %v4392_v12 }
 0x1b9   : > { %3854 = vmatmul.mubr.msk.f32.gmra.mrb[104].mxu0 %vm547_vm0, %v5531_v14 }
 0x1ba   : > { %1690 = vmatprep.mubr.f32.mxu0 %v5102_v0  ;;  %4395 = vmatpush1.bf16.msra.mxu0 %v4394_v18 }
 0x1bb   : > { %4437 = vmatprep.subr.bf16.mxu0 %v4436_v20 }
 0x1bc   : > { %v662_v23 = vpop.f32.mrb[0].mxu0 }
 0x1bd   : > { %v664_v24 = vpop.f32.mrb[1].mxu0  ;;  %3855 = vmatmul.mubr.msk.f32.gmra.mrb[106].mxu0 %vm547_vm0, %v5545_v19  ;;  %v663_v34 = vadd.f32 %v662_v23, %v5814_v21 }
 0x1be   : > { %1696 = vmatprep.mubr.f32.mxu0 %v5102_v0  ;;  %v665_v36 = vadd.f32 %v664_v24, %v5814_v21 }
 0x1bf   : > { %v757_v44 = vmax.f32 %v663_v34, 0.0 }
 0x1c0   : > { %v668_v37 = vpop.f32.mrb[2].mxu0  ;;  %v758_v47 = vmax.f32 %v665_v36, 0.0 }
 0x1c1   : > { %v669_v38 = vadd.f32 %v668_v37, %v5821_v35  ;;  %v670_v39 = vpop.f32.mrb[3].mxu0  ;;  %3856 = vmatmul.mubr.msk.f32.gmra.mrb[108].mxu0 %vm547_vm0, %v5559_v22  ;;  %v5869_v37 = vpop.permute.xlu0 %499 }
 0x1c2   : > { %v671_v42 = vadd.f32 %v670_v39, %v5821_v35  ;;  %1702 = vmatprep.mubr.f32.mxu0 %v5102_v0 }
 0x1c3   : > { %v759_v43 = vmax.f32 %v669_v38, 0.0 }
 0x1c4   : > { %v760_v45 = vmax.f32 %v671_v42, 0.0  ;;  %v674_v46 = vpop.f32.mrb[4].mxu0  ;;  %v5873_v42 = vpop.permute.xlu1 %504 }
 0x1c5   : > { %v676_v49 = vpop.f32.mrb[5].mxu0  ;;  %3857 = vmatmul.mubr.msk.f32.gmra.mrb[110].mxu0 %vm547_vm0, %v5573_v25  ;;  %v4159_v52 = vpack.c.bf16 %v759_v43, %v757_v44  ;;  %v675_v54 = vadd.f32 %v674_v46, %v5827_v41 }
 0x1c6   : > { %v4156_v53 = vpack.c.bf16 %v760_v45, %v758_v47  ;;  %1708 = vmatprep.mubr.f32.mxu0 %v5102_v0  ;;  %v677_v56 = vadd.f32 %v676_v49, %v5827_v41 }
 0x1c7   : > { %v761_v62 = vmax.f32 %v675_v54, 0.0 }
 0x1c8   : > { %v680_v57 = vpop.f32.mrb[6].mxu0  ;;  %4158 = vmatprep.subr.msk.bf16.mxu1 %vm5835_vm2, %v4156_v53  ;;  %v762_v1 = vmax.f32 %v677_v56, 0.0 }
 0x1c9   : > { %v681_v58 = vadd.f32 %v680_v57, %v5841_v55  ;;  %v682_v60 = vpop.f32.mrb[7].mxu0  ;;  %4160 = vmatpush1.bf16.xpose.msra.mxu1 %v4159_v52  ;;  %3858 = vmatmul.mubr.msk.f32.gmra.mrb[112].mxu0 %vm547_vm0, %v5581_v26 }
 0x1ca   : > { %v683_v61 = vadd.f32 %v682_v60, %v5841_v55  ;;  %1714 = vmatprep.mubr.f32.mxu0 %v5102_v0  ;;  %v5885_v60 = vpop.permute.xlu0 %509 }
 0x1cb   : > { %v763_v63 = vmax.f32 %v681_v58, 0.0 }
 0x1cc   : > { %v764_v2 = vmax.f32 %v683_v61, 0.0  ;;  %v686_v3 = vpop.f32.mrb[8].mxu0 }
 0x1cd   : > { %v4164_v4 = vpack.c.bf16 %v763_v63, %v761_v62  ;;  %v688_v6 = vpop.f32.mrb[9].mxu0  ;;  %3859 = vmatmul.mubr.msk.f32.gmra.mrb[114].mxu0 %vm547_vm0, %v5589_v27  ;;  %v687_v9 = vadd.f32 %v686_v3, %v5853_v7  ;;  %v5889_v63 = vpop.permute.xlu1 %514 }
 0x1ce   : > { %v4161_v8 = vpack.c.bf16 %v764_v2, %v762_v1  ;;  %1720 = vmatprep.mubr.f32.mxu0 %v5102_v0  ;;  %v689_v11 = vadd.f32 %v688_v6, %v5853_v7 }
 0x1cf   : > { %v765_v17 = vmax.f32 %v687_v9, 0.0 }
 0x1d0   : > { %v692_v12 = vpop.f32.mrb[10].mxu0  ;;  %4163 = vmatprep.subr.msk.bf16.mxu1 %vm5835_vm2, %v4161_v8  ;;  %v766_v20 = vmax.f32 %v689_v11, 0.0  ;;  %v3936_v11 = vld [vmem:[%s5405_s17 + $0x320] sm:$0xff] }
 0x1d1   : > { %v693_v13 = vadd.f32 %v692_v12, %v5857_v10  ;;  %v694_v15 = vpop.f32.mrb[11].mxu0  ;;  %4165 = vmatpush1.bf16.xpose.msra.mxu1 %v4164_v4  ;;  %3860 = vmatmul.mubr.msk.f32.gmra.mrb[116].mxu0 %vm547_vm0, %v5597_v28  ;;  %v3938_v12 = vld [vmem:[%s5405_s17 + $0x330] sm:$0xff] }
 0x1d2   : > { %v695_v16 = vadd.f32 %v694_v15, %v5857_v10  ;;  %1726 = vmatprep.mubr.f32.mxu0 %v5102_v0 }
 0x1d3   : > { %v767_v18 = vmax.f32 %v693_v13, 0.0 }
 0x1d4   : > { %v768_v23 = vmax.f32 %v695_v16, 0.0  ;;  %v698_v24 = vpop.f32.mrb[12].mxu0 }
 0x1d5   : > { %v4169_v34 = vpack.c.bf16 %v767_v18, %v765_v17  ;;  %v700_v36 = vpop.f32.mrb[13].mxu0  ;;  %3861 = vmatmul.mubr.msk.f32.gmra.mrb[118].mxu0 %vm547_vm0, %v5605_v29  ;;  %v699_v39 = vadd.f32 %v698_v24, %v5869_v37  ;;  %v3941_v17 = vld [vmem:[%s5405_s17 + $0x348] sm:$0xff]  ;;  %v3943_v18 = vld [vmem:[%s5405_s17 + $0x358] sm:$0xff]  ;;  %v5905_v24 = vpop.permute.xlu0 %519 }
 0x1d6   : > { %v4166_v38 = vpack.c.bf16 %v768_v23, %v766_v20  ;;  %1732 = vmatprep.mubr.f32.mxu0 %v5102_v0  ;;  %v701_v43 = vadd.f32 %v700_v36, %v5869_v37  ;;  %v4438_v36 = vpack.c.bf16 %v3938_v12, %v3936_v11 }
 0x1d7   : > { %v769_v49 = vmax.f32 %v699_v39, 0.0  ;;  %v4440_v39 = vpack.c.bf16 %v3943_v18, %v3941_v17  ;;  %v3948_v17 = vld [vmem:[%s5405_s17 + $0x380] sm:$0xff]  ;;  %v3950_v18 = vld [vmem:[%s5405_s17 + $0x390] sm:$0xff] }
 0x1d8   : > { %v704_v44 = vpop.f32.mrb[14].mxu0  ;;  %4168 = vmatprep.subr.msk.bf16.mxu1 %vm5835_vm2, %v4166_v38  ;;  %v770_v53 = vmax.f32 %v701_v43, 0.0  ;;  %v3940_v43 = vld [vmem:[%s5405_s17 + $0x340] sm:$0xff] }
 0x1d9   : > { %v705_v45 = vadd.f32 %v704_v44, %v5873_v42  ;;  %v706_v46 = vpop.f32.mrb[15].mxu0  ;;  %4170 = vmatpush1.bf16.xpose.msra.mxu1 %v4169_v34  ;;  %3862 = vmatmul.mubr.msk.f32.gmra.mrb[120].mxu0 %vm547_vm0, %v5613_v30  ;;  %v3942_v44 = vld [vmem:[%s5405_s17 + $0x350] sm:$0xff]  ;;  %v5929_v11 = vpop.permute.xlu0 %529 }
 0x1da   : > { %v707_v47 = vadd.f32 %v706_v46, %v5873_v42  ;;  %1738 = vmatprep.mubr.f32.mxu0 %v5102_v0 }
 0x1db   : > { %v771_v52 = vmax.f32 %v705_v45, 0.0  ;;  %v5911_v45 = vpop.permute.xlu1 %524 }
 0x1dc   : > { %v772_v54 = vmax.f32 %v707_v47, 0.0  ;;  %v710_v56 = vpop.f32.mrb[16].mxu0 }
 0x1dd   : > { %v4174_v57 = vpack.c.bf16 %v771_v52, %v769_v49  ;;  %v712_v58 = vpop.f32.mrb[17].mxu0  ;;  %3863 = vmatmul.mubr.msk.f32.gmra.mrb[122].mxu0 %vm547_vm0, %v5621_v31  ;;  %v711_v62 = vadd.f32 %v710_v56, %v5885_v60  ;;  %v3947_v49 = vld [vmem:[%s5405_s17 + $0x378] sm:$0xff]  ;;  %v4442_v56 = vpack.c.bf16 %v3942_v44, %v3940_v43  ;;  %v4450_v44 = vpack.c.bf16 %v3950_v18, %v3948_v17 }
 0x1de   : > { %v4171_v61 = vpack.c.bf16 %v772_v54, %v770_v53  ;;  %1744 = vmatprep.mubr.f32.mxu0 %v5102_v0  ;;  %v713_v1 = vadd.f32 %v712_v58, %v5885_v60 }
 0x1df   : > { %v773_v8 = vmax.f32 %v711_v62, 0.0  ;;  %v3944_v62 = vld [vmem:[%s5405_s17 + $0x360] sm:$0xff] }
 0x1e0   : > { %v716_v2 = vpop.f32.mrb[18].mxu0  ;;  %4173 = vmatprep.subr.msk.bf16.mxu1 %vm5835_vm2, %v4171_v61  ;;  %v774_v13 = vmax.f32 %v713_v1, 0.0  ;;  %v3946_v1 = vld [vmem:[%s5405_s17 + $0x370] sm:$0xff] }
 0x1e1   : > { %v717_v3 = vadd.f32 %v716_v2, %v5889_v63  ;;  %v718_v4 = vpop.f32.mrb[19].mxu0  ;;  %4175 = vmatpush1.bf16.xpose.msra.mxu1 %v4174_v57  ;;  %3864 = vmatmul.mubr.msk.f32.gmra.mrb[124].mxu0 %vm547_vm0, %v5629_v32 }
 0x1e2   : > { %v719_v6 = vadd.f32 %v718_v4, %v5889_v63  ;;  %1750 = vmatprep.mubr.f32.mxu0 %v5102_v0 }
 0x1e3   : > { %v775_v9 = vmax.f32 %v717_v3, 0.0 }
 0x1e4   : > { %v776_v15 = vmax.f32 %v719_v6, 0.0  ;;  %v722_v16 = vpop.f32.mrb[20].mxu0  ;;  %v3949_v6 = vld [vmem:[%s5405_s17 + $0x388] sm:$0xff] }
 0x1e5   : > { %v4179_v20 = vpack.c.bf16 %v775_v9, %v773_v8  ;;  %v724_v23 = vpop.f32.mrb[21].mxu0  ;;  %3865 = vmatmul.mubr.msk.f32.gmra.mrb[126].mxu0 %vm547_vm0, %v5637_v33  ;;  %v723_v38 = vadd.f32 %v722_v16, %v5905_v24  ;;  %v3945_v33 = vld [vmem:[%s5405_s17 + $0x368] sm:$0xff]  ;;  %v3951_v8 = vld [vmem:[%s5405_s17 + $0x398] sm:$0xff] }
 0x1e6   : > { %v4176_v34 = vpack.c.bf16 %v776_v15, %v774_v13  ;;  %1992 = vmatprep.mubr.f32.mxu0 %v5102_v0  ;;  %v725_v46 = vadd.f32 %v724_v23, %v5905_v24  ;;  %v4444_v61 = vpack.c.bf16 %v3947_v49, %v3945_v33  ;;  %v4446_v13 = vpack.c.bf16 %v3946_v1, %v3944_v62  ;;  %v3952_v49 = vld [vmem:[%s5405_s17 + $0x3a0] sm:$0xff] }
 0x1e7   : > { %v777_v57 = vmax.f32 %v723_v38, 0.0  ;;  %v4448_v16 = vpack.c.bf16 %v3951_v8, %v3949_v6 }
 0x1e8   : > { %v728_v47 = vpop.f32.mrb[22].mxu0  ;;  %4178 = vmatprep.subr.msk.bf16.mxu1 %vm5835_vm2, %v4176_v34  ;;  %v778_v2 = vmax.f32 %v725_v46, 0.0 }
 0x1e9   : > { %v729_v52 = vadd.f32 %v728_v47, %v5911_v45  ;;  %v730_v53 = vpop.f32.mrb[23].mxu0  ;;  %4180 = vmatpush1.bf16.xpose.msra.mxu1 %v4179_v20  ;;  %3903 = vmatmul.mubr.msk.f32.vlgmr.msra.gmra.mrb[128].mxu0 %vm547_vm0, %v5456_v40  ;;  %v5935_v20 = vpop.permute.xlu1 %534 }
 0x1ea   : > { %v731_v54 = vadd.f32 %v730_v53, %v5911_v45  ;;  %4439 = vmatpush1.bf16.msra.mxu0 %v4438_v36  ;;  %1998 = vmatprep.mubr.f32.mxu0 %v5102_v0  ;;  %v3955_v36 = vld [vmem:[%s5405_s17 + $0x3b8] sm:$0xff] }
 0x1eb   : > { %v779_v58 = vmax.f32 %v729_v52, 0.0  ;;  %4441 = vmatprep.subr.bf16.mxu0 %v4440_v39  ;;  %v3954_v52 = vld [vmem:[%s5405_s17 + $0x3b0] sm:$0xff] }
 0x1ec   : > { %v780_v3 = vmax.f32 %v731_v54, 0.0  ;;  %v734_v4 = vpop.f32.mrb[24].mxu0 }
 0x1ed   : > { %v4184_v40 = vpack.c.bf16 %v779_v58, %v777_v57  ;;  %v736_v9 = vpop.f32.mrb[25].mxu0  ;;  %3904 = vmatmul.mubr.msk.f32.gmra.mrb[130].mxu0 %vm547_vm0, %v5477_v50  ;;  %v735_v15 = vadd.f32 %v734_v4, %v5929_v11  ;;  %v3953_v50 = vld [vmem:[%s5405_s17 + $0x3a8] sm:$0xff]  ;;  %v3992_v58 = vld [vmem:[%s5405_s17 + $0x3d8] sm:$0xff]  ;;  %v5957_v6 = vpop.permute.xlu1 %544 }
 0x1ee   : > { %v4181_v12 = vpack.c.bf16 %v780_v3, %v778_v2  ;;  %2004 = vmatprep.mubr.f32.mxu0 %v5102_v0  ;;  %4443 = vmatpush1.bf16.msra.mxu0 %v4442_v56  ;;  %v737_v23 = vadd.f32 %v736_v9, %v5929_v11  ;;  %v4452_v33 = vpack.c.bf16 %v3955_v36, %v3953_v50  ;;  %v3990_v57 = vld [vmem:[%s5405_s17 + $0x3c8] sm:$0xff] }
 0x1ef   : > { %4445 = vmatprep.subr.bf16.mxu0 %v4444_v61  ;;  %v781_v46 = vmax.f32 %v735_v15, 0.0  ;;  %v4454_v2 = vpack.c.bf16 %v3954_v52, %v3952_v49  ;;  %v4496_v4 = vpack.c.bf16 %v3992_v58, %v3990_v57 }
 0x1f0   : > { %v740_v34 = vpop.f32.mrb[26].mxu0  ;;  %4183 = vmatprep.subr.msk.bf16.mxu1 %vm5835_vm2, %v4181_v12  ;;  %v782_v53 = vmax.f32 %v737_v23, 0.0 }
 0x1f1   : > { %v741_v38 = vadd.f32 %v740_v34, %v5935_v20  ;;  %v742_v39 = vpop.f32.mrb[27].mxu0  ;;  %4185 = vmatpush1.bf16.xpose.msra.mxu1 %v4184_v40  ;;  %3905 = vmatmul.mubr.msk.f32.gmra.mrb[132].mxu0 %vm547_vm0, %v5495_v59  ;;  %v5953_v59 = vpop.permute.xlu0 %539 }
 0x1f2   : > { %v743_v43 = vadd.f32 %v742_v39, %v5935_v20  ;;  %2010 = vmatprep.mubr.f32.mxu0 %v5102_v0  ;;  %4447 = vmatpush1.bf16.msra.mxu0 %v4446_v13 }
 0x1f3   : > { %v783_v47 = vmax.f32 %v741_v38, 0.0  ;;  %4449 = vmatprep.subr.bf16.mxu0 %v4448_v16 }
 0x1f4   : > { %v784_v54 = vmax.f32 %v743_v43, 0.0  ;;  %v746_v56 = vpop.f32.mrb[28].mxu0 }
 0x1f5   : > { %v4189_v61 = vpack.c.bf16 %v783_v47, %v781_v46  ;;  %v748_v62 = vpop.f32.mrb[29].mxu0  ;;  %3906 = vmatmul.mubr.msk.f32.gmra.mrb[134].mxu0 %vm547_vm0, %v5513_v5  ;;  %v747_v3 = vadd.f32 %v746_v56, %v5953_v59 }
 0x1f6   : > { %v4186_v1 = vpack.c.bf16 %v784_v54, %v782_v53  ;;  %2016 = vmatprep.mubr.f32.mxu0 %v5102_v0  ;;  %4451 = vmatpush1.bf16.msra.mxu0 %v4450_v44  ;;  %v749_v8 = vadd.f32 %v748_v62, %v5953_v59 }
 0x1f7   : > { %4453 = vmatprep.subr.bf16.mxu0 %v4452_v33  ;;  %v785_v13 = vmax.f32 %v747_v3, 0.0 }
 0x1f8   : > { %v752_v40 = vpop.f32.mrb[30].mxu0  ;;  %4188 = vmatprep.subr.msk.bf16.mxu1 %vm5835_vm2, %v4186_v1  ;;  %v786_v16 = vmax.f32 %v749_v8, 0.0 }
 0x1f9   : > { %v753_v5 = vadd.f32 %v752_v40, %v5957_v6  ;;  %v754_v9 = vpop.f32.mrb[31].mxu0  ;;  %4190 = vmatpush1.bf16.xpose.msra.mxu1 %v4189_v61  ;;  %3907 = vmatmul.mubr.msk.f32.gmra.mrb[136].mxu0 %vm547_vm0, %v5531_v14 }
 0x1fa   : > { %v755_v12 = vadd.f32 %v754_v9, %v5957_v6  ;;  %2022 = vmatprep.mubr.f32.mxu0 %v5102_v0  ;;  %4455 = vmatpush1.bf16.msra.mxu0 %v4454_v2 }
 0x1fb   : > { %v787_v15 = vmax.f32 %v753_v5, 0.0  ;;  %4497 = vmatprep.subr.bf16.mxu0 %v4496_v4 }
 0x1fc   : > { %v788_v17 = vmax.f32 %v755_v12, 0.0  ;;  %v998_v18 = vpop.f32.mrb[32].mxu0 }
 0x1fd   : > { %v4194_v23 = vpack.c.bf16 %v787_v15, %v785_v13  ;;  %v1000_v34 = vpop.f32.mrb[33].mxu0  ;;  %3908 = vmatmul.mubr.msk.f32.gmra.mrb[138].mxu0 %vm547_vm0, %v5545_v19  ;;  %v999_v14 = vadd.f32 %v998_v18, %v5814_v21 }
 0x1fe   : > { %v4191_v50 = vpack.c.bf16 %v788_v17, %v786_v16  ;;  %2028 = vmatprep.mubr.f32.mxu0 %v5102_v0  ;;  %v1001_v36 = vadd.f32 %v1000_v34, %v5814_v21 }
 0x1ff   : > { %v1093_v44 = vmax.f32 %v999_v14, 0.0 }
 0x200   : > { %4193 = vmatprep.subr.msk.bf16.mxu1 %vm5835_vm2, %v4191_v50  ;;  %v1004_v38 = vpop.f32.mrb[34].mxu0  ;;  %v1094_v47 = vmax.f32 %v1001_v36, 0.0 }
 0x201   : > { %v1005_v39 = vadd.f32 %v1004_v38, %v5821_v35  ;;  %4195 = vmatpush1.bf16.xpose.msra.mxu1 %v4194_v23  ;;  %v1006_v43 = vpop.f32.mrb[35].mxu0  ;;  %3909 = vmatmul.mubr.msk.f32.gmra.mrb[140].mxu0 %vm547_vm0, %v5559_v22 }
 0x202   : > { %v1007_v19 = vadd.f32 %v1006_v43, %v5821_v35  ;;  %2034 = vmatprep.mubr.f32.mxu0 %v5102_v0 }
 0x203   : > { %v1095_v46 = vmax.f32 %v1005_v39, 0.0 }
 0x204   : > { %v1096_v33 = vmax.f32 %v1007_v19, 0.0  ;;  %v1010_v49 = vpop.f32.mrb[36].mxu0 }
 0x205   : > { %v4219_v52 = vpack.c.bf16 %v1095_v46, %v1093_v44  ;;  %v1012_v53 = vpop.f32.mrb[37].mxu0  ;;  %3910 = vmatmul.mubr.msk.f32.gmra.mrb[142].mxu0 %vm547_vm0, %v5573_v25  ;;  %v1011_v56 = vadd.f32 %v1010_v49, %v5827_v41 }
 0x206   : > { %v4216_v54 = vpack.c.bf16 %v1096_v33, %v1094_v47  ;;  %2040 = vmatprep.mubr.f32.mxu0 %v5102_v0  ;;  %v1013_v22 = vadd.f32 %v1012_v53, %v5827_v41 }
 0x207   : > { %v1097_v62 = vmax.f32 %v1011_v56, 0.0 }
 0x208   : > { %v1016_v57 = vpop.f32.mrb[38].mxu0  ;;  %4218 = vmatprep.subr.msk.bf16.mxu1 %vm5835_vm2, %v4216_v54  ;;  %906 = vmatmul.mubr.f32.vlgmr.msra.gmra.mrb[0].mxu1 %v5104_v48  ;;  %v1098_v2 = vmax.f32 %v1013_v22, 0.0 }
 0x209   : > { %v1017_v58 = vadd.f32 %v1016_v57, %v5841_v55  ;;  %v1018_v61 = vpop.f32.mrb[39].mxu0  ;;  %4220 = vmatpush1.bf16.xpose.msra.mxu1 %v4219_v52  ;;  %3911 = vmatmul.mubr.msk.f32.gmra.mrb[144].mxu0 %vm547_vm0, %v5581_v26 }
 0x20a   : > { %v1019_v25 = vadd.f32 %v1018_v61, %v5841_v55  ;;  %2046 = vmatprep.mubr.f32.mxu0 %v5102_v0  ;;  %3776 = vmatprep.mubr.msk.f32.mxu1 %vm789_vm1, %v5104_v48 }
 0x20b   : > { %v1099_v1 = vmax.f32 %v1017_v58, 0.0 }
 0x20c   : > { %v1100_v3 = vmax.f32 %v1019_v25, 0.0  ;;  %v1022_v4 = vpop.f32.mrb[40].mxu0 }
 0x20d   : > { %v4224_v8 = vpack.c.bf16 %v1099_v1, %v1097_v62  ;;  %v1024_v40 = vpop.f32.mrb[41].mxu0  ;;  %3912 = vmatmul.mubr.msk.f32.gmra.mrb[146].mxu0 %vm547_vm0, %v5589_v27  ;;  %v1023_v26 = vadd.f32 %v1022_v4, %v5853_v7  ;;  %v3989_v62 = vld [vmem:[%s5405_s17 + $0x3c0] sm:$0xff]  ;;  %v3991_v1 = vld [vmem:[%s5405_s17 + $0x3d0] sm:$0xff] }
 0x20e   : > { %v4221_v5 = vpack.c.bf16 %v1100_v3, %v1098_v2  ;;  %2052 = vmatprep.mubr.f32.mxu0 %v5102_v0  ;;  %v1025_v9 = vadd.f32 %v1024_v40, %v5853_v7  ;;  %v3996_v40 = vld [vmem:[%s5405_s17 + $0x3f8] sm:$0xff] }
 0x20f   : > { %v1101_v16 = vmax.f32 %v1023_v26, 0.0 }
 0x210   : > { %v1028_v12 = vpop.f32.mrb[42].mxu0  ;;  %4223 = vmatprep.subr.msk.bf16.mxu1 %vm5835_vm2, %v4221_v5  ;;  %v1102_v18 = vmax.f32 %v1025_v9, 0.0 }
 0x211   : > { %v1029_v13 = vadd.f32 %v1028_v12, %v5857_v10  ;;  %v1030_v15 = vpop.f32.mrb[43].mxu0  ;;  %4225 = vmatpush1.bf16.xpose.msra.mxu1 %v4224_v8  ;;  %3913 = vmatmul.mubr.msk.f32.gmra.mrb[148].mxu0 %vm547_vm0, %v5597_v28  ;;  %v3994_v8 = vld [vmem:[%s5405_s17 + $0x3e8] sm:$0xff]  ;;  %v4498_v12 = vpack.c.bf16 %v3991_v1, %v3989_v62 }
 0x212   : > { %v1031_v27 = vadd.f32 %v1030_v15, %v5857_v10  ;;  %2058 = vmatprep.mubr.f32.mxu0 %v5102_v0  ;;  %v4500_v15 = vpack.c.bf16 %v3996_v40, %v3994_v8  ;;  %v4006_v1 = vld [vmem:[%s5405_s17 + $0x448] sm:$0xff]  ;;  %v6084_v8 = vld [vmem:[%s6694_s1 + $0x10] sm:$0xff] }
 0x213   : > { %v1103_v17 = vmax.f32 %v1029_v13, 0.0 }
 0x214   : > { %v1104_v23 = vmax.f32 %v1031_v27, 0.0  ;;  %v1034_v34 = vpop.f32.mrb[44].mxu0  ;;  %v3993_v27 = vld [vmem:[%s5405_s17 + $0x3e0] sm:$0xff] }
 0x215   : > { %v4229_v50 = vpack.c.bf16 %v1103_v17, %v1101_v16  ;;  %v1036_v14 = vpop.f32.mrb[45].mxu0  ;;  %3914 = vmatmul.mubr.msk.f32.gmra.mrb[150].mxu0 %vm547_vm0, %v5605_v29  ;;  %v1035_v38 = vadd.f32 %v1034_v34, %v5869_v37  ;;  %v3995_v16 = vld [vmem:[%s5405_s17 + $0x3f0] sm:$0xff]  ;;  %v4000_v34 = vld [vmem:[%s5405_s17 + $0x418] sm:$0xff] }
 0x216   : > { %v4226_v36 = vpack.c.bf16 %v1104_v23, %v1102_v18  ;;  %2064 = vmatprep.mubr.f32.mxu0 %v5102_v0  ;;  %v1037_v28 = vadd.f32 %v1036_v14, %v5869_v37  ;;  %v3998_v23 = vld [vmem:[%s5405_s17 + $0x408] sm:$0xff] }
 0x217   : > { %v1105_v44 = vmax.f32 %v1035_v38, 0.0 }
 0x218   : > { %v1040_v39 = vpop.f32.mrb[46].mxu0  ;;  %4228 = vmatprep.subr.msk.bf16.mxu1 %vm5835_vm2, %v4226_v36  ;;  %v1106_v47 = vmax.f32 %v1037_v28, 0.0  ;;  %v6054_v36 = vld [vmem:[%s6694_s1] sm:$0xff]  ;;  %v4502_v28 = vpack.c.bf16 %v3995_v16, %v3993_v27 }
 0x219   : > { %v1041_v43 = vadd.f32 %v1040_v39, %v5873_v42  ;;  %v1042_v19 = vpop.f32.mrb[47].mxu0  ;;  %4230 = vmatpush1.bf16.xpose.msra.mxu1 %v4229_v50  ;;  %3915 = vmatmul.mubr.msk.f32.gmra.mrb[152].mxu0 %vm547_vm0, %v5613_v30 }
 0x21a   : > { %v1043_v29 = vadd.f32 %v1042_v19, %v5873_v42  ;;  %2070 = vmatprep.mubr.f32.mxu0 %v5102_v0  ;;  %v4504_v19 = vpack.c.bf16 %v4000_v34, %v3998_v23  ;;  %v4045_v23 = vld [vmem:[%s5405_s17 + $0x478] sm:$0xff] }
 0x21b   : > { %v1107_v46 = vmax.f32 %v1041_v43, 0.0 }
 0x21c   : > { %v1108_v33 = vmax.f32 %v1043_v29, 0.0  ;;  %v1046_v49 = vpop.f32.mrb[48].mxu0  ;;  %v3997_v29 = vld [vmem:[%s5405_s17 + $0x400] sm:$0xff] }
 0x21d   : > { %v4234_v52 = vpack.c.bf16 %v1107_v46, %v1105_v44  ;;  %v1048_v53 = vpop.f32.mrb[49].mxu0  ;;  %3916 = vmatmul.mubr.msk.f32.gmra.mrb[154].mxu0 %vm547_vm0, %v5621_v31  ;;  %v1047_v30 = vadd.f32 %v1046_v49, %v5885_v60  ;;  %v3999_v44 = vld [vmem:[%s5405_s17 + $0x410] sm:$0xff]  ;;  %v4002_v49 = vld [vmem:[%s5405_s17 + $0x428] sm:$0xff] }
 0x21e   : > { %v4231_v54 = vpack.c.bf16 %v1108_v33, %v1106_v47  ;;  %2076 = vmatprep.mubr.f32.mxu0 %v5102_v0  ;;  %v1049_v56 = vadd.f32 %v1048_v53, %v5885_v60 }
 0x21f   : > { %v1109_v61 = vmax.f32 %v1047_v30, 0.0  ;;  %v6067_v30 = vld [vmem:[%s6694_s1 + $0x8] sm:$0xff] }
 0x220   : > { %v1052_v22 = vpop.f32.mrb[50].mxu0  ;;  %4233 = vmatprep.subr.msk.bf16.mxu1 %vm5835_vm2, %v4231_v54  ;;  %v1110_v2 = vmax.f32 %v1049_v56, 0.0 }
 0x221   : > { %v1053_v57 = vadd.f32 %v1052_v22, %v5889_v63  ;;  %v1054_v58 = vpop.f32.mrb[51].mxu0  ;;  %4235 = vmatpush1.bf16.xpose.msra.mxu1 %v4234_v52  ;;  %3917 = vmatmul.mubr.msk.f32.gmra.mrb[156].mxu0 %vm547_vm0, %v5629_v32  ;;  %v6037_v32 = vld [vmem:[%s6694_s1 + $0x78] sm:$0xff]  ;;  %v4506_v22 = vpack.c.bf16 %v3999_v44, %v3997_v29 }
 0x222   : > { %v1055_v31 = vadd.f32 %v1054_v58, %v5889_v63  ;;  %2082 = vmatprep.mubr.f32.mxu0 %v5102_v0  ;;  %v4004_v52 = vld [vmem:[%s5405_s17 + $0x438] sm:$0xff] }
 0x223   : > { %v1111_v25 = vmax.f32 %v1053_v57, 0.0  ;;  %v4508_v58 = vpack.c.bf16 %v4004_v52, %v4002_v49 }
 0x224   : > { %v1112_v3 = vmax.f32 %v1055_v31, 0.0  ;;  %v1058_v4 = vpop.f32.mrb[52].mxu0  ;;  %v4001_v31 = vld [vmem:[%s5405_s17 + $0x420] sm:$0xff] }
 0x225   : > { %v4239_v5 = vpack.c.bf16 %v1111_v25, %v1109_v61  ;;  %v1060_v26 = vpop.f32.mrb[53].mxu0  ;;  %3918 = vmatmul.mubr.msk.f32.gmra.mrb[158].mxu0 %vm547_vm0, %v6037_v32  ;;  %v1059_v13 = vadd.f32 %v1058_v4, %v5905_v24  ;;  %v4003_v61 = vld [vmem:[%s5405_s17 + $0x430] sm:$0xff] }
 0x226   : > { %v4236_v9 = vpack.c.bf16 %v1112_v3, %v1110_v2  ;;  %2324 = vmatprep.mubr.f32.mxu0 %v5102_v0  ;;  %v1061_v17 = vadd.f32 %v1060_v26, %v5905_v24  ;;  %v4008_v2 = vld [vmem:[%s5405_s17 + $0x458] sm:$0xff] }
 0x227   : > { %v1113_v39 = vmax.f32 %v1059_v13, 0.0  ;;  %v4005_v13 = vld [vmem:[%s5405_s17 + $0x440] sm:$0xff] }
 0x228   : > { %v1064_v18 = vpop.f32.mrb[54].mxu0  ;;  %4238 = vmatprep.subr.msk.bf16.mxu1 %vm5835_vm2, %v4236_v9  ;;  %v1114_v46 = vmax.f32 %v1061_v17, 0.0 }
 0x229   : > { %v1065_v50 = vadd.f32 %v1064_v18, %v5911_v45  ;;  %v1066_v14 = vpop.f32.mrb[55].mxu0  ;;  %4240 = vmatpush1.bf16.xpose.msra.mxu1 %v4239_v5  ;;  %3956 = vmatmul.mubr.msk.f32.vlgmr.msra.gmra.mrb[160].mxu0 %vm547_vm0, %v6054_v36  ;;  %v4510_v5 = vpack.c.bf16 %v4003_v61, %v4001_v31  ;;  %v4043_v18 = vld [vmem:[%s5405_s17 + $0x468] sm:$0xff] }
 0x22a   : > { %v1067_v38 = vadd.f32 %v1066_v14, %v5911_v45  ;;  %4499 = vmatpush1.bf16.msra.mxu0 %v4498_v12  ;;  %2330 = vmatprep.mubr.f32.mxu0 %v5102_v0  ;;  %v4512_v12 = vpack.c.bf16 %v4008_v2, %v4006_v1  ;;  %v6097_v14 = vld [vmem:[%s6694_s1 + $0x18] sm:$0xff] }
 0x22b   : > { %v1115_v43 = vmax.f32 %v1065_v50, 0.0  ;;  %4501 = vmatprep.subr.bf16.mxu0 %v4500_v15  ;;  %v4007_v15 = vld [vmem:[%s5405_s17 + $0x450] sm:$0xff] }
 0x22c   : > { %v1116_v47 = vmax.f32 %v1067_v38, 0.0  ;;  %v1070_v33 = vpop.f32.mrb[56].mxu0 }
 0x22d   : > { %v4244_v53 = vpack.c.bf16 %v1115_v43, %v1113_v39  ;;  %v1072_v54 = vpop.f32.mrb[57].mxu0  ;;  %3957 = vmatmul.mubr.msk.f32.gmra.mrb[162].mxu0 %vm547_vm0, %v6067_v30  ;;  %v1071_v57 = vadd.f32 %v1070_v33, %v5929_v11  ;;  %v4556_v43 = vpack.c.bf16 %v4045_v23, %v4043_v18 }
 0x22e   : > { %v4241_v56 = vpack.c.bf16 %v1116_v47, %v1114_v46  ;;  %2336 = vmatprep.mubr.f32.mxu0 %v5102_v0  ;;  %4503 = vmatpush1.bf16.msra.mxu0 %v4502_v28  ;;  %v1073_v25 = vadd.f32 %v1072_v54, %v5929_v11  ;;  %v4514_v28 = vpack.c.bf16 %v4007_v15, %v4005_v13  ;;  %v6110_v47 = vld [vmem:[%s6694_s1 + $0x20] sm:$0xff] }
 0x22f   : > { %4505 = vmatprep.subr.bf16.mxu0 %v4504_v19  ;;  %v1117_v26 = vmax.f32 %v1071_v57, 0.0 }
 0x230   : > { %v1076_v62 = vpop.f32.mrb[58].mxu0  ;;  %4243 = vmatprep.subr.msk.bf16.mxu1 %vm5835_vm2, %v4241_v56  ;;  %v1118_v27 = vmax.f32 %v1073_v25, 0.0 }
 0x231   : > { %v1077_v3 = vadd.f32 %v1076_v62, %v5935_v20  ;;  %v1078_v4 = vpop.f32.mrb[59].mxu0  ;;  %4245 = vmatpush1.bf16.xpose.msra.mxu1 %v4244_v53  ;;  %3958 = vmatmul.mubr.msk.f32.gmra.mrb[164].mxu0 %vm547_vm0, %v6084_v8 }
 0x232   : > { %v1079_v40 = vadd.f32 %v1078_v4, %v5935_v20  ;;  %2342 = vmatprep.mubr.f32.mxu0 %v5102_v0  ;;  %4507 = vmatpush1.bf16.msra.mxu0 %v4506_v22 }
 0x233   : > { %v1119_v9 = vmax.f32 %v1077_v3, 0.0  ;;  %4509 = vmatprep.subr.bf16.mxu0 %v4508_v58  ;;  %v6119_v58 = vld [vmem:[%s6694_s1 + $0x28] sm:$0xff]  ;;  %v6132_v3 = vld [vmem:[%s6694_s1 + $0x30] sm:$0xff] }
 0x234   : > { %v1120_v16 = vmax.f32 %v1079_v40, 0.0  ;;  %v1082_v17 = vpop.f32.mrb[60].mxu0 }
 0x235   : > { %v4249_v34 = vpack.c.bf16 %v1119_v9, %v1117_v26  ;;  %v1084_v50 = vpop.f32.mrb[61].mxu0  ;;  %3959 = vmatmul.mubr.msk.f32.gmra.mrb[166].mxu0 %vm547_vm0, %v6097_v14  ;;  %v1083_v39 = vadd.f32 %v1082_v17, %v5953_v59 }
 0x236   : > { %v4246_v38 = vpack.c.bf16 %v1120_v16, %v1118_v27  ;;  %2348 = vmatprep.mubr.f32.mxu0 %v5102_v0  ;;  %4511 = vmatpush1.bf16.msra.mxu0 %v4510_v5  ;;  %v1085_v19 = vadd.f32 %v1084_v50, %v5953_v59  ;;  %v6141_v27 = vld [vmem:[%s6694_s1 + $0x38] sm:$0xff] }
 0x237   : > { %4513 = vmatprep.subr.bf16.mxu0 %v4512_v12  ;;  %v1121_v49 = vmax.f32 %v1083_v39, 0.0 }
 0x238   : > { %v1088_v29 = vpop.f32.mrb[62].mxu0  ;;  %4248 = vmatprep.subr.msk.bf16.mxu1 %vm5835_vm2, %v4246_v38  ;;  %v1122_v53 = vmax.f32 %v1085_v19, 0.0  ;;  %v6155_v38 = vld [vmem:[%s6694_s1 + $0x40] sm:$0xff] }
 0x239   : > { %v1089_v44 = vadd.f32 %v1088_v29, %v5957_v6  ;;  %v1090_v46 = vpop.f32.mrb[63].mxu0  ;;  %4250 = vmatpush1.bf16.xpose.msra.mxu1 %v4249_v34  ;;  %3960 = vmatmul.mubr.msk.f32.gmra.mrb[168].mxu0 %vm547_vm0, %v6110_v47 }
 0x23a   : > { %v1091_v33 = vadd.f32 %v1090_v46, %v5957_v6  ;;  %2354 = vmatprep.mubr.f32.mxu0 %v5102_v0  ;;  %4515 = vmatpush1.bf16.msra.mxu0 %v4514_v28 }
 0x23b   : > { %v1123_v52 = vmax.f32 %v1089_v44, 0.0  ;;  %4557 = vmatprep.subr.bf16.mxu0 %v4556_v43 }
 0x23c   : > { %v1124_v54 = vmax.f32 %v1091_v33, 0.0  ;;  %v1330_v56 = vpop.f32.mrb[64].mxu0 }
 0x23d   : > { %v4254_v22 = vpack.c.bf16 %v1123_v52, %v1121_v49  ;;  %v1332_v57 = vpop.f32.mrb[65].mxu0  ;;  %3961 = vmatmul.mubr.msk.f32.gmra.mrb[170].mxu0 %vm547_vm0, %v6119_v58  ;;  %v1331_v61 = vadd.f32 %v1330_v56, %v5814_v21  ;;  %v6166_v49 = vld [vmem:[%s6694_s1 + $0x48] sm:$0xff] }
 0x23e   : > { %v4251_v31 = vpack.c.bf16 %v1124_v54, %v1122_v53  ;;  %2360 = vmatprep.mubr.f32.mxu0 %v5102_v0  ;;  %v1333_v25 = vadd.f32 %v1332_v57, %v5814_v21 }
 0x23f   : > { %v1425_v40 = vmax.f32 %v1331_v61, 0.0 }
 0x240   : > { %4253 = vmatprep.subr.msk.bf16.mxu1 %vm5835_vm2, %v4251_v31  ;;  %v1336_v62 = vpop.f32.mrb[66].mxu0  ;;  %v1426_v26 = vmax.f32 %v1333_v25, 0.0  ;;  %v6179_v31 = vld [vmem:[%s6694_s1 + $0x50] sm:$0xff] }
 0x241   : > { %v1337_v1 = vadd.f32 %v1336_v62, %v5821_v35  ;;  %4255 = vmatpush1.bf16.xpose.msra.mxu1 %v4254_v22  ;;  %v1338_v2 = vpop.f32.mrb[67].mxu0  ;;  %3962 = vmatmul.mubr.msk.f32.gmra.mrb[172].mxu0 %vm547_vm0, %v6132_v3 }
 0x242   : > { %v1339_v4 = vadd.f32 %v1338_v2, %v5821_v35  ;;  %2366 = vmatprep.mubr.f32.mxu0 %v5102_v0 }
 0x243   : > { %v1427_v5 = vmax.f32 %v1337_v1, 0.0 }
 0x244   : > { %v1428_v9 = vmax.f32 %v1339_v4, 0.0  ;;  %v1342_v12 = vpop.f32.mrb[68].mxu0 }
 0x245   : > { %v4279_v13 = vpack.c.bf16 %v1427_v5, %v1425_v40  ;;  %v1344_v15 = vpop.f32.mrb[69].mxu0  ;;  %3963 = vmatmul.mubr.msk.f32.gmra.mrb[174].mxu0 %vm547_vm0, %v6141_v27  ;;  %v1343_v17 = vadd.f32 %v1342_v12, %v5827_v41 }
 0x246   : > { %v4276_v16 = vpack.c.bf16 %v1428_v9, %v1426_v26  ;;  %2372 = vmatprep.mubr.f32.mxu0 %v5102_v0  ;;  %v1345_v18 = vadd.f32 %v1344_v15, %v5827_v41  ;;  %v6188_v26 = vld [vmem:[%s6694_s1 + $0x58] sm:$0xff] }
 0x247   : > { %v1429_v39 = vmax.f32 %v1343_v17, 0.0 }
 0x248   : > { %1238 = vmatmul.mubr.f32.vlgmr.msra.gmra.mrb[2].mxu1 %v5104_v48  ;;  %v1348_v23 = vpop.f32.mrb[70].mxu0  ;;  %4278 = vmatprep.subr.msk.bf16.mxu1 %vm5835_vm2, %v4276_v16  ;;  %v1430_v19 = vmax.f32 %v1345_v18, 0.0  ;;  %v6201_v18 = vld [vmem:[%s6694_s1 + $0x60] sm:$0xff] }
 0x249   : > { %v1349_v34 = vadd.f32 %v1348_v23, %v5841_v55  ;;  %v1350_v50 = vpop.f32.mrb[71].mxu0  ;;  %4280 = vmatpush1.bf16.xpose.msra.mxu1 %v4279_v13  ;;  %3964 = vmatmul.mubr.msk.f32.gmra.mrb[176].mxu0 %vm547_vm0, %v6155_v38 }
 0x24a   : > { %v1351_v28 = vadd.f32 %v1350_v50, %v5841_v55  ;;  %2378 = vmatprep.mubr.f32.mxu0 %v5102_v0  ;;  %3829 = vmatprep.mubr.msk.f32.mxu1 %vm789_vm1, %v5104_v48 }
 0x24b   : > { %v1431_v43 = vmax.f32 %v1349_v34, 0.0 }
 0x24c   : > { %v1432_v29 = vmax.f32 %v1351_v28, 0.0  ;;  %v1354_v44 = vpop.f32.mrb[72].mxu0 }
 0x24d   : > { %v4284_v46 = vpack.c.bf16 %v1431_v43, %v1429_v39  ;;  %v1356_v33 = vpop.f32.mrb[73].mxu0  ;;  %3965 = vmatmul.mubr.msk.f32.gmra.mrb[178].mxu0 %vm547_vm0, %v6166_v49  ;;  %v1355_v53 = vadd.f32 %v1354_v44, %v5853_v7  ;;  %v6210_v44 = vld [vmem:[%s6694_s1 + $0x68] sm:$0xff] }
 0x24e   : > { %v4281_v52 = vpack.c.bf16 %v1432_v29, %v1430_v19  ;;  %2384 = vmatprep.mubr.f32.mxu0 %v5102_v0  ;;  %v1357_v54 = vadd.f32 %v1356_v33, %v5853_v7 }
 0x24f   : > { %v1433_v25 = vmax.f32 %v1355_v53, 0.0 }
 0x250   : > { %v1360_v56 = vpop.f32.mrb[74].mxu0  ;;  %4283 = vmatprep.subr.msk.bf16.mxu1 %vm5835_vm2, %v4281_v52  ;;  %v1434_v1 = vmax.f32 %v1357_v54, 0.0 }
 0x251   : > { %v1361_v22 = vadd.f32 %v1360_v56, %v5857_v10  ;;  %v1362_v57 = vpop.f32.mrb[75].mxu0  ;;  %4285 = vmatpush1.bf16.xpose.msra.mxu1 %v4284_v46  ;;  %3966 = vmatmul.mubr.msk.f32.gmra.mrb[180].mxu0 %vm547_vm0, %v6179_v31 }
 0x252   : > { %v1363_v61 = vadd.f32 %v1362_v57, %v5857_v10  ;;  %2390 = vmatprep.mubr.f32.mxu0 %v5102_v0 }
 0x253   : > { %v1435_v62 = vmax.f32 %v1361_v22, 0.0  ;;  %v6223_v22 = vld [vmem:[%s6694_s1 + $0x70] sm:$0xff] }
 0x254   : > { %v1436_v2 = vmax.f32 %v1363_v61, 0.0  ;;  %v1366_v4 = vpop.f32.mrb[76].mxu0 }
 0x255   : > { %v4289_v40 = vpack.c.bf16 %v1435_v62, %v1433_v25  ;;  %v1368_v5 = vpop.f32.mrb[77].mxu0  ;;  %3967 = vmatmul.mubr.msk.f32.gmra.mrb[182].mxu0 %vm547_vm0, %v6188_v26  ;;  %v1367_v12 = vadd.f32 %v1366_v4, %v5869_v37  ;;  %v4042_v62 = vld [vmem:[%s5405_s17 + $0x460] sm:$0xff] }
 0x256   : > { %v4286_v9 = vpack.c.bf16 %v1436_v2, %v1434_v1  ;;  %2396 = vmatprep.mubr.f32.mxu0 %v5102_v0  ;;  %v1369_v13 = vadd.f32 %v1368_v5, %v5869_v37  ;;  %v4044_v1 = vld [vmem:[%s5405_s17 + $0x470] sm:$0xff]  ;;  %v4047_v5 = vld [vmem:[%s5405_s17 + $0x488] sm:$0xff] }
 0x257   : > { %v1437_v34 = vmax.f32 %v1367_v12, 0.0 }
 0x258   : > { %v1372_v15 = vpop.f32.mrb[78].mxu0  ;;  %4288 = vmatprep.subr.msk.bf16.mxu1 %vm5835_vm2, %v4286_v9  ;;  %v1438_v28 = vmax.f32 %v1369_v13, 0.0  ;;  %v4049_v9 = vld [vmem:[%s5405_s17 + $0x498] sm:$0xff] }
 0x259   : > { %v1373_v16 = vadd.f32 %v1372_v15, %v5873_v42  ;;  %v1374_v17 = vpop.f32.mrb[79].mxu0  ;;  %4290 = vmatpush1.bf16.xpose.msra.mxu1 %v4289_v40  ;;  %3968 = vmatmul.mubr.msk.f32.gmra.mrb[184].mxu0 %vm547_vm0, %v6201_v18 }
 0x25a   : > { %v1375_v23 = vadd.f32 %v1374_v17, %v5873_v42  ;;  %2402 = vmatprep.mubr.f32.mxu0 %v5102_v0 }
 0x25b   : > { %v1439_v50 = vmax.f32 %v1373_v16, 0.0  ;;  %v4558_v16 = vpack.c.bf16 %v4044_v1, %v4042_v62 }
 0x25c   : > { %v1440_v39 = vmax.f32 %v1375_v23, 0.0  ;;  %v1378_v43 = vpop.f32.mrb[80].mxu0  ;;  %v4560_v23 = vpack.c.bf16 %v4049_v9, %v4047_v5 }
 0x25d   : > { %v4294_v19 = vpack.c.bf16 %v1439_v50, %v1437_v34  ;;  %v1380_v29 = vpop.f32.mrb[81].mxu0  ;;  %3969 = vmatmul.mubr.msk.f32.gmra.mrb[186].mxu0 %vm547_vm0, %v6210_v44  ;;  %v1379_v33 = vadd.f32 %v1378_v43, %v5885_v60  ;;  %v4046_v34 = vld [vmem:[%s5405_s17 + $0x480] sm:$0xff]  ;;  %v4048_v50 = vld [vmem:[%s5405_s17 + $0x490] sm:$0xff]  ;;  %v4051_v43 = vld [vmem:[%s5405_s17 + $0x4a8] sm:$0xff] }
 0x25e   : > { %v4291_v46 = vpack.c.bf16 %v1440_v39, %v1438_v28  ;;  %2408 = vmatprep.mubr.f32.mxu0 %v5102_v0  ;;  %v1381_v52 = vadd.f32 %v1380_v29, %v5885_v60 }
 0x25f   : > { %v1441_v61 = vmax.f32 %v1379_v33, 0.0 }
 0x260   : > { %v1384_v53 = vpop.f32.mrb[82].mxu0  ;;  %4293 = vmatprep.subr.msk.bf16.mxu1 %vm5835_vm2, %v4291_v46  ;;  %v1442_v2 = vmax.f32 %v1381_v52, 0.0  ;;  %v4562_v52 = vpack.c.bf16 %v4048_v50, %v4046_v34  ;;  %v4059_v50 = vld [vmem:[%s5405_s17 + $0x4e8] sm:$0xff] }
 0x261   : > { %v1385_v54 = vadd.f32 %v1384_v53, %v5889_v63  ;;  %v1386_v56 = vpop.f32.mrb[83].mxu0  ;;  %4295 = vmatpush1.bf16.xpose.msra.mxu1 %v4294_v19  ;;  %3970 = vmatmul.mubr.msk.f32.gmra.mrb[188].mxu0 %vm547_vm0, %v6223_v22  ;;  %v4053_v19 = vld [vmem:[%s5405_s17 + $0x4b8] sm:$0xff] }
 0x262   : > { %v1387_v57 = vadd.f32 %v1386_v56, %v5889_v63  ;;  %2414 = vmatprep.mubr.f32.mxu0 %v5102_v0  ;;  %v4564_v56 = vpack.c.bf16 %v4053_v19, %v4051_v43 }
 0x263   : > { %v1443_v25 = vmax.f32 %v1385_v54, 0.0 }
 0x264   : > { %v1444_v4 = vmax.f32 %v1387_v57, 0.0  ;;  %v1390_v40 = vpop.f32.mrb[84].mxu0  ;;  %v4050_v57 = vld [vmem:[%s5405_s17 + $0x4a0] sm:$0xff] }
 0x265   : > { %v4299_v12 = vpack.c.bf16 %v1443_v25, %v1441_v61  ;;  %v1392_v13 = vpop.f32.mrb[85].mxu0  ;;  %3971 = vmatmul.mubr.msk.f32.gmra.mrb[190].mxu0 %vm547_vm0, %v6037_v32  ;;  %v1391_v17 = vadd.f32 %v1390_v40, %v5905_v24  ;;  %v4052_v61 = vld [vmem:[%s5405_s17 + $0x4b0] sm:$0xff] }
 0x266   : > { %v4296_v15 = vpack.c.bf16 %v1444_v4, %v1442_v2  ;;  %2656 = vmatprep.mubr.f32.mxu0 %v5102_v0  ;;  %v1393_v28 = vadd.f32 %v1392_v13, %v5905_v24  ;;  %v4055_v2 = vld [vmem:[%s5405_s17 + $0x4c8] sm:$0xff]  ;;  %v4057_v4 = vld [vmem:[%s5405_s17 + $0x4d8] sm:$0xff] }
 0x267   : > { %v1445_v53 = vmax.f32 %v1391_v17, 0.0  ;;  %v4056_v17 = vld [vmem:[%s5405_s17 + $0x4d0] sm:$0xff] }
 0x268   : > { %v1396_v39 = vpop.f32.mrb[86].mxu0  ;;  %4298 = vmatprep.subr.msk.bf16.mxu1 %vm5835_vm2, %v4296_v15  ;;  %v1446_v25 = vmax.f32 %v1393_v28, 0.0  ;;  %v4568_v15 = vpack.c.bf16 %v4057_v4, %v4055_v2  ;;  %v4061_v28 = vld [vmem:[%s5405_s17 + $0x4f8] sm:$0xff] }
 0x269   : > { %v1397_v29 = vadd.f32 %v1396_v39, %v5911_v45  ;;  %v1398_v46 = vpop.f32.mrb[87].mxu0  ;;  %4300 = vmatpush1.bf16.xpose.msra.mxu1 %v4299_v12  ;;  %4009 = vmatmul.mubr.msk.f32.vlgmr.msra.gmra.mrb[192].mxu0 %vm547_vm0, %v6054_v36  ;;  %v4566_v12 = vpack.c.bf16 %v4052_v61, %v4050_v57 }
 0x26a   : > { %v1399_v33 = vadd.f32 %v1398_v46, %v5911_v45  ;;  %4559 = vmatpush1.bf16.msra.mxu0 %v4558_v16  ;;  %2662 = vmatprep.mubr.f32.mxu0 %v5102_v0  ;;  %v4054_v16 = vld [vmem:[%s5405_s17 + $0x4c0] sm:$0xff] }
 0x26b   : > { %v1447_v54 = vmax.f32 %v1397_v29, 0.0  ;;  %4561 = vmatprep.subr.bf16.mxu0 %v4560_v23  ;;  %v4570_v29 = vpack.c.bf16 %v4056_v17, %v4054_v16 }
 0x26c   : > { %v1448_v62 = vmax.f32 %v1399_v33, 0.0  ;;  %v1402_v1 = vpop.f32.mrb[88].mxu0 }
 0x26d   : > { %v4304_v40 = vpack.c.bf16 %v1447_v54, %v1445_v53  ;;  %v1404_v5 = vpop.f32.mrb[89].mxu0  ;;  %4010 = vmatmul.mubr.msk.f32.gmra.mrb[194].mxu0 %vm547_vm0, %v6067_v30  ;;  %v1403_v13 = vadd.f32 %v1402_v1, %v5929_v11  ;;  %v4058_v53 = vld [vmem:[%s5405_s17 + $0x4e0] sm:$0xff]  ;;  %v4060_v54 = vld [vmem:[%s5405_s17 + $0x4f0] sm:$0xff] }
 0x26e   : > { %v4301_v9 = vpack.c.bf16 %v1448_v62, %v1446_v25  ;;  %2668 = vmatprep.mubr.f32.mxu0 %v5102_v0  ;;  %4563 = vmatpush1.bf16.msra.mxu0 %v4562_v52  ;;  %v1405_v23 = vadd.f32 %v1404_v5, %v5929_v11  ;;  %v4572_v52 = vpack.c.bf16 %v4061_v28, %v4059_v50 }
 0x26f   : > { %4565 = vmatprep.subr.bf16.mxu0 %v4564_v56  ;;  %v1449_v46 = vmax.f32 %v1403_v13, 0.0  ;;  %v4574_v2 = vpack.c.bf16 %v4060_v54, %v4058_v53 }
 0x270   : > { %v1408_v34 = vpop.f32.mrb[90].mxu0  ;;  %4303 = vmatprep.subr.msk.bf16.mxu1 %vm5835_vm2, %v4301_v9  ;;  %v1450_v56 = vmax.f32 %v1405_v23, 0.0 }
 0x271   : > { %v1409_v39 = vadd.f32 %v1408_v34, %v5935_v20  ;;  %v1410_v43 = vpop.f32.mrb[91].mxu0  ;;  %4305 = vmatpush1.bf16.xpose.msra.mxu1 %v4304_v40  ;;  %4011 = vmatmul.mubr.msk.f32.gmra.mrb[196].mxu0 %vm547_vm0, %v6084_v8 }
 0x272   : > { %v1411_v19 = vadd.f32 %v1410_v43, %v5935_v20  ;;  %2674 = vmatprep.mubr.f32.mxu0 %v5102_v0  ;;  %4567 = vmatpush1.bf16.msra.mxu0 %v4566_v12 }
 0x273   : > { %v1451_v33 = vmax.f32 %v1409_v39, 0.0  ;;  %4569 = vmatprep.subr.bf16.mxu0 %v4568_v15 }
 0x274   : > { %v1452_v57 = vmax.f32 %v1411_v19, 0.0  ;;  %v1414_v61 = vpop.f32.mrb[92].mxu0 }
 0x275   : > { %v4309_v25 = vpack.c.bf16 %v1451_v33, %v1449_v46  ;;  %v1416_v62 = vpop.f32.mrb[93].mxu0  ;;  %4012 = vmatmul.mubr.msk.f32.gmra.mrb[198].mxu0 %vm547_vm0, %v6097_v14  ;;  %v1415_v4 = vadd.f32 %v1414_v61, %v5953_v59 }
 0x276   : > { %v4306_v1 = vpack.c.bf16 %v1452_v57, %v1450_v56  ;;  %2680 = vmatprep.mubr.f32.mxu0 %v5102_v0  ;;  %4571 = vmatpush1.bf16.msra.mxu0 %v4570_v29  ;;  %v1417_v40 = vadd.f32 %v1416_v62, %v5953_v59 }
 0x277   : > { %4573 = vmatprep.subr.bf16.mxu0 %v4572_v52  ;;  %v1453_v15 = vmax.f32 %v1415_v4, 0.0 }
 0x278   : > { %v1420_v5 = vpop.f32.mrb[94].mxu0  ;;  %4308 = vmatprep.subr.msk.bf16.mxu1 %vm5835_vm2, %v4306_v1  ;;  %v1454_v17 = vmax.f32 %v1417_v40, 0.0 }
 0x279   : > { %v1421_v9 = vadd.f32 %v1420_v5, %v5957_v6  ;;  %v1422_v12 = vpop.f32.mrb[95].mxu0  ;;  %4310 = vmatpush1.bf16.xpose.msra.mxu1 %v4309_v25  ;;  %4013 = vmatmul.mubr.msk.f32.gmra.mrb[200].mxu0 %vm547_vm0, %v6110_v47 }
 0x27a   : > { %v1423_v13 = vadd.f32 %v1422_v12, %v5957_v6  ;;  %2686 = vmatprep.mubr.f32.mxu0 %v5102_v0  ;;  %4575 = vmatpush1.bf16.msra.mxu0 %v4574_v2 }
 0x27b   : > { %v1455_v16 = vmax.f32 %v1421_v9, 0.0 }
 0x27c   : > { %v1456_v23 = vmax.f32 %v1423_v13, 0.0  ;;  %v1662_v34 = vpop.f32.mrb[96].mxu0 }
 0x27d   : > { %v4314_v50 = vpack.c.bf16 %v1455_v16, %v1453_v15  ;;  %v1664_v28 = vpop.f32.mrb[97].mxu0  ;;  %4014 = vmatmul.mubr.msk.f32.gmra.mrb[202].mxu0 %vm547_vm0, %v6119_v58  ;;  %v1663_v43 = vadd.f32 %v1662_v34, %v5814_v21 }
 0x27e   : > { %v4311_v39 = vpack.c.bf16 %v1456_v23, %v1454_v17  ;;  %2692 = vmatprep.mubr.f32.mxu0 %v5102_v0  ;;  %v1665_v19 = vadd.f32 %v1664_v28, %v5814_v21 }
 0x27f   : > { %v1757_v53 = vmax.f32 %v1663_v43, 0.0 }
 0x280   : > { %4313 = vmatprep.subr.msk.bf16.mxu1 %vm5835_vm2, %v4311_v39  ;;  %v1668_v29 = vpop.f32.mrb[98].mxu0  ;;  %v1758_v56 = vmax.f32 %v1665_v19, 0.0 }
 0x281   : > { %v1669_v46 = vadd.f32 %v1668_v29, %v5821_v35  ;;  %4315 = vmatpush1.bf16.xpose.msra.mxu1 %v4314_v50  ;;  %v1670_v33 = vpop.f32.mrb[99].mxu0  ;;  %4015 = vmatmul.mubr.msk.f32.gmra.mrb[204].mxu0 %vm547_vm0, %v6132_v3 }
 0x282   : > { %v1671_v52 = vadd.f32 %v1670_v33, %v5821_v35  ;;  %2698 = vmatprep.mubr.f32.mxu0 %v5102_v0 }
 0x283   : > { %v1759_v54 = vmax.f32 %v1669_v46, 0.0 }
 0x284   : > { %v1760_v57 = vmax.f32 %v1671_v52, 0.0  ;;  %v1674_v61 = vpop.f32.mrb[100].mxu0 }
 0x285   : > { %v4339_v25 = vpack.c.bf16 %v1759_v54, %v1757_v53  ;;  %v1676_v62 = vpop.f32.mrb[101].mxu0  ;;  %4016 = vmatmul.mubr.msk.f32.gmra.mrb[206].mxu0 %vm547_vm0, %v6141_v27  ;;  %v1675_v2 = vadd.f32 %v1674_v61, %v5827_v41 }
 0x286   : > { %v4336_v1 = vpack.c.bf16 %v1760_v57, %v1758_v56  ;;  %2704 = vmatprep.mubr.f32.mxu0 %v5102_v0  ;;  %v1677_v4 = vadd.f32 %v1676_v62, %v5827_v41 }
 0x287   : > { %v1761_v13 = vmax.f32 %v1675_v2, 0.0 }
 0x288   : > { %1570 = vmatmul.mubr.f32.vlgmr.msra.gmra.mrb[4].mxu1 %v5104_v48  ;;  %v1680_v40 = vpop.f32.mrb[102].mxu0  ;;  %4338 = vmatprep.subr.msk.bf16.mxu1 %vm5835_vm2, %v4336_v1  ;;  %v1762_v16 = vmax.f32 %v1677_v4, 0.0 }
 0x289   : > { %v1681_v5 = vadd.f32 %v1680_v40, %v5841_v55  ;;  %v1682_v9 = vpop.f32.mrb[103].mxu0  ;;  %4340 = vmatpush1.bf16.xpose.msra.mxu1 %v4339_v25  ;;  %4017 = vmatmul.mubr.msk.f32.gmra.mrb[208].mxu0 %vm547_vm0, %v6155_v38 }
 0x28a   : > { %v1683_v12 = vadd.f32 %v1682_v9, %v5841_v55  ;;  %2710 = vmatprep.mubr.f32.mxu0 %v5102_v0  ;;  %3882 = vmatprep.mubr.msk.f32.mxu1 %vm789_vm1, %v5104_v48 }
 0x28b   : > { %v1763_v15 = vmax.f32 %v1681_v5, 0.0 }
 0x28c   : > { %v1764_v17 = vmax.f32 %v1683_v12, 0.0  ;;  %v1686_v23 = vpop.f32.mrb[104].mxu0 }
 0x28d   : > { %v4344_v34 = vpack.c.bf16 %v1763_v15, %v1761_v13  ;;  %v1688_v50 = vpop.f32.mrb[105].mxu0  ;;  %4018 = vmatmul.mubr.msk.f32.gmra.mrb[210].mxu0 %vm547_vm0, %v6166_v49  ;;  %v1687_v39 = vadd.f32 %v1686_v23, %v5853_v7 }
 0x28e   : > { %v4341_v28 = vpack.c.bf16 %v1764_v17, %v1762_v16  ;;  %2716 = vmatprep.mubr.f32.mxu0 %v5102_v0  ;;  %v1689_v43 = vadd.f32 %v1688_v50, %v5853_v7 }
 0x28f   : > { %v1765_v52 = vmax.f32 %v1687_v39, 0.0 }
 0x290   : > { %v1692_v19 = vpop.f32.mrb[106].mxu0  ;;  %4343 = vmatprep.subr.msk.bf16.mxu1 %vm5835_vm2, %v4341_v28  ;;  %v1766_v54 = vmax.f32 %v1689_v43, 0.0 }
 0x291   : > { %v1693_v29 = vadd.f32 %v1692_v19, %v5857_v10  ;;  %v1694_v46 = vpop.f32.mrb[107].mxu0  ;;  %4345 = vmatpush1.bf16.xpose.msra.mxu1 %v4344_v34  ;;  %4019 = vmatmul.mubr.msk.f32.gmra.mrb[212].mxu0 %vm547_vm0, %v6179_v31 }
 0x292   : > { %v1695_v33 = vadd.f32 %v1694_v46, %v5857_v10  ;;  %2722 = vmatprep.mubr.f32.mxu0 %v5102_v0 }
 0x293   : > { %v1767_v53 = vmax.f32 %v1693_v29, 0.0 }
 0x294   : > { %v1768_v56 = vmax.f32 %v1695_v33, 0.0  ;;  %v1698_v57 = vpop.f32.mrb[108].mxu0 }
 0x295   : > { %v4349_v61 = vpack.c.bf16 %v1767_v53, %v1765_v52  ;;  %v1700_v25 = vpop.f32.mrb[109].mxu0  ;;  %4020 = vmatmul.mubr.msk.f32.gmra.mrb[214].mxu0 %vm547_vm0, %v6188_v26  ;;  %v1699_v1 = vadd.f32 %v1698_v57, %v5869_v37 }
 0x296   : > { %v4346_v62 = vpack.c.bf16 %v1768_v56, %v1766_v54  ;;  %2728 = vmatprep.mubr.f32.mxu0 %v5102_v0  ;;  %v1701_v2 = vadd.f32 %v1700_v25, %v5869_v37 }
 0x297   : > { %v1769_v12 = vmax.f32 %v1699_v1, 0.0 }
 0x298   : > { %v1704_v4 = vpop.f32.mrb[110].mxu0  ;;  %4348 = vmatprep.subr.msk.bf16.mxu1 %vm5835_vm2, %v4346_v62  ;;  %v1770_v15 = vmax.f32 %v1701_v2, 0.0 }
 0x299   : > { %v1705_v40 = vadd.f32 %v1704_v4, %v5873_v42  ;;  %v1706_v5 = vpop.f32.mrb[111].mxu0  ;;  %4350 = vmatpush1.bf16.xpose.msra.mxu1 %v4349_v61  ;;  %4021 = vmatmul.mubr.msk.f32.gmra.mrb[216].mxu0 %vm547_vm0, %v6201_v18 }
 0x29a   : > { %v1707_v9 = vadd.f32 %v1706_v5, %v5873_v42  ;;  %2734 = vmatprep.mubr.f32.mxu0 %v5102_v0 }
 0x29b   : > { %v1771_v13 = vmax.f32 %v1705_v40, 0.0 }
 0x29c   : > { %v1772_v16 = vmax.f32 %v1707_v9, 0.0  ;;  %v1710_v17 = vpop.f32.mrb[112].mxu0 }
 0x29d   : > { %v4354_v23 = vpack.c.bf16 %v1771_v13, %v1769_v12  ;;  %v1712_v34 = vpop.f32.mrb[113].mxu0  ;;  %4022 = vmatmul.mubr.msk.f32.gmra.mrb[218].mxu0 %vm547_vm0, %v6210_v44  ;;  %v1711_v28 = vadd.f32 %v1710_v17, %v5885_v60 }
 0x29e   : > { %v4351_v50 = vpack.c.bf16 %v1772_v16, %v1770_v15  ;;  %2740 = vmatprep.mubr.f32.mxu0 %v5102_v0  ;;  %v1713_v39 = vadd.f32 %v1712_v34, %v5885_v60 }
 0x29f   : > { %v1773_v33 = vmax.f32 %v1711_v28, 0.0 }
 0x2a0   : > { %v1716_v43 = vpop.f32.mrb[114].mxu0  ;;  %4353 = vmatprep.subr.msk.bf16.mxu1 %vm5835_vm2, %v4351_v50  ;;  %v1774_v53 = vmax.f32 %v1713_v39, 0.0 }
 0x2a1   : > { %v1717_v19 = vadd.f32 %v1716_v43, %v5889_v63  ;;  %v1718_v29 = vpop.f32.mrb[115].mxu0  ;;  %4355 = vmatpush1.bf16.xpose.msra.mxu1 %v4354_v23  ;;  %4023 = vmatmul.mubr.msk.f32.gmra.mrb[220].mxu0 %vm547_vm0, %v6223_v22 }
 0x2a2   : > { %v1719_v46 = vadd.f32 %v1718_v29, %v5889_v63  ;;  %2746 = vmatprep.mubr.f32.mxu0 %v5102_v0 }
 0x2a3   : > { %v1775_v52 = vmax.f32 %v1717_v19, 0.0 }
 0x2a4   : > { %v1776_v54 = vmax.f32 %v1719_v46, 0.0  ;;  %v1722_v56 = vpop.f32.mrb[116].mxu0 }
 0x2a5   : > { %v4359_v57 = vpack.c.bf16 %v1775_v52, %v1773_v33  ;;  %v1724_v61 = vpop.f32.mrb[117].mxu0  ;;  %4024 = vmatmul.mubr.msk.f32.gmra.mrb[222].mxu0 %vm547_vm0, %v6037_v32  ;;  %v1723_v62 = vadd.f32 %v1722_v56, %v5905_v24 }
 0x2a6   : > { %v4356_v25 = vpack.c.bf16 %v1776_v54, %v1774_v53  ;;  %2988 = vmatprep.mubr.f32.mxu0 %v5102_v0  ;;  %v1725_v1 = vadd.f32 %v1724_v61, %v5905_v24 }
 0x2a7   : > { %v1777_v5 = vmax.f32 %v1723_v62, 0.0 }
 0x2a8   : > { %v1728_v2 = vpop.f32.mrb[118].mxu0  ;;  %4358 = vmatprep.subr.msk.bf16.mxu1 %vm5835_vm2, %v4356_v25  ;;  %v1778_v12 = vmax.f32 %v1725_v1, 0.0 }
 0x2a9   : > { %v1729_v4 = vadd.f32 %v1728_v2, %v5911_v45  ;;  %v1730_v40 = vpop.f32.mrb[119].mxu0  ;;  %4360 = vmatpush1.bf16.xpose.msra.mxu1 %v4359_v57  ;;  %4062 = vmatmul.mubr.msk.f32.vlgmr.msra.gmra.mrb[224].mxu0 %vm547_vm0, %v6054_v36 }
 0x2aa   : > { %v1731_v32 = vadd.f32 %v1730_v40, %v5911_v45  ;;  %2994 = vmatprep.mubr.f32.mxu0 %v5102_v0 }
 0x2ab   : > { %v1779_v9 = vmax.f32 %v1729_v4, 0.0 }
 0x2ac   : > { %v1780_v13 = vmax.f32 %v1731_v32, 0.0  ;;  %v1734_v15 = vpop.f32.mrb[120].mxu0 }
 0x2ad   : > { %v4364_v16 = vpack.c.bf16 %v1779_v9, %v1777_v5  ;;  %v1736_v17 = vpop.f32.mrb[121].mxu0  ;;  %4063 = vmatmul.mubr.msk.f32.gmra.mrb[226].mxu0 %vm547_vm0, %v6067_v30  ;;  %v1735_v34 = vadd.f32 %v1734_v15, %v5929_v11 }
 0x2ae   : > { %v4361_v23 = vpack.c.bf16 %v1780_v13, %v1778_v12  ;;  %3000 = vmatprep.mubr.f32.mxu0 %v5102_v0  ;;  %v1737_v36 = vadd.f32 %v1736_v17, %v5929_v11 }
 0x2af   : > { %v1781_v43 = vmax.f32 %v1735_v34, 0.0 }
 0x2b0   : > { %v1740_v50 = vpop.f32.mrb[122].mxu0  ;;  %4363 = vmatprep.subr.msk.bf16.mxu1 %vm5835_vm2, %v4361_v23  ;;  %v1782_v29 = vmax.f32 %v1737_v36, 0.0 }
 0x2b1   : > { %v1741_v28 = vadd.f32 %v1740_v50, %v5935_v20  ;;  %v1742_v39 = vpop.f32.mrb[123].mxu0  ;;  %4365 = vmatpush1.bf16.xpose.msra.mxu1 %v4364_v16  ;;  %4064 = vmatmul.mubr.msk.f32.gmra.mrb[228].mxu0 %vm547_vm0, %v6084_v8 }
 0x2b2   : > { %v1743_v30 = vadd.f32 %v1742_v39, %v5935_v20  ;;  %3006 = vmatprep.mubr.f32.mxu0 %v5102_v0 }
 0x2b3   : > { %v1783_v19 = vmax.f32 %v1741_v28, 0.0 }
 0x2b4   : > { %v1784_v46 = vmax.f32 %v1743_v30, 0.0  ;;  %v1746_v33 = vpop.f32.mrb[124].mxu0 }
 0x2b5   : > { %v4369_v52 = vpack.c.bf16 %v1783_v19, %v1781_v43  ;;  %v1748_v53 = vpop.f32.mrb[125].mxu0  ;;  %4065 = vmatmul.mubr.msk.f32.gmra.mrb[230].mxu0 %vm547_vm0, %v6097_v14  ;;  %v1747_v56 = vadd.f32 %v1746_v33, %v5953_v59 }
 0x2b6   : > { %v4366_v54 = vpack.c.bf16 %v1784_v46, %v1782_v29  ;;  %3012 = vmatprep.mubr.f32.mxu0 %v5102_v0  ;;  %v1749_v8 = vadd.f32 %v1748_v53, %v5953_v59 }
 0x2b7   : > { %v1785_v62 = vmax.f32 %v1747_v56, 0.0 }
 0x2b8   : > { %v1752_v57 = vpop.f32.mrb[126].mxu0  ;;  %4368 = vmatprep.subr.msk.bf16.mxu1 %vm5835_vm2, %v4366_v54  ;;  %v1786_v2 = vmax.f32 %v1749_v8, 0.0 }
 0x2b9   : > { %v1753_v61 = vadd.f32 %v1752_v57, %v5957_v6  ;;  %v1754_v25 = vpop.f32.mrb[127].mxu0  ;;  %4370 = vmatpush1.bf16.xpose.msra.mxu1 %v4369_v52  ;;  %4066 = vmatmul.mubr.msk.f32.gmra.mrb[232].mxu0 %vm547_vm0, %v6110_v47 }
 0x2ba   : > { %v1755_v14 = vadd.f32 %v1754_v25, %v5957_v6  ;;  %3018 = vmatprep.mubr.f32.mxu0 %v5102_v0 }
 0x2bb   : > { %v1787_v1 = vmax.f32 %v1753_v61, 0.0 }
 0x2bc   : > { %v1788_v4 = vmax.f32 %v1755_v14, 0.0  ;;  %v1994_v40 = vpop.f32.mrb[128].mxu0 }
 0x2bd   : > { %v4374_v32 = vpack.c.bf16 %v1787_v1, %v1785_v62  ;;  %v1996_v5 = vpop.f32.mrb[129].mxu0  ;;  %4067 = vmatmul.mubr.msk.f32.gmra.mrb[234].mxu0 %vm547_vm0, %v6119_v58  ;;  %v1995_v12 = vadd.f32 %v1994_v40, %v5814_v21 }
 0x2be   : > { %v4371_v9 = vpack.c.bf16 %v1788_v4, %v1786_v2  ;;  %3024 = vmatprep.mubr.f32.mxu0 %v5102_v0  ;;  %v1997_v47 = vadd.f32 %v1996_v5, %v5814_v21 }
 0x2bf   : > { %v2089_v17 = vmax.f32 %v1995_v12, 0.0 }
 0x2c0   : > { %4373 = vmatprep.subr.msk.bf16.mxu1 %vm5835_vm2, %v4371_v9  ;;  %v2000_v13 = vpop.f32.mrb[130].mxu0  ;;  %v2090_v34 = vmax.f32 %v1997_v47, 0.0 }
 0x2c1   : > { %v2001_v15 = vadd.f32 %v2000_v13, %v5821_v35  ;;  %4375 = vmatpush1.bf16.xpose.msra.mxu1 %v4374_v32  ;;  %v2002_v16 = vpop.f32.mrb[131].mxu0  ;;  %4068 = vmatmul.mubr.msk.f32.gmra.mrb[236].mxu0 %vm547_vm0, %v6132_v3 }
 0x2c2   : > { %v2003_v58 = vadd.f32 %v2002_v16, %v5821_v35  ;;  %3030 = vmatprep.mubr.f32.mxu0 %v5102_v0 }
 0x2c3   : > { %v2091_v23 = vmax.f32 %v2001_v15, 0.0 }
 0x2c4   : > { %v2092_v36 = vmax.f32 %v2003_v58, 0.0  ;;  %v2006_v50 = vpop.f32.mrb[132].mxu0 }
 0x2c5   : > { %v4399_v28 = vpack.c.bf16 %v2091_v23, %v2089_v17  ;;  %v2008_v39 = vpop.f32.mrb[133].mxu0  ;;  %4069 = vmatmul.mubr.msk.f32.gmra.mrb[238].mxu0 %vm547_vm0, %v6141_v27  ;;  %v2007_v43 = vadd.f32 %v2006_v50, %v5827_v41 }
 0x2c6   : > { %v4396_v30 = vpack.c.bf16 %v2092_v36, %v2090_v34  ;;  %3036 = vmatprep.mubr.f32.mxu0 %v5102_v0  ;;  %v2009_v3 = vadd.f32 %v2008_v39, %v5827_v41 }
 0x2c7   : > { %v2093_v33 = vmax.f32 %v2007_v43, 0.0 }
 0x2c8   : > { %1902 = vmatmul.mubr.f32.vlgmr.msra.gmra.mrb[6].mxu1 %v5104_v48  ;;  %v2012_v19 = vpop.f32.mrb[134].mxu0  ;;  %4398 = vmatprep.subr.msk.bf16.mxu1 %vm5835_vm2, %v4396_v30  ;;  %v2094_v53 = vmax.f32 %v2009_v3, 0.0 }
 0x2c9   : > { %v2013_v29 = vadd.f32 %v2012_v19, %v5841_v55  ;;  %v2014_v46 = vpop.f32.mrb[135].mxu0  ;;  %4400 = vmatpush1.bf16.xpose.msra.mxu1 %v4399_v28  ;;  %4070 = vmatmul.mubr.msk.f32.gmra.mrb[240].mxu0 %vm547_vm0, %v6155_v38 }
 0x2ca   : > { %v2015_v27 = vadd.f32 %v2014_v46, %v5841_v55  ;;  %3042 = vmatprep.mubr.f32.mxu0 %v5102_v0  ;;  %3935 = vmatprep.mubr.msk.f32.mxu1 %vm789_vm1, %v5104_v48 }
 0x2cb   : > { %v2095_v52 = vmax.f32 %v2013_v29, 0.0 }
 0x2cc   : > { %v2096_v54 = vmax.f32 %v2015_v27, 0.0  ;;  %v2018_v56 = vpop.f32.mrb[136].mxu0 }
 0x2cd   : > { %v4404_v8 = vpack.c.bf16 %v2095_v52, %v2093_v33  ;;  %v2020_v57 = vpop.f32.mrb[137].mxu0  ;;  %4071 = vmatmul.mubr.msk.f32.gmra.mrb[242].mxu0 %vm547_vm0, %v6166_v49  ;;  %v2019_v38 = vadd.f32 %v2018_v56, %v5853_v7 }
 0x2ce   : > { %v4401_v61 = vpack.c.bf16 %v2096_v54, %v2094_v53  ;;  %3048 = vmatprep.mubr.f32.mxu0 %v5102_v0  ;;  %v2021_v25 = vadd.f32 %v2020_v57, %v5853_v7 }
 0x2cf   : > { %v2097_v2 = vmax.f32 %v2019_v38, 0.0 }
 0x2d0   : > { %v2024_v14 = vpop.f32.mrb[138].mxu0  ;;  %4403 = vmatprep.subr.msk.bf16.mxu1 %vm5835_vm2, %v4401_v61  ;;  %v2098_v40 = vmax.f32 %v2021_v25, 0.0  ;;  %v4825_v61 = vld [vmem:[%s6694_s1 + $0x78] sm:$0xff] }
 0x2d1   : > { %v2025_v62 = vadd.f32 %v2024_v14, %v5857_v10  ;;  %v2026_v1 = vpop.f32.mrb[139].mxu0  ;;  %4405 = vmatpush1.bf16.xpose.msra.mxu1 %v4404_v8  ;;  %4072 = vmatmul.mubr.msk.f32.gmra.mrb[244].mxu0 %vm547_vm0, %v6179_v31 }
 0x2d2   : > { %v2027_v49 = vadd.f32 %v2026_v1, %v5857_v10  ;;  %3054 = vmatprep.mubr.f32.mxu0 %v5102_v0 }
 0x2d3   : > { %v2099_v4 = vmax.f32 %v2025_v62, 0.0 }
 0x2d4   : > { %v2100_v32 = vmax.f32 %v2027_v49, 0.0  ;;  %v2030_v5 = vpop.f32.mrb[140].mxu0 }
 0x2d5   : > { %v4409_v9 = vpack.c.bf16 %v2099_v4, %v2097_v2  ;;  %v2032_v12 = vpop.f32.mrb[141].mxu0  ;;  %4073 = vmatmul.mubr.msk.f32.gmra.mrb[246].mxu0 %vm547_vm0, %v6188_v26  ;;  %v2031_v13 = vadd.f32 %v2030_v5, %v5869_v37 }
 0x2d6   : > { %v4406_v47 = vpack.c.bf16 %v2100_v32, %v2098_v40  ;;  %3060 = vmatprep.mubr.f32.mxu0 %v5102_v0  ;;  %v2033_v31 = vadd.f32 %v2032_v12, %v5869_v37 }
 0x2d7   : > { %v2101_v17 = vmax.f32 %v2031_v13, 0.0 }
 0x2d8   : > { %v2036_v15 = vpop.f32.mrb[142].mxu0  ;;  %4408 = vmatprep.subr.msk.bf16.mxu1 %vm5835_vm2, %v4406_v47  ;;  %v2102_v36 = vmax.f32 %v2033_v31, 0.0 }
 0x2d9   : > { %v2037_v16 = vadd.f32 %v2036_v15, %v5873_v42  ;;  %v2038_v58 = vpop.f32.mrb[143].mxu0  ;;  %4410 = vmatpush1.bf16.xpose.msra.mxu1 %v4409_v9  ;;  %4074 = vmatmul.mubr.msk.f32.gmra.mrb[248].mxu0 %vm547_vm0, %v6201_v18 }
 0x2da   : > { %v2039_v26 = vadd.f32 %v2038_v58, %v5873_v42  ;;  %3066 = vmatprep.mubr.f32.mxu0 %v5102_v0 }
 0x2db   : > { %v2103_v23 = vmax.f32 %v2037_v16, 0.0  ;;  %v6433_v34 = vpop.f32.mrb[0].mxu1 }
 0x2dc   : > { %v2104_v50 = vmax.f32 %v2039_v26, 0.0  ;;  %v2042_v28 = vpop.f32.mrb[144].mxu0  ;;  %v909_v39 = vpop.f32.mrb[1].mxu1 }
 0x2dd   : > { %v4414_v30 = vpack.c.bf16 %v2103_v23, %v2101_v17  ;;  %v2044_v43 = vpop.f32.mrb[145].mxu0  ;;  %4075 = vmatmul.mubr.msk.f32.gmra.mrb[250].mxu0 %vm547_vm0, %v6210_v44  ;;  %v2043_v18 = vadd.f32 %v2042_v28, %v5885_v60 }
 0x2de   : > { %v4411_v3 = vpack.c.bf16 %v2104_v50, %v2102_v36  ;;  %3072 = vmatprep.mubr.f32.mxu0 %v5102_v0  ;;  %v2045_v19 = vadd.f32 %v2044_v43, %v5885_v60 }
 0x2df   : > { %v2105_v33 = vmax.f32 %v2043_v18, 0.0 }
 0x2e0   : > { %v2048_v29 = vpop.f32.mrb[146].mxu0  ;;  %4413 = vmatprep.subr.msk.bf16.mxu1 %vm5835_vm2, %v4411_v3  ;;  %v2106_v53 = vmax.f32 %v2045_v19, 0.0 }
 0x2e1   : > { %v2049_v46 = vadd.f32 %v2048_v29, %v5889_v63  ;;  %v2050_v27 = vpop.f32.mrb[147].mxu0  ;;  %4415 = vmatpush1.bf16.xpose.msra.mxu1 %v4414_v30  ;;  %4076 = vmatmul.mubr.msk.f32.gmra.mrb[252].mxu0 %vm547_vm0, %v6223_v22 }
 0x2e2   : > { %v2051_v44 = vadd.f32 %v2050_v27, %v5889_v63  ;;  %3078 = vmatprep.mubr.f32.mxu0 %v5102_v0 }
 0x2e3   : > { %v2107_v52 = vmax.f32 %v2049_v46, 0.0 }
 0x2e4   : > { %v2108_v54 = vmax.f32 %v2051_v44, 0.0  ;;  %v2054_v56 = vpop.f32.mrb[148].mxu0 }
 0x2e5   : > { %v4419_v8 = vpack.c.bf16 %v2107_v52, %v2105_v33  ;;  %v2056_v57 = vpop.f32.mrb[149].mxu0  ;;  %4077 = vmatmul.mubr.msk.f32.gmra.mrb[254].mxu0 %vm547_vm0, %v4825_v61  ;;  %v2055_v22 = vadd.f32 %v2054_v56, %v5905_v24 }
 0x2e6   : > { %v4416_v38 = vpack.c.bf16 %v2108_v54, %v2106_v53  ;;  %3394 = vmatprep.mubr.f32.mxu0 %v5102_v0  ;;  %v2057_v25 = vadd.f32 %v2056_v57, %v5905_v24 }
 0x2e7   : > { %v2109_v2 = vmax.f32 %v2055_v22, 0.0 }
 0x2e8   : > { %v2060_v14 = vpop.f32.mrb[150].mxu0  ;;  %4418 = vmatprep.subr.msk.bf16.mxu1 %vm5835_vm2, %v4416_v38  ;;  %v2110_v40 = vmax.f32 %v2057_v25, 0.0 }
 0x2e9   : > { %v2061_v62 = vadd.f32 %v2060_v14, %v5911_v45  ;;  %v2062_v1 = vpop.f32.mrb[151].mxu0  ;;  %4420 = vmatpush1.bf16.xpose.msra.mxu1 %v4419_v8 }
 0x2ea   : > { %v2063_v49 = vadd.f32 %v2062_v1, %v5911_v45 }
 0x2eb   : > { %v2111_v4 = vmax.f32 %v2061_v62, 0.0 }
 0x2ec   : > { %v2112_v32 = vmax.f32 %v2063_v49, 0.0  ;;  %v2066_v5 = vpop.f32.mrb[152].mxu0 }
 0x2ed   : > { %v4424_v0 = vpack.c.bf16 %v2111_v4, %v2109_v2  ;;  %v2068_v9 = vpop.f32.mrb[153].mxu0  ;;  %v2067_v47 = vadd.f32 %v2066_v5, %v5929_v11 }
 0x2ee   : > { %v4421_v12 = vpack.c.bf16 %v2112_v32, %v2110_v40  ;;  %v2069_v13 = vadd.f32 %v2068_v9, %v5929_v11 }
 0x2ef   : > { %v2113_v26 = vmax.f32 %v2067_v47, 0.0 }
 0x2f0   : > { %v2072_v31 = vpop.f32.mrb[154].mxu0  ;;  %4423 = vmatprep.subr.msk.bf16.mxu1 %vm5835_vm2, %v4421_v12  ;;  %v2114_v23 = vmax.f32 %v2069_v13, 0.0 }
 0x2f1   : > { %v2073_v15 = vadd.f32 %v2072_v31, %v5935_v20  ;;  %v2074_v16 = vpop.f32.mrb[155].mxu0  ;;  %4425 = vmatpush1.bf16.xpose.msra.mxu1 %v4424_v0 }
 0x2f2   : > { %v2075_v58 = vadd.f32 %v2074_v16, %v5935_v20 }
 0x2f3   : > { %v2115_v17 = vmax.f32 %v2073_v15, 0.0 }
 0x2f4   : > { %v2116_v36 = vmax.f32 %v2075_v58, 0.0  ;;  %v2078_v50 = vpop.f32.mrb[156].mxu0 }
 0x2f5   : > { %v4429_v28 = vpack.c.bf16 %v2115_v17, %v2113_v26  ;;  %v2080_v39 = vpop.f32.mrb[157].mxu0  ;;  %v2079_v43 = vadd.f32 %v2078_v50, %v5953_v59 }
 0x2f6   : > { %v4426_v30 = vpack.c.bf16 %v2116_v36, %v2114_v23  ;;  %v2081_v3 = vadd.f32 %v2080_v39, %v5953_v59 }
 0x2f7   : > { %v2117_v27 = vmax.f32 %v2079_v43, 0.0 }
 0x2f8   : > { %v2084_v18 = vpop.f32.mrb[158].mxu0  ;;  %4428 = vmatprep.subr.msk.bf16.mxu1 %vm5835_vm2, %v4426_v30  ;;  %v2118_v33 = vmax.f32 %v2081_v3, 0.0 }
 0x2f9   : > { %v2085_v19 = vadd.f32 %v2084_v18, %v5957_v6  ;;  %v2086_v29 = vpop.f32.mrb[159].mxu0  ;;  %4430 = vmatpush1.bf16.xpose.msra.mxu1 %v4429_v28 }
 0x2fa   : > { %v2087_v46 = vadd.f32 %v2086_v29, %v5957_v6 }
 0x2fb   : > { %v2119_v44 = vmax.f32 %v2085_v19, 0.0 }
 0x2fc   : > { %v2120_v52 = vmax.f32 %v2087_v46, 0.0  ;;  %v2326_v53 = vpop.f32.mrb[160].mxu0 }
 0x2fd   : > { %v4434_v54 = vpack.c.bf16 %v2119_v44, %v2117_v27  ;;  %v2328_v56 = vpop.f32.mrb[161].mxu0  ;;  %v2327_v57 = vadd.f32 %v2326_v53, %v5814_v21 }
 0x2fe   : > { %v4431_v8 = vpack.c.bf16 %v2120_v52, %v2118_v33  ;;  %v2329_v61 = vadd.f32 %v2328_v56, %v5814_v21 }
 0x2ff   : > { %v2421_v62 = vmax.f32 %v2327_v57, 0.0 }
 0x300   : > { %4433 = vmatprep.subr.msk.bf16.mxu1 %vm5835_vm2, %v4431_v8  ;;  %v2332_v38 = vpop.f32.mrb[162].mxu0  ;;  %v2422_v49 = vmax.f32 %v2329_v61, 0.0 }
 0x301   : > { %v2333_v22 = vadd.f32 %v2332_v38, %v5821_v35  ;;  %4435 = vmatpush1.bf16.xpose.msra.mxu1 %v4434_v54  ;;  %v2334_v25 = vpop.f32.mrb[163].mxu0 }
 0x302   : > { %v2335_v14 = vadd.f32 %v2334_v25, %v5821_v35 }
 0x303   : > { %v2423_v1 = vmax.f32 %v2333_v22, 0.0 }
 0x304   : > { %v2424_v2 = vmax.f32 %v2335_v14, 0.0  ;;  %v2338_v4 = vpop.f32.mrb[164].mxu0 }
 0x305   : > { %v4459_v40 = vpack.c.bf16 %v2423_v1, %v2421_v62  ;;  %v2340_v32 = vpop.f32.mrb[165].mxu0  ;;  %v2339_v0 = vadd.f32 %v2338_v4, %v5827_v41 }
 0x306   : > { %v4456_v5 = vpack.c.bf16 %v2424_v2, %v2422_v49  ;;  %v2341_v9 = vadd.f32 %v2340_v32, %v5827_v41 }
 0x307   : > { %v2425_v15 = vmax.f32 %v2339_v0, 0.0 }
 0x308   : > { %2234 = vmatmul.mubr.f32.vlgmr.msra.gmra.mrb[8].mxu1 %v5104_v48  ;;  %v2344_v12 = vpop.f32.mrb[166].mxu0  ;;  %4458 = vmatprep.subr.msk.bf16.mxu1 %vm5835_vm2, %v4456_v5  ;;  %v2426_v58 = vmax.f32 %v2341_v9, 0.0 }
 0x309   : > { %v2345_v47 = vadd.f32 %v2344_v12, %v5841_v55  ;;  %v2346_v13 = vpop.f32.mrb[167].mxu0  ;;  %4460 = vmatpush1.bf16.xpose.msra.mxu1 %v4459_v40  ;;  %3988 = vmatprep.mubr.msk.f32.mxu1 %vm789_vm1, %v5104_v48 }
 0x30a   : > { %v2347_v31 = vadd.f32 %v2346_v13, %v5841_v55 }
 0x30b   : > { %v2427_v16 = vmax.f32 %v2345_v47, 0.0 }
 0x30c   : > { %v2428_v26 = vmax.f32 %v2347_v31, 0.0  ;;  %v2350_v17 = vpop.f32.mrb[168].mxu0 }
 0x30d   : > { %v4464_v23 = vpack.c.bf16 %v2427_v16, %v2425_v15  ;;  %v2352_v36 = vpop.f32.mrb[169].mxu0  ;;  %v2351_v28 = vadd.f32 %v2350_v17, %v5853_v7 }
 0x30e   : > { %v4461_v50 = vpack.c.bf16 %v2428_v26, %v2426_v58  ;;  %v2353_v39 = vadd.f32 %v2352_v36, %v5853_v7 }
 0x30f   : > { %v2429_v19 = vmax.f32 %v2351_v28, 0.0 }
 0x310   : > { %v2356_v30 = vpop.f32.mrb[170].mxu0  ;;  %4463 = vmatprep.subr.msk.bf16.mxu1 %vm5835_vm2, %v4461_v50  ;;  %v2430_v46 = vmax.f32 %v2353_v39, 0.0 }
 0x311   : > { %v2357_v43 = vadd.f32 %v2356_v30, %v5857_v10  ;;  %v2358_v3 = vpop.f32.mrb[171].mxu0  ;;  %4465 = vmatpush1.bf16.xpose.msra.mxu1 %v4464_v23 }
 0x312   : > { %v2359_v18 = vadd.f32 %v2358_v3, %v5857_v10 }
 0x313   : > { %v2431_v29 = vmax.f32 %v2357_v43, 0.0 }
 0x314   : > { %v2432_v27 = vmax.f32 %v2359_v18, 0.0  ;;  %v2362_v44 = vpop.f32.mrb[172].mxu0 }
 0x315   : > { %v4469_v33 = vpack.c.bf16 %v2431_v29, %v2429_v19  ;;  %v2364_v52 = vpop.f32.mrb[173].mxu0  ;;  %v2363_v54 = vadd.f32 %v2362_v44, %v5869_v37 }
 0x316   : > { %v4466_v53 = vpack.c.bf16 %v2432_v27, %v2430_v46  ;;  %v2365_v56 = vadd.f32 %v2364_v52, %v5869_v37 }
 0x317   : > { %v2433_v22 = vmax.f32 %v2363_v54, 0.0 }
 0x318   : > { %v2368_v8 = vpop.f32.mrb[174].mxu0  ;;  %4468 = vmatprep.subr.msk.bf16.mxu1 %vm5835_vm2, %v4466_v53  ;;  %v2434_v62 = vmax.f32 %v2365_v56, 0.0 }
 0x319   : > { %v2369_v57 = vadd.f32 %v2368_v8, %v5873_v42  ;;  %v2370_v61 = vpop.f32.mrb[175].mxu0  ;;  %4470 = vmatpush1.bf16.xpose.msra.mxu1 %v4469_v33 }
 0x31a   : > { %v2371_v38 = vadd.f32 %v2370_v61, %v5873_v42 }
 0x31b   : > { %v2435_v25 = vmax.f32 %v2369_v57, 0.0  ;;  %v1239_v14 = vpop.f32.mrb[2].mxu1 }
 0x31c   : > { %v2436_v1 = vmax.f32 %v2371_v38, 0.0  ;;  %v3237_v49 = vrot.slane %v1239_v14, 7  ;;  %v2374_v2 = vpop.f32.mrb[176].mxu0  ;;  %v1241_v4 = vpop.f32.mrb[3].mxu1 }
 0x31d   : > { %v4474_v40 = vpack.c.bf16 %v2435_v25, %v2433_v22  ;;  %v2376_v32 = vpop.f32.mrb[177].mxu0  ;;  %v2375_v9 = vadd.f32 %v2374_v2, %v5885_v60 }
 0x31e   : > { %v4471_v5 = vpack.c.bf16 %v2436_v1, %v2434_v62  ;;  %v6498_v0 = vsel %vm3257_vm3, %v6433_v34, %v3237_v49  ;;  %v2377_v12 = vadd.f32 %v2376_v32, %v5885_v60 }
 0x31f   : > { %v2437_v16 = vmax.f32 %v2375_v9, 0.0 }
 0x320   : > { %v2380_v47 = vpop.f32.mrb[178].mxu0  ;;  %4473 = vmatprep.subr.msk.bf16.mxu1 %vm5835_vm2, %v4471_v5  ;;  %v2438_v26 = vmax.f32 %v2377_v12, 0.0 }
 0x321   : > { %v2381_v13 = vadd.f32 %v2380_v47, %v5889_v63  ;;  %v2382_v31 = vpop.f32.mrb[179].mxu0  ;;  %4475 = vmatpush1.bf16.xpose.msra.mxu1 %v4474_v40 }
 0x322   : > { %v2383_v15 = vadd.f32 %v2382_v31, %v5889_v63 }
 0x323   : > { %v2439_v58 = vmax.f32 %v2381_v13, 0.0 }
 0x324   : > { %v2440_v17 = vmax.f32 %v2383_v15, 0.0  ;;  %v2386_v34 = vpop.f32.mrb[180].mxu0 }
 0x325   : > { %v4479_v23 = vpack.c.bf16 %v2439_v58, %v2437_v16  ;;  %v2388_v36 = vpop.f32.mrb[181].mxu0  ;;  %v2387_v28 = vadd.f32 %v2386_v34, %v5905_v24 }
 0x326   : > { %v4476_v50 = vpack.c.bf16 %v2440_v17, %v2438_v26  ;;  %v2389_v39 = vadd.f32 %v2388_v36, %v5905_v24 }
 0x327   : > { %v2441_v19 = vmax.f32 %v2387_v28, 0.0 }
 0x328   : > { %v2392_v30 = vpop.f32.mrb[182].mxu0  ;;  %4478 = vmatprep.subr.msk.bf16.mxu1 %vm5835_vm2, %v4476_v50  ;;  %v2442_v46 = vmax.f32 %v2389_v39, 0.0 }
 0x329   : > { %v2393_v43 = vadd.f32 %v2392_v30, %v5911_v45  ;;  %v2394_v3 = vpop.f32.mrb[183].mxu0  ;;  %4480 = vmatpush1.bf16.xpose.msra.mxu1 %v4479_v23 }
 0x32a   : > { %v2395_v18 = vadd.f32 %v2394_v3, %v5911_v45 }
 0x32b   : > { %v2443_v29 = vmax.f32 %v2393_v43, 0.0 }
 0x32c   : > { %v2444_v27 = vmax.f32 %v2395_v18, 0.0  ;;  %v2398_v44 = vpop.f32.mrb[184].mxu0 }
 0x32d   : > { %v4484_v33 = vpack.c.bf16 %v2443_v29, %v2441_v19  ;;  %v2400_v52 = vpop.f32.mrb[185].mxu0  ;;  %v2399_v54 = vadd.f32 %v2398_v44, %v5929_v11 }
 0x32e   : > { %v4481_v53 = vpack.c.bf16 %v2444_v27, %v2442_v46  ;;  %v2401_v56 = vadd.f32 %v2400_v52, %v5929_v11 }
 0x32f   : > { %v2445_v22 = vmax.f32 %v2399_v54, 0.0 }
 0x330   : > { %v2404_v8 = vpop.f32.mrb[186].mxu0  ;;  %4483 = vmatprep.subr.msk.bf16.mxu1 %vm5835_vm2, %v4481_v53  ;;  %v2446_v14 = vmax.f32 %v2401_v56, 0.0 }
 0x331   : > { %v2405_v57 = vadd.f32 %v2404_v8, %v5935_v20  ;;  %v2406_v61 = vpop.f32.mrb[187].mxu0  ;;  %4485 = vmatpush1.bf16.xpose.msra.mxu1 %v4484_v33 }
 0x332   : > { %v2407_v38 = vadd.f32 %v2406_v61, %v5935_v20 }
 0x333   : > { %v2447_v25 = vmax.f32 %v2405_v57, 0.0 }
 0x334   : > { %v2448_v62 = vmax.f32 %v2407_v38, 0.0  ;;  %v2410_v1 = vpop.f32.mrb[188].mxu0 }
 0x335   : > { %v4489_v49 = vpack.c.bf16 %v2447_v25, %v2445_v22  ;;  %v2412_v2 = vpop.f32.mrb[189].mxu0  ;;  %v2411_v40 = vadd.f32 %v2410_v1, %v5953_v59 }
 0x336   : > { %v4486_v4 = vpack.c.bf16 %v2448_v62, %v2446_v14  ;;  %v2413_v32 = vadd.f32 %v2412_v2, %v5953_v59 }
 0x337   : > { %v2449_v13 = vmax.f32 %v2411_v40, 0.0 }
 0x338   : > { %v2416_v5 = vpop.f32.mrb[190].mxu0  ;;  %4488 = vmatprep.subr.msk.bf16.mxu1 %vm5835_vm2, %v4486_v4  ;;  %v2450_v15 = vmax.f32 %v2413_v32, 0.0 }
 0x339   : > { %v2417_v9 = vadd.f32 %v2416_v5, %v5957_v6  ;;  %v2418_v12 = vpop.f32.mrb[191].mxu0  ;;  %4490 = vmatpush1.bf16.xpose.msra.mxu1 %v4489_v49 }
 0x33a   : > { %v2419_v47 = vadd.f32 %v2418_v12, %v5957_v6 }
 0x33b   : > { %v2451_v31 = vmax.f32 %v2417_v9, 0.0 }
 0x33c   : > { %v2452_v16 = vmax.f32 %v2419_v47, 0.0  ;;  %v2658_v58 = vpop.f32.mrb[192].mxu0 }
 0x33d   : > { %v4494_v26 = vpack.c.bf16 %v2451_v31, %v2449_v13  ;;  %v2660_v17 = vpop.f32.mrb[193].mxu0  ;;  %v2659_v23 = vadd.f32 %v2658_v58, %v5814_v21 }
 0x33e   : > { %v4491_v34 = vpack.c.bf16 %v2452_v16, %v2450_v15  ;;  %v2661_v36 = vadd.f32 %v2660_v17, %v5814_v21 }
 0x33f   : > { %v2753_v43 = vmax.f32 %v2659_v23, 0.0 }
 0x340   : > { %4493 = vmatprep.subr.msk.bf16.mxu1 %vm5835_vm2, %v4491_v34  ;;  %v2664_v50 = vpop.f32.mrb[194].mxu0  ;;  %v2754_v18 = vmax.f32 %v2661_v36, 0.0 }
 0x341   : > { %v2665_v28 = vadd.f32 %v2664_v50, %v5821_v35  ;;  %4495 = vmatpush1.bf16.xpose.msra.mxu1 %v4494_v26  ;;  %v2666_v39 = vpop.f32.mrb[195].mxu0 }
 0x342   : > { %v2667_v30 = vadd.f32 %v2666_v39, %v5821_v35 }
 0x343   : > { %v2755_v3 = vmax.f32 %v2665_v28, 0.0 }
 0x344   : > { %v2756_v19 = vmax.f32 %v2667_v30, 0.0  ;;  %v2670_v29 = vpop.f32.mrb[196].mxu0 }
 0x345   : > { %v4519_v46 = vpack.c.bf16 %v2755_v3, %v2753_v43  ;;  %v2672_v27 = vpop.f32.mrb[197].mxu0  ;;  %v2671_v33 = vadd.f32 %v2670_v29, %v5827_v41 }
 0x346   : > { %v4516_v44 = vpack.c.bf16 %v2756_v19, %v2754_v18  ;;  %v2673_v52 = vadd.f32 %v2672_v27, %v5827_v41 }
 0x347   : > { %v2757_v57 = vmax.f32 %v2671_v33, 0.0 }
 0x348   : > { %2566 = vmatmul.mubr.f32.vlgmr.msra.gmra.mrb[10].mxu1 %v5104_v48  ;;  %v2676_v53 = vpop.f32.mrb[198].mxu0  ;;  %4518 = vmatprep.subr.msk.bf16.mxu1 %vm5835_vm2, %v4516_v44  ;;  %v2758_v38 = vmax.f32 %v2673_v52, 0.0 }
 0x349   : > { %v2677_v54 = vadd.f32 %v2676_v53, %v5841_v55  ;;  %v2678_v56 = vpop.f32.mrb[199].mxu0  ;;  %4520 = vmatpush1.bf16.xpose.msra.mxu1 %v4519_v46  ;;  %4041 = vmatprep.mubr.msk.f32.mxu1 %vm789_vm1, %v5104_v48 }
 0x34a   : > { %v2679_v8 = vadd.f32 %v2678_v56, %v5841_v55 }
 0x34b   : > { %v2759_v61 = vmax.f32 %v2677_v54, 0.0 }
 0x34c   : > { %v2760_v22 = vmax.f32 %v2679_v8, 0.0  ;;  %v2682_v25 = vpop.f32.mrb[200].mxu0 }
 0x34d   : > { %v4524_v14 = vpack.c.bf16 %v2759_v61, %v2757_v57  ;;  %v2684_v62 = vpop.f32.mrb[201].mxu0  ;;  %v2683_v49 = vadd.f32 %v2682_v25, %v5853_v7 }
 0x34e   : > { %v4521_v1 = vpack.c.bf16 %v2760_v22, %v2758_v38  ;;  %v2685_v2 = vadd.f32 %v2684_v62, %v5853_v7 }
 0x34f   : > { %v2761_v9 = vmax.f32 %v2683_v49, 0.0 }
 0x350   : > { %v2688_v4 = vpop.f32.mrb[202].mxu0  ;;  %4523 = vmatprep.subr.msk.bf16.mxu1 %vm5835_vm2, %v4521_v1  ;;  %v2762_v47 = vmax.f32 %v2685_v2, 0.0 }
 0x351   : > { %v2689_v40 = vadd.f32 %v2688_v4, %v5857_v10  ;;  %v2690_v32 = vpop.f32.mrb[203].mxu0  ;;  %4525 = vmatpush1.bf16.xpose.msra.mxu1 %v4524_v14 }
 0x352   : > { %v2691_v5 = vadd.f32 %v2690_v32, %v5857_v10 }
 0x353   : > { %v2763_v12 = vmax.f32 %v2689_v40, 0.0 }
 0x354   : > { %v2764_v13 = vmax.f32 %v2691_v5, 0.0  ;;  %v2694_v31 = vpop.f32.mrb[204].mxu0 }
 0x355   : > { %v4529_v15 = vpack.c.bf16 %v2763_v12, %v2761_v9  ;;  %v2696_v16 = vpop.f32.mrb[205].mxu0  ;;  %v2695_v26 = vadd.f32 %v2694_v31, %v5869_v37 }
 0x356   : > { %v4526_v58 = vpack.c.bf16 %v2764_v13, %v2762_v47  ;;  %v2697_v17 = vadd.f32 %v2696_v16, %v5869_v37 }
 0x357   : > { %v2765_v28 = vmax.f32 %v2695_v26, 0.0 }
 0x358   : > { %v2700_v34 = vpop.f32.mrb[206].mxu0  ;;  %4528 = vmatprep.subr.msk.bf16.mxu1 %vm5835_vm2, %v4526_v58  ;;  %v2766_v43 = vmax.f32 %v2697_v17, 0.0 }
 0x359   : > { %v2701_v23 = vadd.f32 %v2700_v34, %v5873_v42  ;;  %v2702_v36 = vpop.f32.mrb[207].mxu0  ;;  %4530 = vmatpush1.bf16.xpose.msra.mxu1 %v4529_v15 }
 0x35a   : > { %v2703_v50 = vadd.f32 %v2702_v36, %v5873_v42 }
 0x35b   : > { %v2767_v39 = vmax.f32 %v2701_v23, 0.0  ;;  %v1571_v30 = vpop.f32.mrb[4].mxu1 }
 0x35c   : > { %v2768_v3 = vmax.f32 %v2703_v50, 0.0  ;;  %v3240_v18 = vrot.slane %v1571_v30, 6  ;;  %v2706_v19 = vpop.f32.mrb[208].mxu0  ;;  %v1573_v29 = vpop.f32.mrb[5].mxu1 }
 0x35d   : > { %v4534_v46 = vpack.c.bf16 %v2767_v39, %v2765_v28  ;;  %v2708_v27 = vpop.f32.mrb[209].mxu0  ;;  %v2707_v52 = vadd.f32 %v2706_v19, %v5885_v60 }
 0x35e   : > { %v4531_v44 = vpack.c.bf16 %v2768_v3, %v2766_v43  ;;  %v6552_v33 = vsel %vm3259_vm4, %v6498_v0, %v3240_v18  ;;  %v2709_v53 = vadd.f32 %v2708_v27, %v5885_v60 }
 0x35f   : > { %v2769_v61 = vmax.f32 %v2707_v52, 0.0 }
 0x360   : > { %v2712_v54 = vpop.f32.mrb[210].mxu0  ;;  %4533 = vmatprep.subr.msk.bf16.mxu1 %vm5835_vm2, %v4531_v44  ;;  %v2770_v22 = vmax.f32 %v2709_v53, 0.0 }
 0x361   : > { %v2713_v56 = vadd.f32 %v2712_v54, %v5889_v63  ;;  %v2714_v8 = vpop.f32.mrb[211].mxu0  ;;  %4535 = vmatpush1.bf16.xpose.msra.mxu1 %v4534_v46 }
 0x362   : > { %v2715_v57 = vadd.f32 %v2714_v8, %v5889_v63 }
 0x363   : > { %v2771_v38 = vmax.f32 %v2713_v56, 0.0 }
 0x364   : > { %v2772_v25 = vmax.f32 %v2715_v57, 0.0  ;;  %v2718_v0 = vpop.f32.mrb[212].mxu0 }
 0x365   : > { %v4539_v14 = vpack.c.bf16 %v2771_v38, %v2769_v61  ;;  %v2720_v62 = vpop.f32.mrb[213].mxu0  ;;  %v2719_v49 = vadd.f32 %v2718_v0, %v5905_v24 }
 0x366   : > { %v4536_v1 = vpack.c.bf16 %v2772_v25, %v2770_v22  ;;  %v2721_v2 = vadd.f32 %v2720_v62, %v5905_v24 }
 0x367   : > { %v2773_v9 = vmax.f32 %v2719_v49, 0.0 }
 0x368   : > { %v2724_v4 = vpop.f32.mrb[214].mxu0  ;;  %4538 = vmatprep.subr.msk.bf16.mxu1 %vm5835_vm2, %v4536_v1  ;;  %v2774_v47 = vmax.f32 %v2721_v2, 0.0 }
 0x369   : > { %v2725_v40 = vadd.f32 %v2724_v4, %v5911_v45  ;;  %v2726_v32 = vpop.f32.mrb[215].mxu0  ;;  %4540 = vmatpush1.bf16.xpose.msra.mxu1 %v4539_v14 }
 0x36a   : > { %v2727_v5 = vadd.f32 %v2726_v32, %v5911_v45 }
 0x36b   : > { %v2775_v12 = vmax.f32 %v2725_v40, 0.0 }
 0x36c   : > { %v2776_v13 = vmax.f32 %v2727_v5, 0.0  ;;  %v2730_v31 = vpop.f32.mrb[216].mxu0 }
 0x36d   : > { %v4544_v15 = vpack.c.bf16 %v2775_v12, %v2773_v9  ;;  %v2732_v16 = vpop.f32.mrb[217].mxu0  ;;  %v2731_v26 = vadd.f32 %v2730_v31, %v5929_v11 }
 0x36e   : > { %v4541_v58 = vpack.c.bf16 %v2776_v13, %v2774_v47  ;;  %v2733_v17 = vadd.f32 %v2732_v16, %v5929_v11 }
 0x36f   : > { %v2777_v28 = vmax.f32 %v2731_v26, 0.0 }
 0x370   : > { %v2736_v34 = vpop.f32.mrb[218].mxu0  ;;  %4543 = vmatprep.subr.msk.bf16.mxu1 %vm5835_vm2, %v4541_v58  ;;  %v2778_v30 = vmax.f32 %v2733_v17, 0.0 }
 0x371   : > { %v2737_v23 = vadd.f32 %v2736_v34, %v5935_v20  ;;  %v2738_v36 = vpop.f32.mrb[219].mxu0  ;;  %4545 = vmatpush1.bf16.xpose.msra.mxu1 %v4544_v15 }
 0x372   : > { %v2739_v50 = vadd.f32 %v2738_v36, %v5935_v20 }
 0x373   : > { %v2779_v39 = vmax.f32 %v2737_v23, 0.0 }
 0x374   : > { %v2780_v43 = vmax.f32 %v2739_v50, 0.0  ;;  %v2742_v3 = vpop.f32.mrb[220].mxu0 }
 0x375   : > { %v4549_v18 = vpack.c.bf16 %v2779_v39, %v2777_v28  ;;  %v2744_v19 = vpop.f32.mrb[221].mxu0  ;;  %v2743_v46 = vadd.f32 %v2742_v3, %v5953_v59 }
 0x376   : > { %v4546_v29 = vpack.c.bf16 %v2780_v43, %v2778_v30  ;;  %v2745_v27 = vadd.f32 %v2744_v19, %v5953_v59 }
 0x377   : > { %v2781_v56 = vmax.f32 %v2743_v46, 0.0 }
 0x378   : > { %v2748_v44 = vpop.f32.mrb[222].mxu0  ;;  %4548 = vmatprep.subr.msk.bf16.mxu1 %vm5835_vm2, %v4546_v29  ;;  %v2782_v57 = vmax.f32 %v2745_v27, 0.0 }
 0x379   : > { %v2749_v52 = vadd.f32 %v2748_v44, %v5957_v6  ;;  %v2750_v53 = vpop.f32.mrb[223].mxu0  ;;  %4550 = vmatpush1.bf16.xpose.msra.mxu1 %v4549_v18 }
 0x37a   : > { %v2751_v54 = vadd.f32 %v2750_v53, %v5957_v6 }
 0x37b   : > { %v2783_v8 = vmax.f32 %v2749_v52, 0.0 }
 0x37c   : > { %v2784_v61 = vmax.f32 %v2751_v54, 0.0  ;;  %v2990_v38 = vpop.f32.mrb[224].mxu0 }
 0x37d   : > { %v4554_v22 = vpack.c.bf16 %v2783_v8, %v2781_v56  ;;  %v2992_v25 = vpop.f32.mrb[225].mxu0  ;;  %v2991_v14 = vadd.f32 %v2990_v38, %v5814_v21 }
 0x37e   : > { %v4551_v0 = vpack.c.bf16 %v2784_v61, %v2782_v57  ;;  %v2993_v62 = vadd.f32 %v2992_v25, %v5814_v21 }
 0x37f   : > { %v3085_v40 = vmax.f32 %v2991_v14, 0.0 }
 0x380   : > { %4553 = vmatprep.subr.msk.bf16.mxu1 %vm5835_vm2, %v4551_v0  ;;  %v2996_v1 = vpop.f32.mrb[226].mxu0  ;;  %v3086_v5 = vmax.f32 %v2993_v62, 0.0 }
 0x381   : > { %v2997_v49 = vadd.f32 %v2996_v1, %v5821_v35  ;;  %4555 = vmatpush1.bf16.xpose.msra.mxu1 %v4554_v22  ;;  %v2998_v2 = vpop.f32.mrb[227].mxu0 }
 0x382   : > { %v2999_v4 = vadd.f32 %v2998_v2, %v5821_v35 }
 0x383   : > { %v3087_v32 = vmax.f32 %v2997_v49, 0.0 }
 0x384   : > { %v3088_v9 = vmax.f32 %v2999_v4, 0.0  ;;  %v3002_v12 = vpop.f32.mrb[228].mxu0 }
 0x385   : > { %v4579_v47 = vpack.c.bf16 %v3087_v32, %v3085_v40  ;;  %v3004_v13 = vpop.f32.mrb[229].mxu0  ;;  %v3003_v21 = vadd.f32 %v3002_v12, %v5827_v41 }
 0x386   : > { %v4576_v31 = vpack.c.bf16 %v3088_v9, %v3086_v5  ;;  %v3005_v15 = vadd.f32 %v3004_v13, %v5827_v41 }
 0x387   : > { %v3089_v17 = vmax.f32 %v3003_v21, 0.0 }
 0x388   : > { %2898 = vmatmul.mubr.f32.vlgmr.msra.gmra.mrb[12].mxu1 %v5104_v48  ;;  %v3008_v16 = vpop.f32.mrb[230].mxu0  ;;  %4578 = vmatprep.subr.msk.bf16.mxu1 %vm5835_vm2, %v4576_v31  ;;  %v3090_v23 = vmax.f32 %v3005_v15, 0.0 }
 0x389   : > { %v3009_v35 = vadd.f32 %v3008_v16, %v5841_v55  ;;  %v3010_v58 = vpop.f32.mrb[231].mxu0  ;;  %4580 = vmatpush1.bf16.xpose.msra.mxu1 %v4579_v47  ;;  %4094 = vmatprep.mubr.msk.f32.mxu1 %vm789_vm1, %v5104_v48 }
 0x38a   : > { %v3011_v26 = vadd.f32 %v3010_v58, %v5841_v55 }
 0x38b   : > { %v3091_v34 = vmax.f32 %v3009_v35, 0.0 }
 0x38c   : > { %v3092_v36 = vmax.f32 %v3011_v26, 0.0  ;;  %v3014_v41 = vpop.f32.mrb[232].mxu0 }
 0x38d   : > { %v4584_v50 = vpack.c.bf16 %v3091_v34, %v3089_v17  ;;  %v3016_v28 = vpop.f32.mrb[233].mxu0  ;;  %v3015_v30 = vadd.f32 %v3014_v41, %v5853_v7 }
 0x38e   : > { %v4581_v39 = vpack.c.bf16 %v3092_v36, %v3090_v23  ;;  %v3017_v43 = vadd.f32 %v3016_v28, %v5853_v7 }
 0x38f   : > { %v3093_v29 = vmax.f32 %v3015_v30, 0.0 }
 0x390   : > { %v3020_v3 = vpop.f32.mrb[234].mxu0  ;;  %4583 = vmatprep.subr.msk.bf16.mxu1 %vm5835_vm2, %v4581_v39  ;;  %v3094_v27 = vmax.f32 %v3017_v43, 0.0 }
 0x391   : > { %v3021_v18 = vadd.f32 %v3020_v3, %v5857_v10  ;;  %v3022_v19 = vpop.f32.mrb[235].mxu0  ;;  %4585 = vmatpush1.bf16.xpose.msra.mxu1 %v4584_v50 }
 0x392   : > { %v3023_v55 = vadd.f32 %v3022_v19, %v5857_v10 }
 0x393   : > { %v3095_v46 = vmax.f32 %v3021_v18, 0.0 }
 0x394   : > { %v3096_v44 = vmax.f32 %v3023_v55, 0.0  ;;  %v3026_v52 = vpop.f32.mrb[236].mxu0 }
 0x395   : > { %v4589_v53 = vpack.c.bf16 %v3095_v46, %v3093_v29  ;;  %v3028_v54 = vpop.f32.mrb[237].mxu0  ;;  %v3027_v7 = vadd.f32 %v3026_v52, %v5869_v37 }
 0x396   : > { %v4586_v56 = vpack.c.bf16 %v3096_v44, %v3094_v27  ;;  %v3029_v8 = vadd.f32 %v3028_v54, %v5869_v37 }
 0x397   : > { %v3097_v22 = vmax.f32 %v3027_v7, 0.0 }
 0x398   : > { %v3032_v57 = vpop.f32.mrb[238].mxu0  ;;  %4588 = vmatprep.subr.msk.bf16.mxu1 %vm5835_vm2, %v4586_v56  ;;  %v3098_v14 = vmax.f32 %v3029_v8, 0.0 }
 0x399   : > { %v3033_v61 = vadd.f32 %v3032_v57, %v5873_v42  ;;  %v3034_v38 = vpop.f32.mrb[239].mxu0  ;;  %4590 = vmatpush1.bf16.xpose.msra.mxu1 %v4589_v53 }
 0x39a   : > { %v3035_v10 = vadd.f32 %v3034_v38, %v5873_v42 }
 0x39b   : > { %v3099_v25 = vmax.f32 %v3033_v61, 0.0  ;;  %v1903_v0 = vpop.f32.mrb[6].mxu1 }
 0x39c   : > { %v3100_v62 = vmax.f32 %v3035_v10, 0.0  ;;  %v3243_v1 = vrot.slane %v1903_v0, 5  ;;  %v3038_v49 = vpop.f32.mrb[240].mxu0  ;;  %v1905_v2 = vpop.f32.mrb[7].mxu1 }
 0x39d   : > { %v4594_v37 = vpack.c.bf16 %v3099_v25, %v3097_v22  ;;  %v3040_v4 = vpop.f32.mrb[241].mxu0  ;;  %v3039_v5 = vadd.f32 %v3038_v49, %v5885_v60 }
 0x39e   : > { %v4591_v40 = vpack.c.bf16 %v3100_v62, %v3098_v14  ;;  %v6606_v32 = vsel %vm3261_vm5, %v6552_v33, %v3243_v1  ;;  %v3041_v9 = vadd.f32 %v3040_v4, %v5885_v60  ;;  %v3289_v4 = vld [vmem:[#allocation8 + $0x18] sm:$0xff] }
 0x39f   : > { %v3101_v31 = vmax.f32 %v3039_v5, 0.0 }
 0x3a0   : > { %v3044_v42 = vpop.f32.mrb[242].mxu0  ;;  %4593 = vmatprep.subr.msk.bf16.mxu1 %vm5835_vm2, %v4591_v40  ;;  %v3102_v15 = vmax.f32 %v3041_v9, 0.0  ;;  %v3286_v40 = vld [vmem:[#allocation8] sm:$0xff]  ;;  %v3288_v9 = vld [vmem:[#allocation8 + $0x10] sm:$0xff] }
 0x3a1   : > { %v3045_v12 = vadd.f32 %v3044_v42, %v5889_v63  ;;  %v3046_v47 = vpop.f32.mrb[243].mxu0  ;;  %4595 = vmatpush1.bf16.xpose.msra.mxu1 %v4594_v37  ;;  %v3291_v42 = vld [vmem:[#allocation8 + $0x28] sm:$0xff] }
 0x3a2   : > { %v3047_v13 = vadd.f32 %v3046_v47, %v5889_v63  ;;  %v4618_v47 = vpack.c.bf16 %v3288_v9, %v3286_v40 }
 0x3a3   : > { %v3103_v21 = vmax.f32 %v3045_v12, 0.0  ;;  %v3293_v12 = vld [vmem:[#allocation8 + $0x38] sm:$0xff] }
 0x3a4   : > { %v3104_v16 = vmax.f32 %v3047_v13, 0.0  ;;  %v3050_v33 = vpop.f32.mrb[244].mxu0  ;;  %v4620_v51 = vpack.c.bf16 %v3293_v12, %v3291_v42  ;;  %v3290_v13 = vld [vmem:[#allocation8 + $0x20] sm:$0xff]  ;;  %v3437_v42 = vld [vmem:[#allocation11 + $0x90] sm:$0xff] }
 0x3a5   : > { %v4599_v35 = vpack.c.bf16 %v3103_v21, %v3101_v31  ;;  %v3052_v58 = vpop.f32.mrb[245].mxu0  ;;  %v3051_v60 = vadd.f32 %v3050_v33, %v5905_v24  ;;  %v3292_v31 = vld [vmem:[#allocation8 + $0x30] sm:$0xff]  ;;  %v3295_v21 = vld [vmem:[#allocation8 + $0x48] sm:$0xff]  ;;  %v3438_v12 = vld [vmem:[#allocation11 + $0x98] sm:$0xff] }
 0x3a6   : > { %v4596_v26 = vpack.c.bf16 %v3104_v16, %v3102_v15  ;;  %v3053_v17 = vadd.f32 %v3052_v58, %v5905_v24  ;;  %v4622_v15 = vpack.c.bf16 %v3292_v31, %v3290_v13  ;;  %v3296_v33 = vld [vmem:[#allocation8 + $0x50] sm:$0xff]  ;;  %v3301_v58 = vld [vmem:[#allocation8 + $0x78] sm:$0xff] }
 0x3a7   : > { %v3105_v41 = vmax.f32 %v3051_v60, 0.0  ;;  %v3422_v13 = vld [vmem:[#allocation11 + $0x18] sm:$0xff] }
 0x3a8   : > { %v3056_v34 = vpop.f32.mrb[246].mxu0  ;;  %4598 = vmatprep.subr.msk.bf16.mxu1 %vm5835_vm2, %v4596_v26  ;;  %v3106_v28 = vmax.f32 %v3053_v17, 0.0  ;;  %v3298_v17 = vld [vmem:[#allocation8 + $0x60] sm:$0xff] }
 0x3a9   : > { %v3057_v23 = vadd.f32 %v3056_v34, %v5911_v45  ;;  %v3058_v36 = vpop.f32.mrb[247].mxu0  ;;  %4600 = vmatpush1.bf16.xpose.msra.mxu1 %v4599_v35  ;;  %v3299_v35 = vld [vmem:[#allocation8 + $0x68] sm:$0xff]  ;;  %v3300_v34 = vld [vmem:[#allocation8 + $0x70] sm:$0xff] }
 0x3aa   : > { %v3059_v63 = vadd.f32 %v3058_v36, %v5911_v45  ;;  %v4628_v60 = vpack.c.bf16 %v3301_v58, %v3299_v35  ;;  %v3305_v36 = vld [vmem:[#allocation8 + $0x98] sm:$0xff] }
 0x3ab   : > { %v3107_v50 = vmax.f32 %v3057_v23, 0.0  ;;  %v3303_v23 = vld [vmem:[#allocation8 + $0x88] sm:$0xff]  ;;  %v3441_v35 = vld [vmem:[#allocation11 + $0xb0] sm:$0xff]  ;;  %v3442_v58 = vld [vmem:[#allocation11 + $0xb8] sm:$0xff] }
 0x3ac   : > { %v3108_v39 = vmax.f32 %v3059_v63, 0.0  ;;  %v3062_v30 = vpop.f32.mrb[248].mxu0  ;;  %v4630_v63 = vpack.c.bf16 %v3300_v34, %v3298_v17  ;;  %v3426_v17 = vld [vmem:[#allocation11 + $0x38] sm:$0xff] }
 0x3ad   : > { %v4604_v43 = vpack.c.bf16 %v3107_v50, %v3105_v41  ;;  %v3064_v3 = vpop.f32.mrb[249].mxu0  ;;  %v3063_v24 = vadd.f32 %v3062_v30, %v5929_v11  ;;  %v4632_v41 = vpack.c.bf16 %v3305_v36, %v3303_v23  ;;  %v3302_v50 = vld [vmem:[#allocation8 + $0x80] sm:$0xff]  ;;  %v3309_v30 = vld [vmem:[#allocation8 + $0xb8] sm:$0xff]  ;;  %v3444_v36 = vld [vmem:[#allocation11 + $0xc8] sm:$0xff] }
 0x3ae   : > { %v4601_v18 = vpack.c.bf16 %v3108_v39, %v3106_v28  ;;  %v3065_v19 = vadd.f32 %v3064_v3, %v5929_v11  ;;  %v3304_v28 = vld [vmem:[#allocation8 + $0x90] sm:$0xff]  ;;  %v3307_v39 = vld [vmem:[#allocation8 + $0xa8] sm:$0xff] }
 0x3af   : > { %v3109_v27 = vmax.f32 %v3063_v24, 0.0  ;;  %v4636_v3 = vpack.c.bf16 %v3309_v30, %v3307_v39  ;;  %v3308_v24 = vld [vmem:[#allocation8 + $0xb0] sm:$0xff]  ;;  %v3443_v23 = vld [vmem:[#allocation11 + $0xc0] sm:$0xff]  ;;  %v3446_v39 = vld [vmem:[#allocation11 + $0xd8] sm:$0xff] }
 0x3b0   : > { %v3068_v55 = vpop.f32.mrb[250].mxu0  ;;  %4603 = vmatprep.subr.msk.bf16.mxu1 %vm5835_vm2, %v4601_v18  ;;  %v3110_v52 = vmax.f32 %v3065_v19, 0.0  ;;  %v3306_v18 = vld [vmem:[#allocation8 + $0xa0] sm:$0xff]  ;;  %v3311_v19 = vld [vmem:[#allocation8 + $0xc8] sm:$0xff] }
 0x3b1   : > { %v3069_v29 = vadd.f32 %v3068_v55, %v5935_v20  ;;  %v3070_v46 = vpop.f32.mrb[251].mxu0  ;;  %4605 = vmatpush1.bf16.xpose.msra.mxu1 %v4604_v43  ;;  %v4634_v43 = vpack.c.bf16 %v3304_v28, %v3302_v50  ;;  %v3313_v55 = vld [vmem:[#allocation8 + $0xd8] sm:$0xff]  ;;  %v3428_v50 = vld [vmem:[#allocation11 + $0x48] sm:$0xff] }
 0x3b2   : > { %v3071_v45 = vadd.f32 %v3070_v46, %v5935_v20  ;;  %v4640_v46 = vpack.c.bf16 %v3313_v55, %v3311_v19  ;;  %v3445_v28 = vld [vmem:[#allocation11 + $0xd0] sm:$0xff]  ;;  %v3448_v19 = vld [vmem:[#allocation11 + $0xe8] sm:$0xff] }
 0x3b3   : > { %v3111_v44 = vmax.f32 %v3069_v29, 0.0  ;;  %v4638_v29 = vpack.c.bf16 %v3308_v24, %v3306_v18  ;;  %v3430_v18 = vld [vmem:[#allocation11 + $0x58] sm:$0xff]  ;;  %v3447_v24 = vld [vmem:[#allocation11 + $0xe0] sm:$0xff] }
 0x3b4   : > { %v3112_v53 = vmax.f32 %v3071_v45, 0.0  ;;  %v3074_v54 = vpop.f32.mrb[252].mxu0  ;;  %v3310_v45 = vld [vmem:[#allocation8 + $0xc0] sm:$0xff] }
 0x3b5   : > { %v4609_v56 = vpack.c.bf16 %v3111_v44, %v3109_v27  ;;  %v3076_v7 = vpop.f32.mrb[253].mxu0  ;;  %v3075_v11 = vadd.f32 %v3074_v54, %v5953_v59  ;;  %v3312_v27 = vld [vmem:[#allocation8 + $0xd0] sm:$0xff] }
 0x3b6   : > { %v4606_v8 = vpack.c.bf16 %v3112_v53, %v3110_v52  ;;  %v3077_v57 = vadd.f32 %v3076_v7, %v5953_v59  ;;  %v4642_v44 = vpack.c.bf16 %v3312_v27, %v3310_v45  ;;  %v3317_v7 = vld [vmem:[#allocation8 + $0xf8] sm:$0xff]  ;;  %v3432_v45 = vld [vmem:[#allocation11 + $0x68] sm:$0xff] }
 0x3b7   : > { %v3113_v22 = vmax.f32 %v3075_v11, 0.0  ;;  %v3314_v11 = vld [vmem:[#allocation8 + $0xe0] sm:$0xff]  ;;  %v3449_v27 = vld [vmem:[#allocation11 + $0xf0] sm:$0xff] }
 0x3b8   : > { %v3080_v61 = vpop.f32.mrb[254].mxu0  ;;  %4608 = vmatprep.subr.msk.bf16.mxu1 %vm5835_vm2, %v4606_v8  ;;  %v3114_v0 = vmax.f32 %v3077_v57, 0.0  ;;  %v3316_v57 = vld [vmem:[#allocation8 + $0xf0] sm:$0xff] }
 0x3b9   : > { %v3081_v38 = vadd.f32 %v3080_v61, %v5957_v6  ;;  %v3082_v10 = vpop.f32.mrb[255].mxu0  ;;  %4610 = vmatpush1.bf16.xpose.msra.mxu1 %v4609_v56  ;;  %v3315_v56 = vld [vmem:[#allocation8 + $0xe8] sm:$0xff] }
 0x3ba   : > { %v3083_v20 = vadd.f32 %v3082_v10, %v5957_v6  ;;  %v3287_v6 = vld [vmem:[#allocation8 + $0x8] sm:$0xff]  ;;  %v4644_v8 = vpack.c.bf16 %v3317_v7, %v3315_v56  ;;  %v3434_v56 = vld [vmem:[#allocation11 + $0x78] sm:$0xff] }
 0x3bb   : > { %v3115_v25 = vmax.f32 %v3081_v38, 0.0  ;;  %v4616_v5 = vpack.c.bf16 %v3289_v4, %v3287_v6  ;;  %v4646_v38 = vpack.c.bf16 %v3316_v57, %v3314_v11  ;;  %v3435_v10 = vld [vmem:[#allocation11 + $0x80] sm:$0xff] }
 0x3bc   : > { %v3116_v14 = vmax.f32 %v3083_v20, 0.0  ;;  %v3436_v20 = vld [vmem:[#allocation11 + $0x88] sm:$0xff] }
 0x3bd   : > { %v4614_v62 = vpack.c.bf16 %v3115_v25, %v3113_v22  ;;  %4617 = vmatprep.subr.bf16.mxu0 %v4616_v5  ;;  %v3419_v22 = vld [vmem:[#allocation11] sm:$0xff]  ;;  %v4648_v25 = vpack.c.bf16 %v3436_v20, %v3435_v10 }
 0x3be   : > { %v4611_v1 = vpack.c.bf16 %v3116_v14, %v3114_v0  ;;  %4619 = vmatpush1.bf16.msra.mxu0 %v4618_v47  ;;  %v3420_v0 = vld [vmem:[#allocation11 + $0x8] sm:$0xff]  ;;  %v4652_v47 = vpack.c.bf16 %v3438_v12, %v3437_v42 }
 0x3bf   : > { %4621 = vmatprep.subr.bf16.mxu0 %v4620_v51  ;;  %v4650_v14 = vpack.c.bf16 %v3420_v0, %v3419_v22  ;;  %v3421_v51 = vld [vmem:[#allocation11 + $0x10] sm:$0xff] }
 0x3c0   : > { %4613 = vmatprep.subr.msk.bf16.mxu1 %vm5835_vm2, %v4611_v1  ;;  %v4654_v31 = vpack.c.bf16 %v3422_v13, %v3421_v51 }
 0x3c1   : > { %4615 = vmatpush1.bf16.xpose.msra.mxu1 %v4614_v62 }
 0x3c2   : > { %4623 = vmatpush1.bf16.msra.mxu0 %v4622_v15  ;;  %4649 = vmatprep.subr.bf16.mxu1 %v4648_v25 }
 0x3c8   : > { %3230 = vmatmul.mubr.f32.vlgmr.msra.gmra.mrb[14].mxu1 %v5104_v48  ;;  %v3297_v48 = vld [vmem:[#allocation8 + $0x58] sm:$0xff] }
 0x3c9   : > { %v4624_v16 = vpack.c.bf16 %v3297_v48, %v3295_v21  ;;  %4651 = vmatpush3.bf16.msra.mxu1 %v4650_v14  ;;  %v3439_v21 = vld [vmem:[#allocation11 + $0xa0] sm:$0xff]  ;;  %v3440_v48 = vld [vmem:[#allocation11 + $0xa8] sm:$0xff] }
 0x3ca   : > { %4653 = vmatprep.subr.bf16.mxu1 %v4652_v47  ;;  %v4656_v15 = vpack.c.bf16 %v3440_v48, %v3439_v21 }
 0x3cb   : > { %4625 = vmatprep.subr.bf16.mxu0 %v4624_v16  ;;  %v3423_v16 = vld [vmem:[#allocation11 + $0x20] sm:$0xff] }
 0x3cd   : > { %4655 = vmatpush3.bf16.msra.mxu1 %v4654_v31 }
 0x3ce   : > { %4657 = vmatprep.subr.bf16.mxu1 %v4656_v15  ;;  %v4096_v15 = vld [vmem:[#allocation12] ss:$0 sm:$0xff] }
 0x3db   : > { %v2235_v59 = vpop.f32.mrb[8].mxu1 }
 0x3dc   : > { %v3246_v49 = vrot.slane %v2235_v59, 4  ;;  %v2237_v2 = vpop.f32.mrb[9].mxu1 }
 0x3de   : > { %v6636_v37 = vsel %vm3263_vm6, %v6606_v32, %v3246_v49  ;;  %v3294_v32 = vld [vmem:[#allocation8 + $0x40] sm:$0xff] }
 0x3df   : > { %v4626_v26 = vpack.c.bf16 %v3296_v33, %v3294_v32  ;;  %v3424_v32 = vld [vmem:[#allocation11 + $0x28] sm:$0xff] }
 0x3e0   : > { %v4658_v33 = vpack.c.bf16 %v3424_v32, %v3423_v16 }
 0x3e1   : > { %4627 = vmatpush1.bf16.msra.mxu0 %v4626_v26  ;;  %v4660_v26 = vpack.c.bf16 %v3442_v58, %v3441_v35 }
 0x3e2   : > { %4629 = vmatprep.subr.bf16.mxu0 %v4628_v60  ;;  %4659 = vmatpush3.bf16.msra.mxu1 %v4658_v33  ;;  %v3425_v60 = vld [vmem:[#allocation11 + $0x30] sm:$0xff] }
 0x3e3   : > { %v4662_v34 = vpack.c.bf16 %v3426_v17, %v3425_v60  ;;  %4661 = vmatprep.subr.bf16.mxu1 %v4660_v26 }
 0x3e5   : > { %4631 = vmatpush1.bf16.msra.mxu0 %v4630_v63  ;;  %v3427_v63 = vld [vmem:[#allocation11 + $0x40] sm:$0xff] }
 0x3e6   : > { %4633 = vmatprep.subr.bf16.mxu0 %v4632_v41  ;;  %v4664_v41 = vpack.c.bf16 %v3444_v36, %v3443_v23  ;;  %4663 = vmatpush3.bf16.msra.mxu1 %v4662_v34  ;;  %v4666_v30 = vpack.c.bf16 %v3428_v50, %v3427_v63 }
 0x3e8   : > { %4665 = vmatprep.subr.bf16.mxu1 %v4664_v41 }
 0x3e9   : > { %4635 = vmatpush1.bf16.msra.mxu0 %v4634_v43  ;;  %v4668_v43 = vpack.c.bf16 %v3446_v39, %v3445_v28 }
 0x3ea   : > { %4637 = vmatprep.subr.bf16.mxu0 %v4636_v3  ;;  %v3429_v3 = vld [vmem:[#allocation11 + $0x50] sm:$0xff]  ;;  %4667 = vmatpush3.bf16.msra.mxu1 %v4666_v30 }
 0x3eb   : > { %v4670_v55 = vpack.c.bf16 %v3430_v18, %v3429_v3  ;;  %4669 = vmatprep.subr.bf16.mxu1 %v4668_v43 }
 0x3ed   : > { %4639 = vmatpush1.bf16.msra.mxu0 %v4638_v29  ;;  %v4672_v29 = vpack.c.bf16 %v3448_v19, %v3447_v24 }
 0x3ee   : > { %4641 = vmatprep.subr.bf16.mxu0 %v4640_v46  ;;  %v3431_v46 = vld [vmem:[#allocation11 + $0x60] sm:$0xff]  ;;  %4671 = vmatpush3.bf16.msra.mxu1 %v4670_v55 }
 0x3ef   : > { %4673 = vmatprep.subr.bf16.mxu1 %v4672_v29 }
 0x3f1   : > { %4643 = vmatpush1.bf16.msra.mxu0 %v4642_v44  ;;  %v3450_v44 = vld [vmem:[#allocation11 + $0xf8] sm:$0xff] }
 0x3f2   : > { %4645 = vmatprep.subr.bf16.mxu0 %v4644_v8  ;;  %v3320_v8 = vlaneseq }
 0x3f4   : > { %v3321_v11 = vshrl.u32 %v3320_v8, 7 }
 0x3f5   : > { %4647 = vmatpush1.bf16.msra.mxu0 %v4646_v38 }
 0x3f6   : > { %v3322_v57 = vsub.s32 0, %v3321_v11  ;;  %v3326_v38 = vsub.s32 1, %v3321_v11 }
 0x41b   : > { %v2567_v52 = vpop.f32.mrb[10].mxu1 }
 0x41c   : > { %v3249_v53 = vrot.slane %v2567_v52, 3  ;;  %v2569_v54 = vpop.f32.mrb[11].mxu1  ;;  %v4674_v52 = vpack.c.bf16 %v3432_v45, %v3431_v46 }
 0x41d   : > { %v3433_v54 = vld [vmem:[#allocation11 + $0x70] sm:$0xff] }
 0x41e   : > { %v3266_v61 = vsel %vm3265_vm7, %v6636_v37, %v3249_v53  ;;  %v4095_v37 = vld [vmem:[#allocation6] ss:$0 sm:$0xff]  ;;  %v4676_v53 = vpack.c.bf16 %v3450_v44, %v3449_v27  ;;  %4675 = vmatpush3.bf16.msra.mxu1 %v4674_v52  ;;  %v4678_v7 = vpack.c.bf16 %v3434_v56, %v3433_v54 }
 0x420   : > { %4677 = vmatprep.subr.bf16.mxu1 %v4676_v53 }
 0x422   : > { %4679 = vmatpush3.bf16.msra.mxu1 %v4678_v7 }
 0x45b   : > { %v2899_v62 = vpop.f32.mrb[12].mxu1 }
 0x45c   : > { %v3252_v1 = vrot.slane %v2899_v62, 2  ;;  %v2901_v59 = vpop.f32.mrb[13].mxu1 }
 0x45e   : > { %v3268_v49 = vsel %vm3267_vm8, %v3266_v61, %v3252_v1  ;;  %v3318_v61 = vld [vmem:[#allocation9] sm:$0x3] }
 0x45f   : > { %v3323_v10 = vrot.slane %v3318_v61, %v3322_v57  ;;  %v3327_v20 = vrot.slane %v3318_v61, %v3326_v38 }
 0x49b   : > { %v3231_v2 = vpop.f32.mrb[14].mxu1 }
 0x49c   : > { %v3255_v6 = vrot.slane %v3231_v2, 1  ;;  %v3233_v4 = vpop.f32.mrb[15].mxu1 }
 0x49e   : > { %v3270_v40 = vsel %vm3269_vm9, %v3268_v49, %v3255_v6 }
 0x49f   : > { %v3284_v5 = vsub.f32 %v3270_v40, %v4095_v37 }
 0x4a1   : > { %v3285_v9 = vmul.f32 0.005, %v3284_v5 }
 0x4a3   : > { %3395 = vmatmul.mubr.f32.vlgmr.msra.gmra.mrb[0].mxu0 %v3285_v9 }
 0x576   : > { %v3396_v22 = vpop.f32.mrb[0].mxu0 }
 0x577   : > { %v3397_v25 = vadd.f32 %v3396_v22, %v3323_v10  ;;  %v3398_v0 = vpop.f32.mrb[1].mxu0 }
 0x578   : > { %v3399_v14 = vadd.f32 %v3398_v0, %v3327_v20 }
 0x579   : > { %v3403_v62 = vmul.f32 0.044715, %v3397_v25  ;;  %v3401_v13 = vmul.f32 0.5, %v3397_v25 }
 0x57a   : > { %v3404_v1 = vmul.f32 0.044715, %v3399_v14  ;;  %v3402_v47 = vmul.f32 0.5, %v3399_v14 }
 0x57b   : > { %v3405_v59 = vmul.f32 %v3403_v62, %v3397_v25 }
 0x57c   : > { %v3406_v49 = vmul.f32 %v3404_v1, %v3399_v14 }
 0x57d   : > { %v3407_v2 = vmul.f32 %v3405_v59, %v3397_v25 }
 0x57e   : > { %v3408_v6 = vmul.f32 %v3406_v49, %v3399_v14 }
 0x57f   : > { %v3409_v37 = vadd.f32 %v3407_v2, %v3397_v25 }
 0x580   : > { %v3410_v4 = vadd.f32 %v3408_v6, %v3399_v14 }
 0x581   : > { %v3411_v40 = vmul.f32 0.7978846, %v3409_v37 }
 0x582   : > { %v3412_v5 = vmul.f32 0.7978846, %v3410_v4 }
 0x583   : > { %4805 = vtanh.f32 %v3411_v40 }
 0x584   : > { %4807 = vtanh.f32 %v3412_v5 }
 0x58d   : > { %v4806_v9 = vpop.eup %4805 }
 0x58e   : > { %v4808_v42 = vpop.eup %4807  ;;  %v3415_v12 = vadd.f32 1.0, %v4806_v9 }
 0x58f   : > { %v3416_v51 = vadd.f32 1.0, %v4808_v42 }
 0x590   : > { %v3417_v21 = vmul.f32 %v3415_v12, %v3401_v13 }
 0x591   : > { %v3418_v31 = vmul.f32 %v3416_v51, %v3402_v47 }
 0x593   : > { %3522 = vmatprep.mubr.f32.mxu1 %v3418_v31 }
 0x594   : > { %3523 = vmatmul.mubr.f32.vlgmr.msra.gmra.mrb[16].mxu1 %v3417_v21 }
 0x667   : > { %v4133_v48 = vpop.f32.mrb[16].mxu1 }
 0x668   : > { %v4134_v16 = vpop.f32.mrb[17].mxu1 }
 0x669   : > { %v4135_v32 = vadd.f32 %v4134_v16, %v4133_v48 }
 0x66b   : > { %v3525_v33 = vadd.f32 %v4135_v32, %v4096_v15 }
 0x66d   : > { %3528 = vst [vmem:[%s407_s13] sm:$0xff] %v3525_v33 }
 0x66e   : > { %5009 = shalt.err (!%p5006_p8)
}
 0x66f   : > { %s5010_s25 = scalar_lea.hbm %s6644_s23, 128  ;;  %s5014_s17 = scalar_lea.hbm %s6701_s8, 256 }
 0x670   : > { %p5011_p9 = scmp.ne.s32.totalorder %s6644_s23, %s5010_s25  ;;  %p5015_p10 = scmp.lt.u32.totalorder %s6644_s23, %s6701_s8 }
 0x671   : > { %p5016_p7 = scmp.lt.u32.totalorder %s5014_s17, %s5010_s25  ;;  %p5018_p6 = scmp.lt.u32.totalorder %s5010_s25, %s6644_s23 }
 0x672   : > { %p5012_p1 = pnand %p5011_p9, %p6734_p2 }
 0x673   : > { %p5017_p13 = por %p5016_p7, %p5015_p10 }
 0x674   : > { %p5013_p3 = pneg %p5012_p1 }
 0x675   : > { %p5019_p5 = por %p5018_p6, %p5017_p13 }
 0x677   : > { %p5020_p4 = pnand %p5019_p5, %p5013_p3 }
 0x679   : > { %5023 = shalt.err (!%p5020_p4)
}
 0x67a   : > { %4705 = dma.vmem_to_hbm [thread:$0]  (%p6734_p2), %s6646_s5, 128, %s6644_s23, %s3530_s11  }
 0x67b PF: > { %s3555_s12 = sand.u32 1, %s5070_s27   ;;  %p6735_p11 = scmp.ne.s32.totalorder %s6726_s21, 0 }
 0x67c   : > { %p6736_p12 = scmp.ge.s32.totalorder %s5090_s10, 2  ;;  %s3556_s13 = scalar_lea.sflag [#allocation5], %s3555_s12 }
 0x67e   : > { %p4728_p0 = pnand %p6736_p12, %p6735_p11 }
 0x680   : > { %5065 = dma.done.wait (!%p4728_p0), %s3556_s13, 128  }
 0x681   : > { %5067 = vsyncadd (!%p4728_p0), %s3556_s13, 4294967168  ;;  %s27_s10 = sadd.s32 1, %s5090_s10   ;;  %s6737_s27 = smov %s5074_s28 }
 0x682   : > { %p24_p8 = scmp.ge.s32.totalorder %s27_s10, 4   ;;  %s6738_s28 = smov %s5078_s29 }
 0x683   : > { %s6739_s29 = smov %s5346_s19  ;;  %s6740_s30 = smov %s5086_s9 }
 0x684   : > { %s6741_s9 = smov %s6743_s15  ;;  %26 = sbr.rel (!%p24_p8) target bundleno = 14 (0xe), region = 132 }
 0x68b   :  { %3561 = vsyncpa [#allocation4], 1 }
 0x68c   :  { %3563 = vsyncpa [#allocation4 + $0x1], 1 }
 0x68d   :  { %3564 = vsyncpa [#allocation7], 1 }
 0x68e   :  { %3565 = vsyncpa [#allocation10], 1 }
 0x68f   :  { %3566 = vsyncpa [#allocation13], 1 }
 0x690   :  { %3567 = vsyncpa [#allocation5], 1 }
 0x691   :  { %3569 = vsyncpa [#allocation5 + $0x1], 1 }

</bundles_post_ra>
